<compile_context>
chip_gen: v7x
topology: tpu7x:2x2x1
jax: 0.10.0
libtpu: 0.0.40
codegen_flags: <defaults>
</compile_context>

<pallas_src>
import numpy as np
import jax
import jax.numpy as jnp
from jax import lax
from jax.experimental import pallas as pl
from jax.experimental.pallas import tpu as pltpu

GATE_LANES = 128          # per-gate lane padding (H=20 -> 128)
EMB_LANES = 128           # contraction padding for E=100 -> 128


# ----------------------------- Pallas kernel ------------------------------ #
def bilstm_kernel(x_ref,        # (T*Bp, Ep)    bf16, time-major rows t*Bp+b
                  wih_ref,      # (Ep, 8*Hp)    bf16, cols [fi,ff,fo,bi,bf,bo,fg,bg]
                  bias_ref,     # (1, 8*Hp)     f32,  b_ih + b_hh, same order
                  whh_ref,      # (2*Hp, 8*Hp)  bf16, block-diag fused recurrent
                  w1_ref,       # (2*Hp, 128)   bf16, head layer-1
                  b1_ref,       # (1, 128)      f32
                  w2_ref,       # (128, 128)    bf16, head layer-2 (only col 0 live)
                  b2_ref,       # (1, 128)      f32
                  out_ref,      # (Bp, 128)     f32,  col 0 = probability
                  gx_ref):      # scratch (T, Bp, 8*Hp) bf16: precomputed input gates
    T, Bp, _ = gx_ref.shape
    Hp = whh_ref.shape[0] // 2

    # One batched GEMM covering every timestep, both directions, all 4 gates.
    # Accumulate in f32, store bf16 (halves per-step gx load bytes / VMEM).
    gx = (jnp.dot(x_ref[...], wih_ref[...], preferred_element_type=jnp.float32)
          + bias_ref[...])
    gx_ref[...] = gx.reshape(T, Bp, 8 * Hp).astype(jnp.bfloat16)

    def step(t, carry):
        hf, cf, hb, cb = carry
        tb = T - 1 - t

        gx_t = gx_ref[t].astype(jnp.float32)     # fwd gates use time t
        gx_b = gx_ref[tb].astype(jnp.float32)    # bwd gates use time T-1-t
        gx_sig = jnp.concatenate(
            [gx_t[:, :3 * Hp], gx_b[:, 3 * Hp:6 * Hp]], axis=1)
        gx_tanh = jnp.concatenate(
            [gx_t[:, 6 * Hp:7 * Hp], gx_b[:, 7 * Hp:]], axis=1)

        # ONE block-diagonal recurrent matmul for BOTH directions (K = 2*Hp).
        h_cat = jnp.concatenate([hf, hb], axis=1).astype(jnp.bfloat16)
        hw = jnp.dot(h_cat, whh_ref[...], preferred_element_type=jnp.float32)

        # ONE sigmoid over the contiguous (i,f,o)x2 slab, ONE tanh over (g)x2.
        s = jax.nn.sigmoid(hw[:, :6 * Hp] + gx_sig)
        tg = jnp.tanh(hw[:, 6 * Hp:] + gx_tanh)

        i_f, f_f, o_f = s[:, :Hp], s[:, Hp:2 * Hp], s[:, 2 * Hp:3 * Hp]
        i_b, f_b, o_b = s[:, 3 * Hp:4 * Hp], s[:, 4 * Hp:5 * Hp], s[:, 5 * Hp:6 * Hp]
        g_f, g_b = tg[:, :Hp], tg[:, Hp:]

        cf2 = f_f * cf + i_f * g_f
        cb2 = f_b * cb + i_b * g_b
        hf2 = o_f * jnp.tanh(cf2)
        hb2 = o_b * jnp.tanh(cb2)
        return hf2, cf2, hb2, cb2

    z0 = jnp.zeros((Bp, Hp), jnp.float32)
    # Live state per step is small (Bp=8 rows -> ~20 vregs); full unroll stays
    # well inside the 64-vreg file.  Drop to unroll=2..4 if Bp grows and the
    # bundle dump shows spill ld/st traffic.
    hf, _, hb, _ = lax.fori_loop(0, T, step, (z0, z0, z0, z0), unroll=True)

    # Feed-forward head (dropout is identity in eval mode); bf16 MXU operands.
    h_all = jnp.concatenate([hf, hb], axis=1).astype(jnp.bfloat16)
    z = (jnp.dot(h_all, w1_ref[...], preferred_element_type=jnp.float32)
         + b1_ref[...])
    z = jnp.maximum(z, 0.0)
    logits = (jnp.dot(z.astype(jnp.bfloat16), w2_ref[...],
                      preferred_element_type=jnp.float32) + b2_ref[...])
    out_ref[...] = jax.nn.sigmoid(logits)


# ------------------------------ param packing ------------------------------ #
def _split_ih(w_ih, H, Hp):
    """(4H, E) PyTorch layout -> 4 right-multiply blocks (E, Hp), order [i,f,g,o]."""
    E = w_ih.shape[1]
    w = jnp.transpose(w_ih.reshape(4, H, E), (0, 2, 1))      # (4, E, H)
    w = jnp.pad(w, ((0, 0), (0, 0), (0, Hp - H)))            # (4, E, Hp)
    return [w[g] for g in range(4)]


def _split_hh(w_hh, H, Hp):
    """(4H, H) PyTorch layout -> 4 right-multiply blocks (Hp, Hp), order [i,f,g,o]."""
    w = jnp.transpose(w_hh.reshape(4, H, H), (0, 2, 1))      # (4, Hin, Hout)
    w = jnp.pad(w, ((0, 0), (0, Hp - H), (0, Hp - H)))       # (4, Hp, Hp)
    return [w[g] for g in range(4)]


def _split_bias(b_ih, b_hh, H, Hp):
    b = jnp.pad((b_ih + b_hh).reshape(4, H), ((0, 0), (0, Hp - H)))   # (4, Hp)
    return [b[g] for g in range(4)]


# ------------------------------ JAX wrapper -------------------------------- #
def init_params(key, vocab_size, embedding_dim=100, hidden_dim=20):
    E, H = embedding_dim, hidden_dim
    ks = jax.random.split(key, 16)
    s = 0.1
    return {
        "embedding": jax.random.normal(ks[0], (vocab_size, E), jnp.float32) * s,
        # PyTorch LSTM parameter shapes (gate order i, f, g, o)
        "w_ih_f": jax.random.normal(ks[1], (4 * H, E), jnp.float32) * s,
        "w_hh_f": jax.random.normal(ks[2], (4 * H, H), jnp.float32) * s,
        "b_ih_f": jax.random.normal(ks[3], (4 * H,), jnp.float32) * s,
        "b_hh_f": jax.random.normal(ks[4], (4 * H,), jnp.float32) * s,
        "w_ih_b": jax.random.normal(ks[5], (4 * H, E), jnp.float32) * s,
        "w_hh_b": jax.random.normal(ks[6], (4 * H, H), jnp.float32) * s,
        "b_ih_b": jax.random.normal(ks[7], (4 * H,), jnp.float32) * s,
        "b_hh_b": jax.random.normal(ks[8], (4 * H,), jnp.float32) * s,
        # feedforward: Linear(2H, H//2), Linear(H//2, 1)
        "w1": jax.random.normal(ks[9], (H // 2, 2 * H), jnp.float32) * s,
        "b1": jax.random.normal(ks[10], (H // 2,), jnp.float32) * s,
        "w2": jax.random.normal(ks[11], (1, H // 2), jnp.float32) * s,
        "b2": jax.random.normal(ks[12], (1,), jnp.float32) * s,
    }


def bilstm_forward(params, input_ids):
    B, T = input_ids.shape
    E = params["embedding"].shape[1]
    H = params["w_hh_f"].shape[1]
    H2 = params["w1"].shape[0]
    Hp = GATE_LANES
    Ep = max(EMB_LANES, ((E + 127) // 128) * 128)
    Bp = max(8, ((B + 7) // 8) * 8)          # pad batch to a sublane multiple

    # Glue: batch pad, embedding gather, time-major flatten, pad E->Ep, bf16.
    ids_p = jnp.zeros((Bp, T), input_ids.dtype).at[:B].set(input_ids)
    emb = jnp.take(params["embedding"], ids_p, axis=0)         # (Bp, T, E)
    x = jnp.transpose(emb, (1, 0, 2)).reshape(T * Bp, E)       # rows: t*Bp + b
    x = jnp.pad(x, ((0, 0), (0, Ep - E))).astype(jnp.bfloat16)

    # Fused gate column order: [fwd i,f,o | bwd i,f,o | fwd g | bwd g],
    # each block Hp lanes wide (PyTorch gate indices i=0, f=1, g=2, o=3).
    ih_f = _split_ih(params["w_ih_f"], H, Hp)
    ih_b = _split_ih(params["w_ih_b"], H, Hp)
    wih = jnp.concatenate([ih_f[0], ih_f[1], ih_f[3],
                           ih_b[0], ih_b[1], ih_b[3],
                           ih_f[2], ih_b[2]], axis=1)          # (E, 8*Hp)
    wih = jnp.pad(wih, ((0, Ep - E), (0, 0))).astype(jnp.bfloat16)

    bf = _split_bias(params["b_ih_f"], params["b_hh_f"], H, Hp)
    bb = _split_bias(params["b_ih_b"], params["b_hh_b"], H, Hp)
    bias = jnp.concatenate([bf[0], bf[1], bf[3], bb[0], bb[1], bb[3],
                            bf[2], bb[2]])[None, :]            # (1, 8*Hp) f32

    # Block-diagonal fused recurrent weights (K = 2*Hp per step).
    hh_f = _split_hh(params["w_hh_f"], H, Hp)
    hh_b = _split_hh(params["w_hh_b"], H, Hp)
    zz = jnp.zeros((Hp, Hp), jnp.float32)
    whh_top = jnp.concatenate([hh_f[0], hh_f[1], hh_f[3], zz, zz, zz,
                               hh_f[2], zz], axis=1)
    whh_bot = jnp.concatenate([zz, zz, zz, hh_b[0], hh_b[1], hh_b[3],
                               zz, hh_b[2]], axis=1)
    whh = jnp.concatenate([whh_top, whh_bot], axis=0).astype(jnp.bfloat16)

    # Head weights, right-multiplied, lane-padded, bf16 (f32 biases).
    w1t = params["w1"].T                                       # (2H, H2)
    w1p = (jnp.zeros((2 * Hp, 128), jnp.float32)
           .at[:H, :H2].set(w1t[:H])
           .at[Hp:Hp + H, :H2].set(w1t[H:])).astype(jnp.bfloat16)
    b1 = jnp.zeros((1, 128), jnp.float32).at[0, :H2].set(params["b1"])
    w2p = (jnp.zeros((128, 128), jnp.float32)
           .at[:H2, 0].set(params["w2"][0])).astype(jnp.bfloat16)
    b2 = jnp.zeros((1, 128), jnp.float32).at[0, 0].set(params["b2"][0])

    # Size the VMEM limit from the actual buffers (+ headroom), not a flat cap.
    args = (x, wih, bias, whh, w1p, b1, w2p, b2)
    arg_bytes = sum(int(np.prod(a.shape)) * np.dtype(a.dtype).itemsize
                    for a in args)
    scratch_bytes = T * Bp * 8 * Hp * 2          # bf16 gx scratch
    out_bytes = Bp * 128 * 4
    vmem_limit = int(2 * (arg_bytes + scratch_bytes + out_bytes)) + (4 << 20)

    vmem = pl.BlockSpec(memory_space=pltpu.MemorySpace.VMEM)
    out = pl.pallas_call(
        bilstm_kernel,
        out_shape=jax.ShapeDtypeStruct((Bp, 128), jnp.float32),
        in_specs=[vmem] * len(args),
        out_specs=vmem,
        scratch_shapes=[pltpu.VMEM((T, Bp, 8 * Hp), jnp.bfloat16)],
        compiler_params=pltpu.CompilerParams(vmem_limit_bytes=vmem_limit),
    )(*args)
    # TODO(synk): on v7x with large B, add a batch grid axis with
    # dimension_semantics=("parallel",) to shard across both TensorCores and
    # tile the gx scratch; on v5e/v6e grow Bp (single tile) before gridding.
    return out[:B, 0]                         # (B,) == probs.squeeze(dim=1)


# ------------------------- pure-JAX reference ------------------------------ #
def bilstm_reference(params, input_ids):
    B, T = input_ids.shape
    H = params["w_hh_f"].shape[1]
    emb = jnp.take(params["embedding"], input_ids, axis=0)     # (B, T, E)

    def run_dir(w_ih, w_hh, b_ih, b_hh, reverse):
        h = jnp.zeros((B, H), jnp.float32)
        c = jnp.zeros((B, H), jnp.float32)
        order = range(T - 1, -1, -1) if reverse else range(T)
        for t in order:
            xt = emb[:, t, :]
            gates = xt @ w_ih.T + h @ w_hh.T + b_ih + b_hh     # (B, 4H)
            i = jax.nn.sigmoid(gates[:, 0 * H:1 * H])
            f = jax.nn.sigmoid(gates[:, 1 * H:2 * H])
            g = jnp.tanh(gates[:, 2 * H:3 * H])
            o = jax.nn.sigmoid(gates[:, 3 * H:4 * H])
            c = f * c + i * g
            h = o * jnp.tanh(c)
        return h

    h_f = run_dir(params["w_ih_f"], params["w_hh_f"],
                  params["b_ih_f"], params["b_hh_f"], False)
    h_b = run_dir(params["w_ih_b"], params["w_hh_b"],
                  params["b_ih_b"], params["b_hh_b"], True)
    feats = jnp.concatenate([h_f, h_b], axis=1)                # (B, 2H)
    z = jnp.maximum(feats @ params["w1"].T + params["b1"], 0.0)
    probs = jax.nn.sigmoid(z @ params["w2"].T + params["b2"])
    return probs[:, 0]


# ---------------------------------- main ----------------------------------- #
if __name__ == "__main__":
    vocab_size, embedding_dim, hidden_dim = 50, 100, 20
    B, T = 2, 8

    key = jax.random.PRNGKey(0)
    k_params, k_ids = jax.random.split(key)
    params = init_params(k_params, vocab_size, embedding_dim, hidden_dim)
    input_ids = jax.random.randint(k_ids, (B, T), 0, vocab_size, dtype=jnp.int32)

    probs = bilstm_forward(params, input_ids)
    probs = jax.block_until_ready(probs)

    ref = jax.block_until_ready(bilstm_reference(params, input_ids))
    assert probs.shape == (B,)
    assert np.all(np.isfinite(np.asarray(probs)))
    # bf16 MXU operands + bf16 gx storage (f32 accumulation / carries) vs f32 ref.
    np.testing.assert_allclose(np.asarray(probs), np.asarray(ref),
                               rtol=2e-2, atol=2e-2)
    print("KERNEL_OK")
</pallas_src>

<mosaic_0001>
module attributes {stable_mosaic.version = 11 : i64} {
  func.func @bilstm_kernel(%arg0: memref<64x128xbf16, #tpu.memory_space<vmem>>, %arg1: memref<128x1024xbf16, #tpu.memory_space<vmem>>, %arg2: memref<1x1024xf32, #tpu.memory_space<vmem>>, %arg3: memref<256x1024xbf16, #tpu.memory_space<vmem>>, %arg4: memref<256x128xbf16, #tpu.memory_space<vmem>>, %arg5: memref<1x128xf32, #tpu.memory_space<vmem>>, %arg6: memref<128x128xbf16, #tpu.memory_space<vmem>>, %arg7: memref<1x128xf32, #tpu.memory_space<vmem>>, %arg8: memref<8x128xf32, #tpu.memory_space<vmem>>, %arg9: memref<8x8x1024xbf16, #tpu.memory_space<vmem>>) attributes {dimension_semantics = [], scalar_prefetch = 0 : i64, scratch_operands = 1 : i64, tpu.core_type = #tpu.core_type<tc>} {
    %c0 = arith.constant 0 : index
    %c0_0 = arith.constant 0 : index
    %0 = vector.load %arg0[%c0, %c0_0] : memref<64x128xbf16, #tpu.memory_space<vmem>>, vector<64x128xbf16>
    %c0_1 = arith.constant 0 : index
    %c0_2 = arith.constant 0 : index
    %1 = vector.load %arg1[%c0_1, %c0_2] : memref<128x1024xbf16, #tpu.memory_space<vmem>>, vector<128x1024xbf16>
    %cst = arith.constant dense<0.000000e+00> : vector<64x1024xf32>
    %2 = tpu.matmul %0, %1, %cst {dimension_numbers = #tpu.dot_dimension_numbers<[1], [0], [0], [1], [0, 0, 1, 1], [], []>} : vector<64x128xbf16>, vector<128x1024xbf16>, vector<64x1024xf32> -> vector<64x1024xf32>
    %c0_3 = arith.constant 0 : index
    %c0_4 = arith.constant 0 : index
    %3 = vector.load %arg2[%c0_3, %c0_4] : memref<1x1024xf32, #tpu.memory_space<vmem>>, vector<1x1024xf32>
    %4 = vector.broadcast %3 : vector<1x1024xf32> to vector<64x1024xf32>
    %5 = arith.addf %2, %4 : vector<64x1024xf32>
    %6 = vector.shape_cast %5 : vector<64x1024xf32> to vector<8x8x1024xf32>
    %7 = arith.truncf %6 : vector<8x8x1024xf32> to vector<8x8x1024xbf16>
    %c0_5 = arith.constant 0 : index
    %c0_6 = arith.constant 0 : index
    %c0_7 = arith.constant 0 : index
    %8 = vector.load %arg9[%c0_5, %c0_6, %c0_7] : memref<8x8x1024xbf16, #tpu.memory_space<vmem>>, vector<8x8x1024xbf16>
    tpu.vector_store %arg9[%c0_5, %c0_6, %c0_7], %7 {strides = array<i32>} : memref<8x8x1024xbf16, #tpu.memory_space<vmem>>, vector<8x8x1024xbf16>,
    %cst_8 = arith.constant 0.000000e+00 : f32
    %9 = vector.broadcast %cst_8 : f32 to vector<8x128xf32>
    %c0_i32 = arith.constant 0 : i32
    %c7_i32 = arith.constant 7 : i32
    %10 = arith.subi %c7_i32, %c0_i32 : i32
    %11 = arith.index_cast %c0_i32 : i32 to index
    %c0_9 = arith.constant 0 : index
    %c0_10 = arith.constant 0 : index
    %12 = vector.load %arg9[%11, %c0_9, %c0_10] : memref<8x8x1024xbf16, #tpu.memory_space<vmem>>, vector<1x8x1024xbf16>
    %13 = vector.shape_cast %12 : vector<1x8x1024xbf16> to vector<8x1024xbf16>
    %14 = arith.extf %13 : vector<8x1024xbf16> to vector<8x1024xf32>
    %15 = arith.index_cast %10 : i32 to index
    %c0_11 = arith.constant 0 : index
    %c0_12 = arith.constant 0 : index
    %16 = vector.load %arg9[%15, %c0_11, %c0_12] : memref<8x8x1024xbf16, #tpu.memory_space<vmem>>, vector<1x8x1024xbf16>
    %17 = vector.shape_cast %16 : vector<1x8x1024xbf16> to vector<8x1024xbf16>
    %18 = arith.extf %17 : vector<8x1024xbf16> to vector<8x1024xf32>
    %19 = vector.extract_strided_slice %14 {offsets = [0, 0], sizes = [8, 384], strides = [1, 1]} : vector<8x1024xf32> to vector<8x384xf32>
    %20 = vector.extract_strided_slice %18 {offsets = [0, 384], sizes = [8, 384], strides = [1, 1]} : vector<8x1024xf32> to vector<8x384xf32>
    %21 = tpu.concatenate %19, %20 in 1 : vector<8x384xf32>, vector<8x384xf32> -> vector<8x768xf32>
    %22 = vector.extract_strided_slice %14 {offsets = [0, 768], sizes = [8, 128], strides = [1, 1]} : vector<8x1024xf32> to vector<8x128xf32>
    %23 = vector.extract_strided_slice %18 {offsets = [0, 896], sizes = [8, 128], strides = [1, 1]} : vector<8x1024xf32> to vector<8x128xf32>
    %24 = tpu.concatenate %22, %23 in 1 : vector<8x128xf32>, vector<8x128xf32> -> vector<8x256xf32>
    %25 = tpu.concatenate %9, %9 in 1 : vector<8x128xf32>, vector<8x128xf32> -> vector<8x256xf32>
    %26 = arith.truncf %25 : vector<8x256xf32> to vector<8x256xbf16>
    %c0_13 = arith.constant 0 : index
    %c0_14 = arith.constant 0 : index
    %27 = vector.load %arg3[%c0_13, %c0_14] : memref<256x1024xbf16, #tpu.memory_space<vmem>>, vector<256x1024xbf16>
    %cst_15 = arith.constant dense<0.000000e+00> : vector<8x1024xf32>
    %28 = tpu.matmul %26, %27, %cst_15 {dimension_numbers = #tpu.dot_dimension_numbers<[1], [0], [0], [1], [0, 0, 1, 1], [], []>} : vector<8x256xbf16>, vector<256x1024xbf16>, vector<8x1024xf32> -> vector<8x1024xf32>
    %29 = vector.extract_strided_slice %28 {offsets = [0, 0], sizes = [8, 768], strides = [1, 1]} : vector<8x1024xf32> to vector<8x768xf32>
    %30 = arith.addf %29, %21 : vector<8x768xf32>
    %31 = arith.negf %30 : vector<8x768xf32>
    %32 = math.exp %31 : vector<8x768xf32>
    %cst_16 = arith.constant 1.000000e+00 : f32
    %33 = vector.broadcast %cst_16 : f32 to vector<8x768xf32>
    %34 = arith.addf %33, %32 : vector<8x768xf32>
    %35 = arith.divf %33, %34 : vector<8x768xf32>
    %36 = vector.extract_strided_slice %28 {offsets = [0, 768], sizes = [8, 256], strides = [1, 1]} : vector<8x1024xf32> to vector<8x256xf32>
    %37 = arith.addf %36, %24 : vector<8x256xf32>
    %38 = math.tanh %37 : vector<8x256xf32>
    %39 = vector.extract_strided_slice %35 {offsets = [0, 0], sizes = [8, 128], strides = [1, 1]} : vector<8x768xf32> to vector<8x128xf32>
    %40 = vector.extract_strided_slice %35 {offsets = [0, 128], sizes = [8, 128], strides = [1, 1]} : vector<8x768xf32> to vector<8x128xf32>
    %41 = vector.extract_strided_slice %35 {offsets = [0, 256], sizes = [8, 128], strides = [1, 1]} : vector<8x768xf32> to vector<8x128xf32>
    %42 = vector.extract_strided_slice %35 {offsets = [0, 384], sizes = [8, 128], strides = [1, 1]} : vector<8x768xf32> to vector<8x128xf32>
    %43 = vector.extract_strided_slice %35 {offsets = [0, 512], sizes = [8, 128], strides = [1, 1]} : vector<8x768xf32> to vector<8x128xf32>
    %44 = vector.extract_strided_slice %35 {offsets = [0, 640], sizes = [8, 128], strides = [1, 1]} : vector<8x768xf32> to vector<8x128xf32>
    %45 = vector.extract_strided_slice %38 {offsets = [0, 0], sizes = [8, 128], strides = [1, 1]} : vector<8x256xf32> to vector<8x128xf32>
    %46 = vector.extract_strided_slice %38 {offsets = [0, 128], sizes = [8, 128], strides = [1, 1]} : vector<8x256xf32> to vector<8x128xf32>
    %47 = arith.mulf %40, %9 : vector<8x128xf32>
    %48 = arith.mulf %39, %45 : vector<8x128xf32>
    %49 = arith.addf %47, %48 : vector<8x128xf32>
    %50 = arith.mulf %43, %9 : vector<8x128xf32>
    %51 = arith.mulf %42, %46 : vector<8x128xf32>
    %52 = arith.addf %50, %51 : vector<8x128xf32>
    %53 = math.tanh %49 : vector<8x128xf32>
    %54 = arith.mulf %41, %53 : vector<8x128xf32>
    %55 = math.tanh %52 : vector<8x128xf32>
    %56 = arith.mulf %44, %55 : vector<8x128xf32>
    %c1_i32 = arith.constant 1 : i32
    %c7_i32_17 = arith.constant 7 : i32
    %57 = arith.subi %c7_i32_17, %c1_i32 : i32
    %58 = arith.index_cast %c1_i32 : i32 to index
    %c0_18 = arith.constant 0 : index
    %c0_19 = arith.constant 0 : index
    %59 = vector.load %arg9[%58, %c0_18, %c0_19] : memref<8x8x1024xbf16, #tpu.memory_space<vmem>>, vector<1x8x1024xbf16>
    %60 = vector.shape_cast %59 : vector<1x8x1024xbf16> to vector<8x1024xbf16>
    %61 = arith.extf %60 : vector<8x1024xbf16> to vector<8x1024xf32>
    %62 = arith.index_cast %57 : i32 to index
    %c0_20 = arith.constant 0 : index
    %c0_21 = arith.constant 0 : index
    %63 = vector.load %arg9[%62, %c0_20, %c0_21] : memref<8x8x1024xbf16, #tpu.memory_space<vmem>>, vector<1x8x1024xbf16>
    %64 = vector.shape_cast %63 : vector<1x8x1024xbf16> to vector<8x1024xbf16>
    %65 = arith.extf %64 : vector<8x1024xbf16> to vector<8x1024xf32>
    %66 = vector.extract_strided_slice %61 {offsets = [0, 0], sizes = [8, 384], strides = [1, 1]} : vector<8x1024xf32> to vector<8x384xf32>
    %67 = vector.extract_strided_slice %65 {offsets = [0, 384], sizes = [8, 384], strides = [1, 1]} : vector<8x1024xf32> to vector<8x384xf32>
    %68 = tpu.concatenate %66, %67 in 1 : vector<8x384xf32>, vector<8x384xf32> -> vector<8x768xf32>
    %69 = vector.extract_strided_slice %61 {offsets = [0, 768], sizes = [8, 128], strides = [1, 1]} : vector<8x1024xf32> to vector<8x128xf32>
    %70 = vector.extract_strided_slice %65 {offsets = [0, 896], sizes = [8, 128], strides = [1, 1]} : vector<8x1024xf32> to vector<8x128xf32>
    %71 = tpu.concatenate %69, %70 in 1 : vector<8x128xf32>, vector<8x128xf32> -> vector<8x256xf32>
    %72 = tpu.concatenate %54, %56 in 1 : vector<8x128xf32>, vector<8x128xf32> -> vector<8x256xf32>
    %73 = arith.truncf %72 : vector<8x256xf32> to vector<8x256xbf16>
    %c0_22 = arith.constant 0 : index
    %c0_23 = arith.constant 0 : index
    %74 = vector.load %arg3[%c0_22, %c0_23] : memref<256x1024xbf16, #tpu.memory_space<vmem>>, vector<256x1024xbf16>
    %cst_24 = arith.constant dense<0.000000e+00> : vector<8x1024xf32>
    %75 = tpu.matmul %73, %74, %cst_24 {dimension_numbers = #tpu.dot_dimension_numbers<[1], [0], [0], [1], [0, 0, 1, 1], [], []>} : vector<8x256xbf16>, vector<256x1024xbf16>, vector<8x1024xf32> -> vector<8x1024xf32>
    %76 = vector.extract_strided_slice %75 {offsets = [0, 0], sizes = [8, 768], strides = [1, 1]} : vector<8x1024xf32> to vector<8x768xf32>
    %77 = arith.addf %76, %68 : vector<8x768xf32>
    %78 = arith.negf %77 : vector<8x768xf32>
    %79 = math.exp %78 : vector<8x768xf32>
    %cst_25 = arith.constant 1.000000e+00 : f32
    %80 = vector.broadcast %cst_25 : f32 to vector<8x768xf32>
    %81 = arith.addf %80, %79 : vector<8x768xf32>
    %82 = arith.divf %80, %81 : vector<8x768xf32>
    %83 = vector.extract_strided_slice %75 {offsets = [0, 768], sizes = [8, 256], strides = [1, 1]} : vector<8x1024xf32> to vector<8x256xf32>
    %84 = arith.addf %83, %71 : vector<8x256xf32>
    %85 = math.tanh %84 : vector<8x256xf32>
    %86 = vector.extract_strided_slice %82 {offsets = [0, 0], sizes = [8, 128], strides = [1, 1]} : vector<8x768xf32> to vector<8x128xf32>
    %87 = vector.extract_strided_slice %82 {offsets = [0, 128], sizes = [8, 128], strides = [1, 1]} : vector<8x768xf32> to vector<8x128xf32>
    %88 = vector.extract_strided_slice %82 {offsets = [0, 256], sizes = [8, 128], strides = [1, 1]} : vector<8x768xf32> to vector<8x128xf32>
    %89 = vector.extract_strided_slice %82 {offsets = [0, 384], sizes = [8, 128], strides = [1, 1]} : vector<8x768xf32> to vector<8x128xf32>
    %90 = vector.extract_strided_slice %82 {offsets = [0, 512], sizes = [8, 128], strides = [1, 1]} : vector<8x768xf32> to vector<8x128xf32>
    %91 = vector.extract_strided_slice %82 {offsets = [0, 640], sizes = [8, 128], strides = [1, 1]} : vector<8x768xf32> to vector<8x128xf32>
    %92 = vector.extract_strided_slice %85 {offsets = [0, 0], sizes = [8, 128], strides = [1, 1]} : vector<8x256xf32> to vector<8x128xf32>
    %93 = vector.extract_strided_slice %85 {offsets = [0, 128], sizes = [8, 128], strides = [1, 1]} : vector<8x256xf32> to vector<8x128xf32>
    %94 = arith.mulf %87, %49 : vector<8x128xf32>
    %95 = arith.mulf %86, %92 : vector<8x128xf32>
    %96 = arith.addf %94, %95 : vector<8x128xf32>
    %97 = arith.mulf %90, %52 : vector<8x128xf32>
    %98 = arith.mulf %89, %93 : vector<8x128xf32>
    %99 = arith.addf %97, %98 : vector<8x128xf32>
    %100 = math.tanh %96 : vector<8x128xf32>
    %101 = arith.mulf %88, %100 : vector<8x128xf32>
    %102 = math.tanh %99 : vector<8x128xf32>
    %103 = arith.mulf %91, %102 : vector<8x128xf32>
    %c2_i32 = arith.constant 2 : i32
    %c7_i32_26 = arith.constant 7 : i32
    %104 = arith.subi %c7_i32_26, %c2_i32 : i32
    %105 = arith.index_cast %c2_i32 : i32 to index
    %c0_27 = arith.constant 0 : index
    %c0_28 = arith.constant 0 : index
    %106 = vector.load %arg9[%105, %c0_27, %c0_28] : memref<8x8x1024xbf16, #tpu.memory_space<vmem>>, vector<1x8x1024xbf16>
    %107 = vector.shape_cast %106 : vector<1x8x1024xbf16> to vector<8x1024xbf16>
    %108 = arith.extf %107 : vector<8x1024xbf16> to vector<8x1024xf32>
    %109 = arith.index_cast %104 : i32 to index
    %c0_29 = arith.constant 0 : index
    %c0_30 = arith.constant 0 : index
    %110 = vector.load %arg9[%109, %c0_29, %c0_30] : memref<8x8x1024xbf16, #tpu.memory_space<vmem>>, vector<1x8x1024xbf16>
    %111 = vector.shape_cast %110 : vector<1x8x1024xbf16> to vector<8x1024xbf16>
    %112 = arith.extf %111 : vector<8x1024xbf16> to vector<8x1024xf32>
    %113 = vector.extract_strided_slice %108 {offsets = [0, 0], sizes = [8, 384], strides = [1, 1]} : vector<8x1024xf32> to vector<8x384xf32>
    %114 = vector.extract_strided_slice %112 {offsets = [0, 384], sizes = [8, 384], strides = [1, 1]} : vector<8x1024xf32> to vector<8x384xf32>
    %115 = tpu.concatenate %113, %114 in 1 : vector<8x384xf32>, vector<8x384xf32> -> vector<8x768xf32>
    %116 = vector.extract_strided_slice %108 {offsets = [0, 768], sizes = [8, 128], strides = [1, 1]} : vector<8x1024xf32> to vector<8x128xf32>
    %117 = vector.extract_strided_slice %112 {offsets = [0, 896], sizes = [8, 128], strides = [1, 1]} : vector<8x1024xf32> to vector<8x128xf32>
    %118 = tpu.concatenate %116, %117 in 1 : vector<8x128xf32>, vector<8x128xf32> -> vector<8x256xf32>
    %119 = tpu.concatenate %101, %103 in 1 : vector<8x128xf32>, vector<8x128xf32> -> vector<8x256xf32>
    %120 = arith.truncf %119 : vector<8x256xf32> to vector<8x256xbf16>
    %c0_31 = arith.constant 0 : index
    %c0_32 = arith.constant 0 : index
    %121 = vector.load %arg3[%c0_31, %c0_32] : memref<256x1024xbf16, #tpu.memory_space<vmem>>, vector<256x1024xbf16>
    %cst_33 = arith.constant dense<0.000000e+00> : vector<8x1024xf32>
    %122 = tpu.matmul %120, %121, %cst_33 {dimension_numbers = #tpu.dot_dimension_numbers<[1], [0], [0], [1], [0, 0, 1, 1], [], []>} : vector<8x256xbf16>, vector<256x1024xbf16>, vector<8x1024xf32> -> vector<8x1024xf32>
    %123 = vector.extract_strided_slice %122 {offsets = [0, 0], sizes = [8, 768], strides = [1, 1]} : vector<8x1024xf32> to vector<8x768xf32>
    %124 = arith.addf %123, %115 : vector<8x768xf32>
    %125 = arith.negf %124 : vector<8x768xf32>
    %126 = math.exp %125 : vector<8x768xf32>
    %cst_34 = arith.constant 1.000000e+00 : f32
    %127 = vector.broadcast %cst_34 : f32 to vector<8x768xf32>
    %128 = arith.addf %127, %126 : vector<8x768xf32>
    %129 = arith.divf %127, %128 : vector<8x768xf32>
    %130 = vector.extract_strided_slice %122 {offsets = [0, 768], sizes = [8, 256], strides = [1, 1]} : vector<8x1024xf32> to vector<8x256xf32>
    %131 = arith.addf %130, %118 : vector<8x256xf32>
    %132 = math.tanh %131 : vector<8x256xf32>
    %133 = vector.extract_strided_slice %129 {offsets = [0, 0], sizes = [8, 128], strides = [1, 1]} : vector<8x768xf32> to vector<8x128xf32>
    %134 = vector.extract_strided_slice %129 {offsets = [0, 128], sizes = [8, 128], strides = [1, 1]} : vector<8x768xf32> to vector<8x128xf32>
    %135 = vector.extract_strided_slice %129 {offsets = [0, 256], sizes = [8, 128], strides = [1, 1]} : vector<8x768xf32> to vector<8x128xf32>
    %136 = vector.extract_strided_slice %129 {offsets = [0, 384], sizes = [8, 128], strides = [1, 1]} : vector<8x768xf32> to vector<8x128xf32>
    %137 = vector.extract_strided_slice %129 {offsets = [0, 512], sizes = [8, 128], strides = [1, 1]} : vector<8x768xf32> to vector<8x128xf32>
    %138 = vector.extract_strided_slice %129 {offsets = [0, 640], sizes = [8, 128], strides = [1, 1]} : vector<8x768xf32> to vector<8x128xf32>
    %139 = vector.extract_strided_slice %132 {offsets = [0, 0], sizes = [8, 128], strides = [1, 1]} : vector<8x256xf32> to vector<8x128xf32>
    %140 = vector.extract_strided_slice %132 {offsets = [0, 128], sizes = [8, 128], strides = [1, 1]} : vector<8x256xf32> to vector<8x128xf32>
    %141 = arith.mulf %134, %96 : vector<8x128xf32>
    %142 = arith.mulf %133, %139 : vector<8x128xf32>
    %143 = arith.addf %141, %142 : vector<8x128xf32>
    %144 = arith.mulf %137, %99 : vector<8x128xf32>
    %145 = arith.mulf %136, %140 : vector<8x128xf32>
    %146 = arith.addf %144, %145 : vector<8x128xf32>
    %147 = math.tanh %143 : vector<8x128xf32>
    %148 = arith.mulf %135, %147 : vector<8x128xf32>
    %149 = math.tanh %146 : vector<8x128xf32>
    %150 = arith.mulf %138, %149 : vector<8x128xf32>
    %c3_i32 = arith.constant 3 : i32
    %c7_i32_35 = arith.constant 7 : i32
    %151 = arith.subi %c7_i32_35, %c3_i32 : i32
    %152 = arith.index_cast %c3_i32 : i32 to index
    %c0_36 = arith.constant 0 : index
    %c0_37 = arith.constant 0 : index
    %153 = vector.load %arg9[%152, %c0_36, %c0_37] : memref<8x8x1024xbf16, #tpu.memory_space<vmem>>, vector<1x8x1024xbf16>
    %154 = vector.shape_cast %153 : vector<1x8x1024xbf16> to vector<8x1024xbf16>
    %155 = arith.extf %154 : vector<8x1024xbf16> to vector<8x1024xf32>
    %156 = arith.index_cast %151 : i32 to index
    %c0_38 = arith.constant 0 : index
    %c0_39 = arith.constant 0 : index
    %157 = vector.load %arg9[%156, %c0_38, %c0_39] : memref<8x8x1024xbf16, #tpu.memory_space<vmem>>, vector<1x8x1024xbf16>
    %158 = vector.shape_cast %157 : vector<1x8x1024xbf16> to vector<8x1024xbf16>
    %159 = arith.extf %158 : vector<8x1024xbf16> to vector<8x1024xf32>
    %160 = vector.extract_strided_slice %155 {offsets = [0, 0], sizes = [8, 384], strides = [1, 1]} : vector<8x1024xf32> to vector<8x384xf32>
    %161 = vector.extract_strided_slice %159 {offsets = [0, 384], sizes = [8, 384], strides = [1, 1]} : vector<8x1024xf32> to vector<8x384xf32>
    %162 = tpu.concatenate %160, %161 in 1 : vector<8x384xf32>, vector<8x384xf32> -> vector<8x768xf32>
    %163 = vector.extract_strided_slice %155 {offsets = [0, 768], sizes = [8, 128], strides = [1, 1]} : vector<8x1024xf32> to vector<8x128xf32>
    %164 = vector.extract_strided_slice %159 {offsets = [0, 896], sizes = [8, 128], strides = [1, 1]} : vector<8x1024xf32> to vector<8x128xf32>
    %165 = tpu.concatenate %163, %164 in 1 : vector<8x128xf32>, vector<8x128xf32> -> vector<8x256xf32>
    %166 = tpu.concatenate %148, %150 in 1 : vector<8x128xf32>, vector<8x128xf32> -> vector<8x256xf32>
    %167 = arith.truncf %166 : vector<8x256xf32> to vector<8x256xbf16>
    %c0_40 = arith.constant 0 : index
    %c0_41 = arith.constant 0 : index
    %168 = vector.load %arg3[%c0_40, %c0_41] : memref<256x1024xbf16, #tpu.memory_space<vmem>>, vector<256x1024xbf16>
    %cst_42 = arith.constant dense<0.000000e+00> : vector<8x1024xf32>
    %169 = tpu.matmul %167, %168, %cst_42 {dimension_numbers = #tpu.dot_dimension_numbers<[1], [0], [0], [1], [0, 0, 1, 1], [], []>} : vector<8x256xbf16>, vector<256x1024xbf16>, vector<8x1024xf32> -> vector<8x1024xf32>
    %170 = vector.extract_strided_slice %169 {offsets = [0, 0], sizes = [8, 768], strides = [1, 1]} : vector<8x1024xf32> to vector<8x768xf32>
    %171 = arith.addf %170, %162 : vector<8x768xf32>
    %172 = arith.negf %171 : vector<8x768xf32>
    %173 = math.exp %172 : vector<8x768xf32>
    %cst_43 = arith.constant 1.000000e+00 : f32
    %174 = vector.broadcast %cst_43 : f32 to vector<8x768xf32>
    %175 = arith.addf %174, %173 : vector<8x768xf32>
    %176 = arith.divf %174, %175 : vector<8x768xf32>
    %177 = vector.extract_strided_slice %169 {offsets = [0, 768], sizes = [8, 256], strides = [1, 1]} : vector<8x1024xf32> to vector<8x256xf32>
    %178 = arith.addf %177, %165 : vector<8x256xf32>
    %179 = math.tanh %178 : vector<8x256xf32>
    %180 = vector.extract_strided_slice %176 {offsets = [0, 0], sizes = [8, 128], strides = [1, 1]} : vector<8x768xf32> to vector<8x128xf32>
    %181 = vector.extract_strided_slice %176 {offsets = [0, 128], sizes = [8, 128], strides = [1, 1]} : vector<8x768xf32> to vector<8x128xf32>
    %182 = vector.extract_strided_slice %176 {offsets = [0, 256], sizes = [8, 128], strides = [1, 1]} : vector<8x768xf32> to vector<8x128xf32>
    %183 = vector.extract_strided_slice %176 {offsets = [0, 384], sizes = [8, 128], strides = [1, 1]} : vector<8x768xf32> to vector<8x128xf32>
    %184 = vector.extract_strided_slice %176 {offsets = [0, 512], sizes = [8, 128], strides = [1, 1]} : vector<8x768xf32> to vector<8x128xf32>
    %185 = vector.extract_strided_slice %176 {offsets = [0, 640], sizes = [8, 128], strides = [1, 1]} : vector<8x768xf32> to vector<8x128xf32>
    %186 = vector.extract_strided_slice %179 {offsets = [0, 0], sizes = [8, 128], strides = [1, 1]} : vector<8x256xf32> to vector<8x128xf32>
    %187 = vector.extract_strided_slice %179 {offsets = [0, 128], sizes = [8, 128], strides = [1, 1]} : vector<8x256xf32> to vector<8x128xf32>
    %188 = arith.mulf %181, %143 : vector<8x128xf32>
    %189 = arith.mulf %180, %186 : vector<8x128xf32>
    %190 = arith.addf %188, %189 : vector<8x128xf32>
    %191 = arith.mulf %184, %146 : vector<8x128xf32>
    %192 = arith.mulf %183, %187 : vector<8x128xf32>
    %193 = arith.addf %191, %192 : vector<8x128xf32>
    %194 = math.tanh %190 : vector<8x128xf32>
    %195 = arith.mulf %182, %194 : vector<8x128xf32>
    %196 = math.tanh %193 : vector<8x128xf32>
    %197 = arith.mulf %185, %196 : vector<8x128xf32>
    %c4_i32 = arith.constant 4 : i32
    %c7_i32_44 = arith.constant 7 : i32
    %198 = arith.subi %c7_i32_44, %c4_i32 : i32
    %199 = arith.index_cast %c4_i32 : i32 to index
    %c0_45 = arith.constant 0 : index
    %c0_46 = arith.constant 0 : index
    %200 = vector.load %arg9[%199, %c0_45, %c0_46] : memref<8x8x1024xbf16, #tpu.memory_space<vmem>>, vector<1x8x1024xbf16>
    %201 = vector.shape_cast %200 : vector<1x8x1024xbf16> to vector<8x1024xbf16>
    %202 = arith.extf %201 : vector<8x1024xbf16> to vector<8x1024xf32>
    %203 = arith.index_cast %198 : i32 to index
    %c0_47 = arith.constant 0 : index
    %c0_48 = arith.constant 0 : index
    %204 = vector.load %arg9[%203, %c0_47, %c0_48] : memref<8x8x1024xbf16, #tpu.memory_space<vmem>>, vector<1x8x1024xbf16>
    %205 = vector.shape_cast %204 : vector<1x8x1024xbf16> to vector<8x1024xbf16>
    %206 = arith.extf %205 : vector<8x1024xbf16> to vector<8x1024xf32>
    %207 = vector.extract_strided_slice %202 {offsets = [0, 0], sizes = [8, 384], strides = [1, 1]} : vector<8x1024xf32> to vector<8x384xf32>
    %208 = vector.extract_strided_slice %206 {offsets = [0, 384], sizes = [8, 384], strides = [1, 1]} : vector<8x1024xf32> to vector<8x384xf32>
    %209 = tpu.concatenate %207, %208 in 1 : vector<8x384xf32>, vector<8x384xf32> -> vector<8x768xf32>
    %210 = vector.extract_strided_slice %202 {offsets = [0, 768], sizes = [8, 128], strides = [1, 1]} : vector<8x1024xf32> to vector<8x128xf32>
    %211 = vector.extract_strided_slice %206 {offsets = [0, 896], sizes = [8, 128], strides = [1, 1]} : vector<8x1024xf32> to vector<8x128xf32>
    %212 = tpu.concatenate %210, %211 in 1 : vector<8x128xf32>, vector<8x128xf32> -> vector<8x256xf32>
    %213 = tpu.concatenate %195, %197 in 1 : vector<8x128xf32>, vector<8x128xf32> -> vector<8x256xf32>
    %214 = arith.truncf %213 : vector<8x256xf32> to vector<8x256xbf16>
    %c0_49 = arith.constant 0 : index
    %c0_50 = arith.constant 0 : index
    %215 = vector.load %arg3[%c0_49, %c0_50] : memref<256x1024xbf16, #tpu.memory_space<vmem>>, vector<256x1024xbf16>
    %cst_51 = arith.constant dense<0.000000e+00> : vector<8x1024xf32>
    %216 = tpu.matmul %214, %215, %cst_51 {dimension_numbers = #tpu.dot_dimension_numbers<[1], [0], [0], [1], [0, 0, 1, 1], [], []>} : vector<8x256xbf16>, vector<256x1024xbf16>, vector<8x1024xf32> -> vector<8x1024xf32>
    %217 = vector.extract_strided_slice %216 {offsets = [0, 0], sizes = [8, 768], strides = [1, 1]} : vector<8x1024xf32> to vector<8x768xf32>
    %218 = arith.addf %217, %209 : vector<8x768xf32>
    %219 = arith.negf %218 : vector<8x768xf32>
    %220 = math.exp %219 : vector<8x768xf32>
    %cst_52 = arith.constant 1.000000e+00 : f32
    %221 = vector.broadcast %cst_52 : f32 to vector<8x768xf32>
    %222 = arith.addf %221, %220 : vector<8x768xf32>
    %223 = arith.divf %221, %222 : vector<8x768xf32>
    %224 = vector.extract_strided_slice %216 {offsets = [0, 768], sizes = [8, 256], strides = [1, 1]} : vector<8x1024xf32> to vector<8x256xf32>
    %225 = arith.addf %224, %212 : vector<8x256xf32>
    %226 = math.tanh %225 : vector<8x256xf32>
    %227 = vector.extract_strided_slice %223 {offsets = [0, 0], sizes = [8, 128], strides = [1, 1]} : vector<8x768xf32> to vector<8x128xf32>
    %228 = vector.extract_strided_slice %223 {offsets = [0, 128], sizes = [8, 128], strides = [1, 1]} : vector<8x768xf32> to vector<8x128xf32>
    %229 = vector.extract_strided_slice %223 {offsets = [0, 256], sizes = [8, 128], strides = [1, 1]} : vector<8x768xf32> to vector<8x128xf32>
    %230 = vector.extract_strided_slice %223 {offsets = [0, 384], sizes = [8, 128], strides = [1, 1]} : vector<8x768xf32> to vector<8x128xf32>
    %231 = vector.extract_strided_slice %223 {offsets = [0, 512], sizes = [8, 128], strides = [1, 1]} : vector<8x768xf32> to vector<8x128xf32>
    %232 = vector.extract_strided_slice %223 {offsets = [0, 640], sizes = [8, 128], strides = [1, 1]} : vector<8x768xf32> to vector<8x128xf32>
    %233 = vector.extract_strided_slice %226 {offsets = [0, 0], sizes = [8, 128], strides = [1, 1]} : vector<8x256xf32> to vector<8x128xf32>
    %234 = vector.extract_strided_slice %226 {offsets = [0, 128], sizes = [8, 128], strides = [1, 1]} : vector<8x256xf32> to vector<8x128xf32>
    %235 = arith.mulf %228, %190 : vector<8x128xf32>
    %236 = arith.mulf %227, %233 : vector<8x128xf32>
    %237 = arith.addf %235, %236 : vector<8x128xf32>
    %238 = arith.mulf %231, %193 : vector<8x128xf32>
    %239 = arith.mulf %230, %234 : vector<8x128xf32>
    %240 = arith.addf %238, %239 : vector<8x128xf32>
    %241 = math.tanh %237 : vector<8x128xf32>
    %242 = arith.mulf %229, %241 : vector<8x128xf32>
    %243 = math.tanh %240 : vector<8x128xf32>
    %244 = arith.mulf %232, %243 : vector<8x128xf32>
    %c5_i32 = arith.constant 5 : i32
    %c7_i32_53 = arith.constant 7 : i32
    %245 = arith.subi %c7_i32_53, %c5_i32 : i32
    %246 = arith.index_cast %c5_i32 : i32 to index
    %c0_54 = arith.constant 0 : index
    %c0_55 = arith.constant 0 : index
    %247 = vector.load %arg9[%246, %c0_54, %c0_55] : memref<8x8x1024xbf16, #tpu.memory_space<vmem>>, vector<1x8x1024xbf16>
    %248 = vector.shape_cast %247 : vector<1x8x1024xbf16> to vector<8x1024xbf16>
    %249 = arith.extf %248 : vector<8x1024xbf16> to vector<8x1024xf32>
    %250 = arith.index_cast %245 : i32 to index
    %c0_56 = arith.constant 0 : index
    %c0_57 = arith.constant 0 : index
    %251 = vector.load %arg9[%250, %c0_56, %c0_57] : memref<8x8x1024xbf16, #tpu.memory_space<vmem>>, vector<1x8x1024xbf16>
    %252 = vector.shape_cast %251 : vector<1x8x1024xbf16> to vector<8x1024xbf16>
    %253 = arith.extf %252 : vector<8x1024xbf16> to vector<8x1024xf32>
    %254 = vector.extract_strided_slice %249 {offsets = [0, 0], sizes = [8, 384], strides = [1, 1]} : vector<8x1024xf32> to vector<8x384xf32>
    %255 = vector.extract_strided_slice %253 {offsets = [0, 384], sizes = [8, 384], strides = [1, 1]} : vector<8x1024xf32> to vector<8x384xf32>
    %256 = tpu.concatenate %254, %255 in 1 : vector<8x384xf32>, vector<8x384xf32> -> vector<8x768xf32>
    %257 = vector.extract_strided_slice %249 {offsets = [0, 768], sizes = [8, 128], strides = [1, 1]} : vector<8x1024xf32> to vector<8x128xf32>
    %258 = vector.extract_strided_slice %253 {offsets = [0, 896], sizes = [8, 128], strides = [1, 1]} : vector<8x1024xf32> to vector<8x128xf32>
    %259 = tpu.concatenate %257, %258 in 1 : vector<8x128xf32>, vector<8x128xf32> -> vector<8x256xf32>
    %260 = tpu.concatenate %242, %244 in 1 : vector<8x128xf32>, vector<8x128xf32> -> vector<8x256xf32>
    %261 = arith.truncf %260 : vector<8x256xf32> to vector<8x256xbf16>
    %c0_58 = arith.constant 0 : index
    %c0_59 = arith.constant 0 : index
    %262 = vector.load %arg3[%c0_58, %c0_59] : memref<256x1024xbf16, #tpu.memory_space<vmem>>, vector<256x1024xbf16>
    %cst_60 = arith.constant dense<0.000000e+00> : vector<8x1024xf32>
    %263 = tpu.matmul %261, %262, %cst_60 {dimension_numbers = #tpu.dot_dimension_numbers<[1], [0], [0], [1], [0, 0, 1, 1], [], []>} : vector<8x256xbf16>, vector<256x1024xbf16>, vector<8x1024xf32> -> vector<8x1024xf32>
    %264 = vector.extract_strided_slice %263 {offsets = [0, 0], sizes = [8, 768], strides = [1, 1]} : vector<8x1024xf32> to vector<8x768xf32>
    %265 = arith.addf %264, %256 : vector<8x768xf32>
    %266 = arith.negf %265 : vector<8x768xf32>
    %267 = math.exp %266 : vector<8x768xf32>
    %cst_61 = arith.constant 1.000000e+00 : f32
    %268 = vector.broadcast %cst_61 : f32 to vector<8x768xf32>
    %269 = arith.addf %268, %267 : vector<8x768xf32>
    %270 = arith.divf %268, %269 : vector<8x768xf32>
    %271 = vector.extract_strided_slice %263 {offsets = [0, 768], sizes = [8, 256], strides = [1, 1]} : vector<8x1024xf32> to vector<8x256xf32>
    %272 = arith.addf %271, %259 : vector<8x256xf32>
    %273 = math.tanh %272 : vector<8x256xf32>
    %274 = vector.extract_strided_slice %270 {offsets = [0, 0], sizes = [8, 128], strides = [1, 1]} : vector<8x768xf32> to vector<8x128xf32>
    %275 = vector.extract_strided_slice %270 {offsets = [0, 128], sizes = [8, 128], strides = [1, 1]} : vector<8x768xf32> to vector<8x128xf32>
    %276 = vector.extract_strided_slice %270 {offsets = [0, 256], sizes = [8, 128], strides = [1, 1]} : vector<8x768xf32> to vector<8x128xf32>
    %277 = vector.extract_strided_slice %270 {offsets = [0, 384], sizes = [8, 128], strides = [1, 1]} : vector<8x768xf32> to vector<8x128xf32>
    %278 = vector.extract_strided_slice %270 {offsets = [0, 512], sizes = [8, 128], strides = [1, 1]} : vector<8x768xf32> to vector<8x128xf32>
    %279 = vector.extract_strided_slice %270 {offsets = [0, 640], sizes = [8, 128], strides = [1, 1]} : vector<8x768xf32> to vector<8x128xf32>
    %280 = vector.extract_strided_slice %273 {offsets = [0, 0], sizes = [8, 128], strides = [1, 1]} : vector<8x256xf32> to vector<8x128xf32>
    %281 = vector.extract_strided_slice %273 {offsets = [0, 128], sizes = [8, 128], strides = [1, 1]} : vector<8x256xf32> to vector<8x128xf32>
    %282 = arith.mulf %275, %237 : vector<8x128xf32>
    %283 = arith.mulf %274, %280 : vector<8x128xf32>
    %284 = arith.addf %282, %283 : vector<8x128xf32>
    %285 = arith.mulf %278, %240 : vector<8x128xf32>
    %286 = arith.mulf %277, %281 : vector<8x128xf32>
    %287 = arith.addf %285, %286 : vector<8x128xf32>
    %288 = math.tanh %284 : vector<8x128xf32>
    %289 = arith.mulf %276, %288 : vector<8x128xf32>
    %290 = math.tanh %287 : vector<8x128xf32>
    %291 = arith.mulf %279, %290 : vector<8x128xf32>
    %c6_i32 = arith.constant 6 : i32
    %c7_i32_62 = arith.constant 7 : i32
    %292 = arith.subi %c7_i32_62, %c6_i32 : i32
    %293 = arith.index_cast %c6_i32 : i32 to index
    %c0_63 = arith.constant 0 : index
    %c0_64 = arith.constant 0 : index
    %294 = vector.load %arg9[%293, %c0_63, %c0_64] : memref<8x8x1024xbf16, #tpu.memory_space<vmem>>, vector<1x8x1024xbf16>
    %295 = vector.shape_cast %294 : vector<1x8x1024xbf16> to vector<8x1024xbf16>
    %296 = arith.extf %295 : vector<8x1024xbf16> to vector<8x1024xf32>
    %297 = arith.index_cast %292 : i32 to index
    %c0_65 = arith.constant 0 : index
    %c0_66 = arith.constant 0 : index
    %298 = vector.load %arg9[%297, %c0_65, %c0_66] : memref<8x8x1024xbf16, #tpu.memory_space<vmem>>, vector<1x8x1024xbf16>
    %299 = vector.shape_cast %298 : vector<1x8x1024xbf16> to vector<8x1024xbf16>
    %300 = arith.extf %299 : vector<8x1024xbf16> to vector<8x1024xf32>
    %301 = vector.extract_strided_slice %296 {offsets = [0, 0], sizes = [8, 384], strides = [1, 1]} : vector<8x1024xf32> to vector<8x384xf32>
    %302 = vector.extract_strided_slice %300 {offsets = [0, 384], sizes = [8, 384], strides = [1, 1]} : vector<8x1024xf32> to vector<8x384xf32>
    %303 = tpu.concatenate %301, %302 in 1 : vector<8x384xf32>, vector<8x384xf32> -> vector<8x768xf32>
    %304 = vector.extract_strided_slice %296 {offsets = [0, 768], sizes = [8, 128], strides = [1, 1]} : vector<8x1024xf32> to vector<8x128xf32>
    %305 = vector.extract_strided_slice %300 {offsets = [0, 896], sizes = [8, 128], strides = [1, 1]} : vector<8x1024xf32> to vector<8x128xf32>
    %306 = tpu.concatenate %304, %305 in 1 : vector<8x128xf32>, vector<8x128xf32> -> vector<8x256xf32>
    %307 = tpu.concatenate %289, %291 in 1 : vector<8x128xf32>, vector<8x128xf32> -> vector<8x256xf32>
    %308 = arith.truncf %307 : vector<8x256xf32> to vector<8x256xbf16>
    %c0_67 = arith.constant 0 : index
    %c0_68 = arith.constant 0 : index
    %309 = vector.load %arg3[%c0_67, %c0_68] : memref<256x1024xbf16, #tpu.memory_space<vmem>>, vector<256x1024xbf16>
    %cst_69 = arith.constant dense<0.000000e+00> : vector<8x1024xf32>
    %310 = tpu.matmul %308, %309, %cst_69 {dimension_numbers = #tpu.dot_dimension_numbers<[1], [0], [0], [1], [0, 0, 1, 1], [], []>} : vector<8x256xbf16>, vector<256x1024xbf16>, vector<8x1024xf32> -> vector<8x1024xf32>
    %311 = vector.extract_strided_slice %310 {offsets = [0, 0], sizes = [8, 768], strides = [1, 1]} : vector<8x1024xf32> to vector<8x768xf32>
    %312 = arith.addf %311, %303 : vector<8x768xf32>
    %313 = arith.negf %312 : vector<8x768xf32>
    %314 = math.exp %313 : vector<8x768xf32>
    %cst_70 = arith.constant 1.000000e+00 : f32
    %315 = vector.broadcast %cst_70 : f32 to vector<8x768xf32>
    %316 = arith.addf %315, %314 : vector<8x768xf32>
    %317 = arith.divf %315, %316 : vector<8x768xf32>
    %318 = vector.extract_strided_slice %310 {offsets = [0, 768], sizes = [8, 256], strides = [1, 1]} : vector<8x1024xf32> to vector<8x256xf32>
    %319 = arith.addf %318, %306 : vector<8x256xf32>
    %320 = math.tanh %319 : vector<8x256xf32>
    %321 = vector.extract_strided_slice %317 {offsets = [0, 0], sizes = [8, 128], strides = [1, 1]} : vector<8x768xf32> to vector<8x128xf32>
    %322 = vector.extract_strided_slice %317 {offsets = [0, 128], sizes = [8, 128], strides = [1, 1]} : vector<8x768xf32> to vector<8x128xf32>
    %323 = vector.extract_strided_slice %317 {offsets = [0, 256], sizes = [8, 128], strides = [1, 1]} : vector<8x768xf32> to vector<8x128xf32>
    %324 = vector.extract_strided_slice %317 {offsets = [0, 384], sizes = [8, 128], strides = [1, 1]} : vector<8x768xf32> to vector<8x128xf32>
    %325 = vector.extract_strided_slice %317 {offsets = [0, 512], sizes = [8, 128], strides = [1, 1]} : vector<8x768xf32> to vector<8x128xf32>
    %326 = vector.extract_strided_slice %317 {offsets = [0, 640], sizes = [8, 128], strides = [1, 1]} : vector<8x768xf32> to vector<8x128xf32>
    %327 = vector.extract_strided_slice %320 {offsets = [0, 0], sizes = [8, 128], strides = [1, 1]} : vector<8x256xf32> to vector<8x128xf32>
    %328 = vector.extract_strided_slice %320 {offsets = [0, 128], sizes = [8, 128], strides = [1, 1]} : vector<8x256xf32> to vector<8x128xf32>
    %329 = arith.mulf %322, %284 : vector<8x128xf32>
    %330 = arith.mulf %321, %327 : vector<8x128xf32>
    %331 = arith.addf %329, %330 : vector<8x128xf32>
    %332 = arith.mulf %325, %287 : vector<8x128xf32>
    %333 = arith.mulf %324, %328 : vector<8x128xf32>
    %334 = arith.addf %332, %333 : vector<8x128xf32>
    %335 = math.tanh %331 : vector<8x128xf32>
    %336 = arith.mulf %323, %335 : vector<8x128xf32>
    %337 = math.tanh %334 : vector<8x128xf32>
    %338 = arith.mulf %326, %337 : vector<8x128xf32>
    %c7_i32_71 = arith.constant 7 : i32
    %c7_i32_72 = arith.constant 7 : i32
    %339 = arith.subi %c7_i32_72, %c7_i32_71 : i32
    %340 = arith.index_cast %c7_i32_71 : i32 to index
    %c0_73 = arith.constant 0 : index
    %c0_74 = arith.constant 0 : index
    %341 = vector.load %arg9[%340, %c0_73, %c0_74] : memref<8x8x1024xbf16, #tpu.memory_space<vmem>>, vector<1x8x1024xbf16>
    %342 = vector.shape_cast %341 : vector<1x8x1024xbf16> to vector<8x1024xbf16>
    %343 = arith.extf %342 : vector<8x1024xbf16> to vector<8x1024xf32>
    %344 = arith.index_cast %339 : i32 to index
    %c0_75 = arith.constant 0 : index
    %c0_76 = arith.constant 0 : index
    %345 = vector.load %arg9[%344, %c0_75, %c0_76] : memref<8x8x1024xbf16, #tpu.memory_space<vmem>>, vector<1x8x1024xbf16>
    %346 = vector.shape_cast %345 : vector<1x8x1024xbf16> to vector<8x1024xbf16>
    %347 = arith.extf %346 : vector<8x1024xbf16> to vector<8x1024xf32>
    %348 = vector.extract_strided_slice %343 {offsets = [0, 0], sizes = [8, 384], strides = [1, 1]} : vector<8x1024xf32> to vector<8x384xf32>
    %349 = vector.extract_strided_slice %347 {offsets = [0, 384], sizes = [8, 384], strides = [1, 1]} : vector<8x1024xf32> to vector<8x384xf32>
    %350 = tpu.concatenate %348, %349 in 1 : vector<8x384xf32>, vector<8x384xf32> -> vector<8x768xf32>
    %351 = vector.extract_strided_slice %343 {offsets = [0, 768], sizes = [8, 128], strides = [1, 1]} : vector<8x1024xf32> to vector<8x128xf32>
    %352 = vector.extract_strided_slice %347 {offsets = [0, 896], sizes = [8, 128], strides = [1, 1]} : vector<8x1024xf32> to vector<8x128xf32>
    %353 = tpu.concatenate %351, %352 in 1 : vector<8x128xf32>, vector<8x128xf32> -> vector<8x256xf32>
    %354 = tpu.concatenate %336, %338 in 1 : vector<8x128xf32>, vector<8x128xf32> -> vector<8x256xf32>
    %355 = arith.truncf %354 : vector<8x256xf32> to vector<8x256xbf16>
    %c0_77 = arith.constant 0 : index
    %c0_78 = arith.constant 0 : index
    %356 = vector.load %arg3[%c0_77, %c0_78] : memref<256x1024xbf16, #tpu.memory_space<vmem>>, vector<256x1024xbf16>
    %cst_79 = arith.constant dense<0.000000e+00> : vector<8x1024xf32>
    %357 = tpu.matmul %355, %356, %cst_79 {dimension_numbers = #tpu.dot_dimension_numbers<[1], [0], [0], [1], [0, 0, 1, 1], [], []>} : vector<8x256xbf16>, vector<256x1024xbf16>, vector<8x1024xf32> -> vector<8x1024xf32>
    %358 = vector.extract_strided_slice %357 {offsets = [0, 0], sizes = [8, 768], strides = [1, 1]} : vector<8x1024xf32> to vector<8x768xf32>
    %359 = arith.addf %358, %350 : vector<8x768xf32>
    %360 = arith.negf %359 : vector<8x768xf32>
    %361 = math.exp %360 : vector<8x768xf32>
    %cst_80 = arith.constant 1.000000e+00 : f32
    %362 = vector.broadcast %cst_80 : f32 to vector<8x768xf32>
    %363 = arith.addf %362, %361 : vector<8x768xf32>
    %364 = arith.divf %362, %363 : vector<8x768xf32>
    %365 = vector.extract_strided_slice %357 {offsets = [0, 768], sizes = [8, 256], strides = [1, 1]} : vector<8x1024xf32> to vector<8x256xf32>
    %366 = arith.addf %365, %353 : vector<8x256xf32>
    %367 = math.tanh %366 : vector<8x256xf32>
    %368 = vector.extract_strided_slice %364 {offsets = [0, 0], sizes = [8, 128], strides = [1, 1]} : vector<8x768xf32> to vector<8x128xf32>
    %369 = vector.extract_strided_slice %364 {offsets = [0, 128], sizes = [8, 128], strides = [1, 1]} : vector<8x768xf32> to vector<8x128xf32>
    %370 = vector.extract_strided_slice %364 {offsets = [0, 256], sizes = [8, 128], strides = [1, 1]} : vector<8x768xf32> to vector<8x128xf32>
    %371 = vector.extract_strided_slice %364 {offsets = [0, 384], sizes = [8, 128], strides = [1, 1]} : vector<8x768xf32> to vector<8x128xf32>
    %372 = vector.extract_strided_slice %364 {offsets = [0, 512], sizes = [8, 128], strides = [1, 1]} : vector<8x768xf32> to vector<8x128xf32>
    %373 = vector.extract_strided_slice %364 {offsets = [0, 640], sizes = [8, 128], strides = [1, 1]} : vector<8x768xf32> to vector<8x128xf32>
    %374 = vector.extract_strided_slice %367 {offsets = [0, 0], sizes = [8, 128], strides = [1, 1]} : vector<8x256xf32> to vector<8x128xf32>
    %375 = vector.extract_strided_slice %367 {offsets = [0, 128], sizes = [8, 128], strides = [1, 1]} : vector<8x256xf32> to vector<8x128xf32>
    %376 = arith.mulf %369, %331 : vector<8x128xf32>
    %377 = arith.mulf %368, %374 : vector<8x128xf32>
    %378 = arith.addf %376, %377 : vector<8x128xf32>
    %379 = arith.mulf %372, %334 : vector<8x128xf32>
    %380 = arith.mulf %371, %375 : vector<8x128xf32>
    %381 = arith.addf %379, %380 : vector<8x128xf32>
    %382 = math.tanh %378 : vector<8x128xf32>
    %383 = arith.mulf %370, %382 : vector<8x128xf32>
    %384 = math.tanh %381 : vector<8x128xf32>
    %385 = arith.mulf %373, %384 : vector<8x128xf32>
    %c8_i32 = arith.constant 8 : i32
    %386 = tpu.concatenate %383, %385 in 1 : vector<8x128xf32>, vector<8x128xf32> -> vector<8x256xf32>
    %387 = arith.truncf %386 : vector<8x256xf32> to vector<8x256xbf16>
    %c0_81 = arith.constant 0 : index
    %c0_82 = arith.constant 0 : index
    %388 = vector.load %arg4[%c0_81, %c0_82] : memref<256x128xbf16, #tpu.memory_space<vmem>>, vector<256x128xbf16>
    %cst_83 = arith.constant dense<0.000000e+00> : vector<8x128xf32>
    %389 = tpu.matmul %387, %388, %cst_83 {dimension_numbers = #tpu.dot_dimension_numbers<[1], [0], [0], [1], [0, 0, 1, 1], [], []>} : vector<8x256xbf16>, vector<256x128xbf16>, vector<8x128xf32> -> vector<8x128xf32>
    %c0_84 = arith.constant 0 : index
    %c0_85 = arith.constant 0 : index
    %390 = vector.load %arg5[%c0_84, %c0_85] : memref<1x128xf32, #tpu.memory_space<vmem>>, vector<1x128xf32>
    %391 = vector.broadcast %390 : vector<1x128xf32> to vector<8x128xf32>
    %392 = arith.addf %389, %391 : vector<8x128xf32>
    %cst_86 = arith.constant 0.000000e+00 : f32
    %393 = vector.broadcast %cst_86 : f32 to vector<8x128xf32>
    %394 = arith.maximumf %392, %393 : vector<8x128xf32>
    %395 = arith.truncf %394 : vector<8x128xf32> to vector<8x128xbf16>
    %c0_87 = arith.constant 0 : index
    %c0_88 = arith.constant 0 : index
    %396 = vector.load %arg6[%c0_87, %c0_88] : memref<128x128xbf16, #tpu.memory_space<vmem>>, vector<128x128xbf16>
    %cst_89 = arith.constant dense<0.000000e+00> : vector<8x128xf32>
    %397 = tpu.matmul %395, %396, %cst_89 {dimension_numbers = #tpu.dot_dimension_numbers<[1], [0], [0], [1], [0, 0, 1, 1], [], []>} : vector<8x128xbf16>, vector<128x128xbf16>, vector<8x128xf32> -> vector<8x128xf32>
    %c0_90 = arith.constant 0 : index
    %c0_91 = arith.constant 0 : index
    %398 = vector.load %arg7[%c0_90, %c0_91] : memref<1x128xf32, #tpu.memory_space<vmem>>, vector<1x128xf32>
    %399 = vector.broadcast %398 : vector<1x128xf32> to vector<8x128xf32>
    %400 = arith.addf %397, %399 : vector<8x128xf32>
    %401 = arith.negf %400 : vector<8x128xf32>
    %402 = math.exp %401 : vector<8x128xf32>
    %cst_92 = arith.constant 1.000000e+00 : f32
    %403 = vector.broadcast %cst_92 : f32 to vector<8x128xf32>
    %404 = arith.addf %403, %402 : vector<8x128xf32>
    %405 = arith.divf %403, %404 : vector<8x128xf32>
    %c0_93 = arith.constant 0 : index
    %c0_94 = arith.constant 0 : index
    %406 = vector.load %arg8[%c0_93, %c0_94] : memref<8x128xf32, #tpu.memory_space<vmem>>, vector<8x128xf32>
    tpu.vector_store %arg8[%c0_93, %c0_94], %405 {strides = array<i32>} : memref<8x128xf32, #tpu.memory_space<vmem>>, vector<8x128xf32>,
    return
  }
}

</mosaic_0001>

<bundles_post_ra>
// kernel: tpu_custom_call.1
= control target key start
LH: loop header
LB: loop body
LE: loop exit
PB: predicated region body
PF: predicated region fallthrough
CT: control target
= control target key end

     0   :  { %13 = vsyncpa [#allocation4], 0  ;;  %s6781_s0 = inlined_call_operand.hbm [shape: bf16[64,128], index: 0, kind: input, shape index: {}]   ;;  %s6782_s1 = inlined_call_operand.hbm [shape: bf16[128,1024], index: 1, kind: input, shape index: {}]   ;;  %s6783_s2 = inlined_call_operand.hbm [shape: f32[1,1024], index: 2, kind: input, shape index: {}]   ;;  %s6784_s3 = inlined_call_operand.hbm [shape: bf16[256,1024], index: 3, kind: input, shape index: {}]   ;;  %s6785_s4 = inlined_call_operand.hbm [shape: bf16[256,128], index: 4, kind: input, shape index: {}]   ;;  %s6786_s5 = inlined_call_operand.vmem [shape: f32[1,128], index: 5, kind: input, shape index: {}]   ;;  %s6787_s6 = inlined_call_operand.hbm [shape: bf16[128,128], index: 6, kind: input, shape index: {}]   ;;  %s6788_s7 = inlined_call_operand.vmem [shape: f32[1,128], index: 7, kind: input, shape index: {}]   ;;  %s6789_s8 = inlined_call_operand.hbm [shape: f32[8,128], index: 8, kind: output, shape index: {}]  }
   0x1   :  { %14 = vsyncpa [#allocation7], 0 }
   0x2   :  { %15 = vsyncpa [#allocation10], 0 }
   0x3   :  { %16 = vsyncpa [#allocation13], 0 }
   0x4   :  { %17 = vsyncpa [#allocation5], 0  ;;  %s4963_s27 = smov [#allocation6]   ;;  %s4799_s9 = scalar_lea.hbm %s6782_s1, 8192 }
   0x5   :  { %s35_s28 = sshll.u32 %s4963_s27, 4  ;;  %p4800_p0 = scmp.ne.s32.totalorder %s6782_s1, %s4799_s9  ;;  %s36_s28 = int_to_ptr.vmem [resolvable:$true] %s35_s28 }
   0x6   :  { %p4803_p1 = scmp.lt.u32.totalorder %s4799_s9, %s6782_s1 }
   0x8   :  { %p4805_p2 = pnand %p4803_p1, %p4800_p0 }
   0xa   :  { %4808 = shalt.err (!%p4805_p2)
}
   0xb   :  { %s4809_s14 = scalar_lea.vmem %s36_s28, 8192  ;;  %p4814_p4 = scmp.lt.s32.totalorder %s36_s28, %s36_s28 }
   0xc   :  { %p4810_p3 = scmp.ne.s32.totalorder %s36_s28, %s4809_s14  ;;  %p4815_p5 = scmp.lt.s32.totalorder %s4809_s14, %s4809_s14 }
   0xe   :  { %p4816_p6 = por %p4815_p5, %p4814_p4 }
  0x10   :  { %p4817_p7 = pnand %p4816_p6, %p4810_p3 }
  0x12   :  { %4820 = shalt.err (!%p4817_p7)
}
  0x13   :  { %s4964_s15 = smov 512   ;;  %s4965_s16 = smov 32  }
  0x14   :  { %41 = dma.hbm_to_vmem [thread:$0]  %s6782_s1, 8192, %s36_s28, [#allocation7], %s4964_s15, %s4964_s15, %s4965_s16  }
  0x15   :  { %s4966_s19 = smov [#allocation9]   ;;  %s4967_s21 = smov [#allocation3]  }
  0x16   :  { %s57_s20 = sshll.u32 %s4966_s19, 4  ;;  %s23_s22 = sshll.u32 %s4967_s21, 4  ;;  %s58_s20 = int_to_ptr.vmem [resolvable:$true] %s57_s20  ;;  %s24_s22 = int_to_ptr.vmem [resolvable:$true] %s23_s22 }
  0x17   :  { %s4821_s25 = scalar_lea.hbm %s6784_s3, 16384 }
  0x18   :  { %p4822_p8 = scmp.ne.s32.totalorder %s6784_s3, %s4821_s25  ;;  %p4825_p9 = scmp.lt.u32.totalorder %s4821_s25, %s6784_s3 }
  0x1a   :  { %p4827_p10 = pnand %p4825_p9, %p4822_p8 }
  0x1c   :  { %4830 = shalt.err (!%p4827_p10)
}
  0x1d   :  { %s4831_s1 = scalar_lea.vmem %s58_s20, 16384  ;;  %p4836_p12 = scmp.lt.s32.totalorder %s58_s20, %s58_s20 }
  0x1e   :  { %p4832_p11 = scmp.ne.s32.totalorder %s58_s20, %s4831_s1  ;;  %p4837_p13 = scmp.lt.s32.totalorder %s4831_s1, %s4831_s1 }
  0x20   :  { %p4838_p0 = por %p4837_p13, %p4836_p12 }
  0x22   :  { %p4839_p1 = pnand %p4838_p0, %p4832_p11 }
  0x24   :  { %4842 = shalt.err (!%p4839_p1)
}
  0x25   :  { %63 = dma.hbm_to_vmem [thread:$0]  %s6784_s3, 16384, %s58_s20, [#allocation10], %s4964_s15, %s4964_s15, %s4965_s16  }
  0x26   :  { %s4843_s12 = scalar_lea.hbm %s6781_s0, 512 }
  0x27   :  { %p4844_p2 = scmp.ne.s32.totalorder %s6781_s0, %s4843_s12  ;;  %p4847_p3 = scmp.lt.u32.totalorder %s4843_s12, %s6781_s0 }
  0x29   :  { %p4849_p4 = pnand %p4847_p3, %p4844_p2 }
  0x2b   :  { %4852 = shalt.err (!%p4849_p4)
}
  0x2c   :  { %s4853_s19 = scalar_lea.vmem %s24_s22, 512  ;;  %p4858_p6 = scmp.lt.s32.totalorder %s24_s22, %s24_s22 }
  0x2d   :  { %p4854_p5 = scmp.ne.s32.totalorder %s24_s22, %s4853_s19  ;;  %p4859_p7 = scmp.lt.s32.totalorder %s4853_s19, %s4853_s19 }
  0x2f   :  { %p4860_p8 = por %p4859_p7, %p4858_p6 }
  0x31   :  { %p4861_p9 = pnand %p4860_p8, %p4854_p5 }
  0x33   :  { %4864 = shalt.err (!%p4861_p9)
}
  0x34   :  { %s4968_s3 = smov 64   ;;  %s4969_s15 = smov 4  }
  0x35   :  { %29 = dma.hbm_to_vmem [thread:$0]  %s6781_s0, 512, %s24_s22, [#allocation4], %s4968_s3, %s4968_s3, %s4969_s15  }
  0x36   :  { %s4970_s21 = smov [#allocation8]   ;;  %s4971_s24 = smov [#allocation11]  }
  0x37   :  { %s48_s23 = sshll.u32 %s4970_s21, 4  ;;  %s69_s25 = sshll.u32 %s4971_s24, 4  ;;  %s49_s23 = int_to_ptr.vmem [resolvable:$true] %s48_s23  ;;  %s70_s25 = int_to_ptr.vmem [resolvable:$true] %s69_s25 }
  0x38   :  { %s4865_s29 = scalar_lea.hbm %s6783_s2, 128 }
  0x39   :  { %p4866_p10 = scmp.ne.s32.totalorder %s6783_s2, %s4865_s29  ;;  %p4869_p11 = scmp.lt.u32.totalorder %s4865_s29, %s6783_s2 }
  0x3b   :  { %p4871_p12 = pnand %p4869_p11, %p4866_p10 }
  0x3d   :  { %4874 = shalt.err (!%p4871_p12)
}
  0x3e   :  { %s4875_s0 = scalar_lea.vmem %s49_s23, 128  ;;  %p4880_p0 = scmp.lt.s32.totalorder %s49_s23, %s49_s23 }
  0x3f   :  { %p4876_p13 = scmp.ne.s32.totalorder %s49_s23, %s4875_s0  ;;  %p4881_p1 = scmp.lt.s32.totalorder %s4875_s0, %s4875_s0 }
  0x41   :  { %p4882_p2 = por %p4881_p1, %p4880_p0 }
  0x43   :  { %p4883_p3 = pnand %p4882_p2, %p4876_p13 }
  0x45   :  { %4886 = shalt.err (!%p4883_p3)
}
  0x46   :  { %51 = dma.hbm_to_vmem [thread:$0]  %s6783_s2, 128, %s49_s23, [#allocation7]  }
  0x47   :  { %s4887_s13 = scalar_lea.hbm %s6785_s4, 2048 }
  0x48   :  { %p4888_p4 = scmp.ne.s32.totalorder %s6785_s4, %s4887_s13  ;;  %p4891_p5 = scmp.lt.u32.totalorder %s4887_s13, %s6785_s4 }
  0x4a   :  { %p4893_p6 = pnand %p4891_p5, %p4888_p4 }
  0x4c   :  { %4896 = shalt.err (!%p4893_p6)
}
  0x4d   :  { %s4897_s16 = scalar_lea.vmem %s70_s25, 2048  ;;  %p4902_p8 = scmp.lt.s32.totalorder %s70_s25, %s70_s25 }
  0x4e   :  { %p4898_p7 = scmp.ne.s32.totalorder %s70_s25, %s4897_s16  ;;  %p4903_p9 = scmp.lt.s32.totalorder %s4897_s16, %s4897_s16 }
  0x50   :  { %p4904_p10 = por %p4903_p9, %p4902_p8 }
  0x52   :  { %p4905_p11 = pnand %p4904_p10, %p4898_p7 }
  0x54   :  { %4908 = shalt.err (!%p4905_p11)
}
  0x55   :  { %75 = dma.hbm_to_vmem [thread:$0]  %s6785_s4, 2048, %s70_s25, [#allocation10], %s4968_s3, %s4968_s3, %s4969_s15  }
  0x56   :  { %s4972_s21 = smov [#allocation12]   ;;  %s4909_s27 = scalar_lea.hbm %s6787_s6, 1024 }
  0x57   :  { %s83_s23 = sshll.u32 %s4972_s21, 4  ;;  %p4910_p12 = scmp.ne.s32.totalorder %s6787_s6, %s4909_s27  ;;  %s84_s23 = int_to_ptr.vmem [resolvable:$true] %s83_s23 }
  0x58   :  { %p4913_p13 = scmp.lt.u32.totalorder %s4909_s27, %s6787_s6 }
  0x5a   :  { %p4915_p0 = pnand %p4913_p13, %p4910_p12 }
  0x5c   :  { %4918 = shalt.err (!%p4915_p0)
}
  0x5d   :  { %s4919_s9 = scalar_lea.vmem %s84_s23, 1024  ;;  %p4924_p2 = scmp.lt.s32.totalorder %s84_s23, %s84_s23 }
  0x5e   :  { %p4920_p1 = scmp.ne.s32.totalorder %s84_s23, %s4919_s9  ;;  %p4925_p3 = scmp.lt.s32.totalorder %s4919_s9, %s4919_s9 }
  0x60   :  { %p4926_p4 = por %p4925_p3, %p4924_p2 }
  0x62   :  { %p4927_p5 = pnand %p4926_p4, %p4920_p1 }
  0x64   :  { %4930 = shalt.err (!%p4927_p5)
}
  0x65   :  { %89 = dma.hbm_to_vmem [thread:$0]  %s6787_s6, 1024, %s84_s23, [#allocation13], %s4968_s3, %s4968_s3, %s4969_s15  }
  0x66   :  { %4953 = dma.done.wait [#allocation4], 512  }
  0x67   :  { %4954 = vsyncadd [#allocation4], 4294966784 }
  0x68   :  { %4955 = dma.done.wait [#allocation7], 8320  }
  0x69   :  { %4956 = vsyncadd [#allocation7], 4294958976 }
  0x6a   :  { %4957 = dma.done.wait [#allocation10], 18432  }
  0x6b   :  { %4958 = vsyncadd [#allocation10], 4294948864 }
  0x6c   :  { %4959 = dma.done.wait [#allocation13], 1024  }
  0x6d   :  { %4960 = vsyncadd [#allocation13], 4294966272  ;;  %v4973_v0 = vmov 0   ;;  %v119_v1 = vld [vmem:[#allocation6] sm:$0xff]  ;;  %v120_v3 = vld [vmem:[#allocation6 + $0x8] sm:$0xff]  ;;  %vm4976_vm0 = vmmov 0  }
  0x6e   :  { %601 = vmatprep.mubr.bf16.mxu0 %v4973_v0  ;;  %674 = vmatprep.mubr.bf16.mxu1 %v4973_v0  ;;  %v123_v2 = vld [vmem:[#allocation6 + $0x20] sm:$0xff]  ;;  %v124_v5 = vld [vmem:[#allocation6 + $0x28] sm:$0xff]  ;;  %v121_v63 = vld [vmem:[#allocation6 + $0x10] sm:$0xff] }
  0x6f   :  { %v4115_v4 = vcombine.high %v119_v1, %v123_v2  ;;  %v4114_v6 = vcombine.low %v119_v1, %v123_v2  ;;  %v127_v7 = vld [vmem:[#allocation6 + $0x40] sm:$0xff]  ;;  %v4117_v9 = vcombine.high %v120_v3, %v124_v5  ;;  %v4116_v10 = vcombine.low %v120_v3, %v124_v5  ;;  %v128_v12 = vld [vmem:[#allocation6 + $0x48] sm:$0xff]  ;;  %v125_v1 = vld [vmem:[#allocation6 + $0x30] sm:$0xff] }
  0x70   :  { %v131_v8 = vld [vmem:[#allocation6 + $0x60] sm:$0xff]  ;;  %v132_v13 = vld [vmem:[#allocation6 + $0x68] sm:$0xff]  ;;  %v122_v2 = vld [vmem:[#allocation6 + $0x18] sm:$0xff] }
  0x71   :  { %v4123_v11 = vcombine.high %v127_v7, %v131_v8  ;;  %v135_v14 = vld [vmem:[#allocation6 + $0x80] sm:$0xff]  ;;  %569 = vmatprep.subr.bf16.mxu0 %v4115_v4  ;;  %v4125_v15 = vcombine.high %v128_v12, %v132_v13  ;;  %v136_v17 = vld [vmem:[#allocation6 + $0x88] sm:$0xff]  ;;  %642 = vmatprep.subr.bf16.mxu1 %v4117_v9  ;;  %v4122_v19 = vcombine.low %v127_v7, %v131_v8  ;;  %v126_v3 = vld [vmem:[#allocation6 + $0x38] sm:$0xff] }
  0x72   :  { %v139_v16 = vld [vmem:[#allocation6 + $0xa0] sm:$0xff]  ;;  %v140_v18 = vld [vmem:[#allocation6 + $0xa8] sm:$0xff]  ;;  %570 = vmatpush1.bf16.msra.mxu0 %v4114_v6  ;;  %643 = vmatpush1.bf16.msra.mxu1 %v4116_v10  ;;  %v4124_v20 = vcombine.low %v128_v12, %v132_v13  ;;  %v4119_v6 = vcombine.high %v121_v63, %v125_v1  ;;  %v4121_v7 = vcombine.high %v122_v2, %v126_v3  ;;  %v129_v8 = vld [vmem:[#allocation6 + $0x50] sm:$0xff] }
  0x73   :  { %571 = vmatprep.subr.bf16.mxu0 %v4123_v11  ;;  %v4131_v21 = vcombine.high %v135_v14, %v139_v16  ;;  %644 = vmatprep.subr.bf16.mxu1 %v4125_v15  ;;  %v4133_v22 = vcombine.high %v136_v17, %v140_v18  ;;  %v143_v23 = vld [vmem:[#allocation6 + $0xc0] sm:$0xff]  ;;  %v144_v25 = vld [vmem:[#allocation6 + $0xc8] sm:$0xff]  ;;  %v4130_v27 = vcombine.low %v135_v14, %v139_v16  ;;  %v133_v9 = vld [vmem:[#allocation6 + $0x70] sm:$0xff] }
  0x74   :  { %v147_v24 = vld [vmem:[#allocation6 + $0xe0] sm:$0xff]  ;;  %v148_v26 = vld [vmem:[#allocation6 + $0xe8] sm:$0xff]  ;;  %v4132_v28 = vcombine.low %v136_v17, %v140_v18  ;;  %v130_v11 = vld [vmem:[#allocation6 + $0x58] sm:$0xff]  ;;  %v4118_v13 = vcombine.low %v121_v63, %v125_v1  ;;  %v4120_v14 = vcombine.low %v122_v2, %v126_v3  ;;  %v4127_v15 = vcombine.high %v129_v8, %v133_v9 }
  0x75   :  { %v4139_v29 = vcombine.high %v143_v23, %v147_v24  ;;  %v4141_v30 = vcombine.high %v144_v25, %v148_v26  ;;  %v151_v31 = vld [vmem:[#allocation6 + $0x100] sm:$0xff]  ;;  %v152_v33 = vld [vmem:[#allocation6 + $0x108] sm:$0xff]  ;;  %v4138_v35 = vcombine.low %v143_v23, %v147_v24  ;;  %v4140_v36 = vcombine.low %v144_v25, %v148_v26  ;;  %v134_v12 = vld [vmem:[#allocation6 + $0x78] sm:$0xff] }
  0x76   :  { %572 = vmatpush1.bf16.msra.mxu0 %v4122_v19  ;;  %645 = vmatpush1.bf16.msra.mxu1 %v4124_v20  ;;  %v155_v32 = vld [vmem:[#allocation6 + $0x120] sm:$0xff]  ;;  %v156_v34 = vld [vmem:[#allocation6 + $0x128] sm:$0xff]  ;;  %v4129_v16 = vcombine.high %v130_v11, %v134_v12  ;;  %v137_v17 = vld [vmem:[#allocation6 + $0x90] sm:$0xff] }
  0x77   :  { %573 = vmatprep.subr.bf16.mxu0 %v4131_v21  ;;  %646 = vmatprep.subr.bf16.mxu1 %v4133_v22  ;;  %v4147_v37 = vcombine.high %v151_v31, %v155_v32  ;;  %v159_v38 = vld [vmem:[#allocation6 + $0x140] sm:$0xff]  ;;  %v4149_v39 = vcombine.high %v152_v33, %v156_v34  ;;  %v160_v41 = vld [vmem:[#allocation6 + $0x148] sm:$0xff]  ;;  %v4146_v43 = vcombine.low %v151_v31, %v155_v32  ;;  %v141_v18 = vld [vmem:[#allocation6 + $0xb0] sm:$0xff] }
  0x78   :  { %v163_v40 = vld [vmem:[#allocation6 + $0x160] sm:$0xff]  ;;  %v164_v42 = vld [vmem:[#allocation6 + $0x168] sm:$0xff]  ;;  %v4148_v44 = vcombine.low %v152_v33, %v156_v34  ;;  %v138_v19 = vld [vmem:[#allocation6 + $0x98] sm:$0xff]  ;;  %v4126_v21 = vcombine.low %v129_v8, %v133_v9  ;;  %v4128_v22 = vcombine.low %v130_v11, %v134_v12  ;;  %v4135_v23 = vcombine.high %v137_v17, %v141_v18 }
  0x79   :  { %v4155_v45 = vcombine.high %v159_v38, %v163_v40  ;;  %v167_v46 = vld [vmem:[#allocation6 + $0x180] sm:$0xff]  ;;  %v4157_v47 = vcombine.high %v160_v41, %v164_v42  ;;  %v168_v49 = vld [vmem:[#allocation6 + $0x188] sm:$0xff]  ;;  %v4154_v51 = vcombine.low %v159_v38, %v163_v40  ;;  %v4156_v52 = vcombine.low %v160_v41, %v164_v42  ;;  %v142_v20 = vld [vmem:[#allocation6 + $0xb8] sm:$0xff] }
  0x7a   :  { %574 = vmatpush1.bf16.msra.mxu0 %v4130_v27  ;;  %647 = vmatpush1.bf16.msra.mxu1 %v4132_v28  ;;  %v171_v48 = vld [vmem:[#allocation6 + $0x1a0] sm:$0xff]  ;;  %v172_v50 = vld [vmem:[#allocation6 + $0x1a8] sm:$0xff]  ;;  %v4137_v24 = vcombine.high %v138_v19, %v142_v20  ;;  %v145_v25 = vld [vmem:[#allocation6 + $0xd0] sm:$0xff]  ;;  %v4136_v31 = vcombine.low %v138_v19, %v142_v20 }
  0x7b   :  { %575 = vmatprep.subr.bf16.mxu0 %v4139_v29  ;;  %648 = vmatprep.subr.bf16.mxu1 %v4141_v30  ;;  %v4163_v53 = vcombine.high %v167_v46, %v171_v48  ;;  %v4165_v54 = vcombine.high %v168_v49, %v172_v50  ;;  %v175_v55 = vld [vmem:[#allocation6 + $0x1c0] sm:$0xff]  ;;  %v176_v57 = vld [vmem:[#allocation6 + $0x1c8] sm:$0xff]  ;;  %v4162_v59 = vcombine.low %v167_v46, %v171_v48  ;;  %v149_v26 = vld [vmem:[#allocation6 + $0xf0] sm:$0xff] }
  0x7c   :  { %v179_v56 = vld [vmem:[#allocation6 + $0x1e0] sm:$0xff]  ;;  %v180_v58 = vld [vmem:[#allocation6 + $0x1e8] sm:$0xff]  ;;  %v4164_v60 = vcombine.low %v168_v49, %v172_v50  ;;  %v146_v28 = vld [vmem:[#allocation6 + $0xd8] sm:$0xff]  ;;  %v4134_v30 = vcombine.low %v137_v17, %v141_v18  ;;  %v4143_v32 = vcombine.high %v145_v25, %v149_v26  ;;  %v4142_v38 = vcombine.low %v145_v25, %v149_v26 }
  0x7d   :  { %v4171_v61 = vcombine.high %v175_v55, %v179_v56  ;;  %v4173_v62 = vcombine.high %v176_v57, %v180_v58  ;;  %v4170_v4 = vcombine.low %v175_v55, %v179_v56  ;;  %v4172_v5 = vcombine.low %v176_v57, %v180_v58  ;;  %v5106_v10 = vld [vmem:[#allocation3] sm:$0xff]   ;;  %v5111_v27 = vld [vmem:[#allocation3 + $0x8] sm:$0xff]   ;;  %v150_v29 = vld [vmem:[#allocation6 + $0xf8] sm:$0xff] }
  0x7e   :  { %576 = vmatpush1.bf16.msra.mxu0 %v4138_v35  ;;  %649 = vmatpush1.bf16.msra.mxu1 %v4140_v36  ;;  %v4145_v33 = vcombine.high %v146_v28, %v150_v29  ;;  %v153_v34 = vld [vmem:[#allocation6 + $0x110] sm:$0xff]  ;;  %v154_v36 = vld [vmem:[#allocation6 + $0x118] sm:$0xff] }
  0x7f   :  { %577 = vmatprep.subr.bf16.mxu0 %v4147_v37  ;;  %650 = vmatprep.subr.bf16.mxu1 %v4149_v39  ;;  %v157_v35 = vld [vmem:[#allocation6 + $0x130] sm:$0xff]  ;;  %v158_v37 = vld [vmem:[#allocation6 + $0x138] sm:$0xff]  ;;  %v4144_v39 = vcombine.low %v146_v28, %v150_v29  ;;  %v1199_v28 = vld [vmem:[#allocation9 + $0xc0] sm:$0xff] }
  0x80   :  { %v4151_v40 = vcombine.high %v153_v34, %v157_v35  ;;  %v4153_v41 = vcombine.high %v154_v36, %v158_v37  ;;  %v161_v42 = vld [vmem:[#allocation6 + $0x150] sm:$0xff]  ;;  %v166_v46 = vld [vmem:[#allocation6 + $0x178] sm:$0xff]  ;;  %v4152_v48 = vcombine.low %v154_v36, %v158_v37  ;;  %v1203_v29 = vld [vmem:[#allocation9 + $0xe0] sm:$0xff] }
  0x81   :  { %v182_v63 = vld [vmem:[#allocation6 + $0x1f8] sm:$0xff]  ;;  %v1180_v8 = vld [vmem:[#allocation9 + $0x28] sm:$0xff]  ;;  %v1211_v36 = vld [vmem:[#allocation9 + $0x120] sm:$0xff] }
  0x82   :  { %578 = vmatpush1.bf16.msra.mxu0 %v4146_v43  ;;  %651 = vmatpush1.bf16.msra.mxu1 %v4148_v44  ;;  %v165_v43 = vld [vmem:[#allocation6 + $0x170] sm:$0xff] }
  0x83   :  { %579 = vmatprep.subr.bf16.mxu0 %v4155_v45  ;;  %652 = vmatprep.subr.bf16.mxu1 %v4157_v47  ;;  %v5117_v44 = vld [vmem:[#allocation3 + $0x10] sm:$0xff]   ;;  %v162_v45 = vld [vmem:[#allocation6 + $0x158] sm:$0xff]  ;;  %v4150_v47 = vcombine.low %v153_v34, %v157_v35  ;;  %v4159_v49 = vcombine.high %v161_v42, %v165_v43  ;;  %v4158_v55 = vcombine.low %v161_v42, %v165_v43  ;;  %v1207_v35 = vld [vmem:[#allocation9 + $0x100] sm:$0xff] }
  0x84   :  { %v4161_v50 = vcombine.high %v162_v45, %v166_v46  ;;  %v4160_v56 = vcombine.low %v162_v45, %v166_v46  ;;  %v1188_v17 = vld [vmem:[#allocation9 + $0x68] sm:$0xff]  ;;  %v5174_v42 = vcombine.low %v1199_v28, %v1203_v29  ;;  %v1215_v43 = vld [vmem:[#allocation9 + $0x140] sm:$0xff] }
  0x85   :  { %v1196_v25 = vld [vmem:[#allocation9 + $0xa8] sm:$0xff]  ;;  %v1219_v45 = vld [vmem:[#allocation9 + $0x160] sm:$0xff] }
  0x86   :  { %580 = vmatpush1.bf16.msra.mxu0 %v4154_v51  ;;  %653 = vmatpush1.bf16.msra.mxu1 %v4156_v52  ;;  %v169_v51 = vld [vmem:[#allocation6 + $0x190] sm:$0xff]  ;;  %7102 = vst [vmem:[#allocation34_spill] sm:$0xff] %v5174_v42 }
  0x87   :  { %581 = vmatprep.subr.bf16.mxu0 %v4163_v53  ;;  %654 = vmatprep.subr.bf16.mxu1 %v4165_v54  ;;  %v173_v52 = vld [vmem:[#allocation6 + $0x1b0] sm:$0xff]  ;;  %v170_v53 = vld [vmem:[#allocation6 + $0x198] sm:$0xff] }
  0x88   :  { %v174_v54 = vld [vmem:[#allocation6 + $0x1b8] sm:$0xff]  ;;  %v4167_v57 = vcombine.high %v169_v51, %v173_v52  ;;  %v4166_v1 = vcombine.low %v169_v51, %v173_v52  ;;  %v1223_v51 = vld [vmem:[#allocation9 + $0x180] sm:$0xff] }
  0x89   :  { %v4169_v58 = vcombine.high %v170_v53, %v174_v54  ;;  %v4168_v2 = vcombine.low %v170_v53, %v174_v54  ;;  %v1227_v52 = vld [vmem:[#allocation9 + $0x1a0] sm:$0xff]  ;;  %v5195_v54 = vcombine.high %v1215_v43, %v1219_v45 }
  0x8a   :  { %582 = vmatpush1.bf16.msra.mxu0 %v4162_v59  ;;  %655 = vmatpush1.bf16.msra.mxu1 %v4164_v60  ;;  %v177_v59 = vld [vmem:[#allocation6 + $0x1d0] sm:$0xff] }
  0x8b   :  { %583 = vmatprep.subr.bf16.mxu0 %v4171_v61  ;;  %656 = vmatprep.subr.bf16.mxu1 %v4173_v62  ;;  %v181_v60 = vld [vmem:[#allocation6 + $0x1f0] sm:$0xff]  ;;  %v5123_v61 = vld [vmem:[#allocation3 + $0x18] sm:$0xff]   ;;  %7108 = vst [vmem:[#allocation40_spill] sm:$0xff] %v5195_v54 }
  0x8c   :  { %v178_v62 = vld [vmem:[#allocation6 + $0x1d8] sm:$0xff]  ;;  %v4175_v3 = vcombine.high %v177_v59, %v181_v60  ;;  %v4174_v9 = vcombine.low %v177_v59, %v181_v60  ;;  %v5209_v60 = vcombine.high %v1223_v51, %v1227_v52 }
  0x8d   :  { %v4176_v11 = vcombine.low %v178_v62, %v182_v63 }
  0x8e   :  { %584 = vmatpush1.bf16.msra.mxu0 %v4170_v4  ;;  %657 = vmatpush1.bf16.msra.mxu1 %v4172_v5  ;;  %v4177_v4 = vcombine.high %v178_v62, %v182_v63  ;;  %v1175_v5 = vld [vmem:[#allocation9] sm:$0xff]  ;;  %7112 = vst [vmem:[#allocation44_spill] sm:$0xff] %v5209_v60 }
  0x8f   :  { %715 = vmatprep.subr.bf16.mxu0 %v4119_v6  ;;  %788 = vmatprep.subr.bf16.mxu1 %v4121_v7  ;;  %v1179_v6 = vld [vmem:[#allocation9 + $0x20] sm:$0xff]  ;;  %v1176_v7 = vld [vmem:[#allocation9 + $0x8] sm:$0xff] }
  0x90   :  { %v5128_v12 = vcombine.high %v1175_v5, %v1179_v6  ;;  %v5134_v18 = vcombine.low %v1175_v5, %v1179_v6  ;;  %v5137_v19 = vcombine.low %v1176_v7, %v1180_v8  ;;  %v1231_v63 = vld [vmem:[#allocation9 + $0x1c0] sm:$0xff] }
  0x91   :  { %602 = vmatmul.mubr.bf16.vlgmr.msra.gmra.mrb[0].mxu0 %v5106_v10  ;;  %675 = vmatmul.mubr.bf16.vlgmr.msra.gmra.mrb[0].mxu1 %v5106_v10 }
  0x92   :  { %716 = vmatpush1.bf16.msra.mxu0 %v4118_v13  ;;  %789 = vmatpush1.bf16.msra.mxu1 %v4120_v14  ;;  %7088 = vst [vmem:[#allocation20_spill] sm:$0xff] %v5128_v12  ;;  %v5131_v13 = vcombine.high %v1176_v7, %v1180_v8  ;;  %v1183_v14 = vld [vmem:[#allocation9 + $0x40] sm:$0xff]  ;;  %7090 = vst [vmem:[#allocation22_spill] sm:$0xff] %v5134_v18 }
  0x93   :  { %717 = vmatprep.subr.bf16.mxu0 %v4127_v15  ;;  %790 = vmatprep.subr.bf16.mxu1 %v4129_v16  ;;  %v1187_v15 = vld [vmem:[#allocation9 + $0x60] sm:$0xff]  ;;  %v1184_v16 = vld [vmem:[#allocation9 + $0x48] sm:$0xff]  ;;  %7091 = vst [vmem:[#allocation23_spill] sm:$0xff] %v5137_v19 }
  0x94   :  { %611 = vmatprep.mubr.bf16.mxu0 %v4973_v0  ;;  %684 = vmatprep.mubr.bf16.mxu1 %v4973_v0  ;;  %7089 = vst [vmem:[#allocation21_spill] sm:$0xff] %v5131_v13  ;;  %v5139_v20 = vcombine.high %v1183_v14, %v1187_v15  ;;  %v5147_v26 = vcombine.low %v1183_v14, %v1187_v15  ;;  %v1239_v7 = vld [vmem:[#allocation9 + $0x200] sm:$0xff] }
  0x95   :  { %v1243_v8 = vld [vmem:[#allocation9 + $0x220] sm:$0xff] }
  0x96   :  { %718 = vmatpush1.bf16.msra.mxu0 %v4126_v21  ;;  %791 = vmatpush1.bf16.msra.mxu1 %v4128_v22  ;;  %7092 = vst [vmem:[#allocation24_spill] sm:$0xff] %v5139_v20  ;;  %v5142_v21 = vcombine.high %v1184_v16, %v1188_v17  ;;  %v1191_v22 = vld [vmem:[#allocation9 + $0x80] sm:$0xff]  ;;  %7094 = vst [vmem:[#allocation26_spill] sm:$0xff] %v5147_v26  ;;  %v5237_v15 = vcombine.high %v1239_v7, %v1243_v8 }
  0x97   :  { %719 = vmatprep.subr.bf16.mxu0 %v4135_v23  ;;  %792 = vmatprep.subr.bf16.mxu1 %v4137_v24  ;;  %v1195_v23 = vld [vmem:[#allocation9 + $0xa0] sm:$0xff]  ;;  %v1192_v24 = vld [vmem:[#allocation9 + $0x88] sm:$0xff] }
  0x98   :  { %7093 = vst [vmem:[#allocation25_spill] sm:$0xff] %v5142_v21  ;;  %v5161_v34 = vcombine.low %v1191_v22, %v1195_v23  ;;  %v5165_v37 = vcombine.low %v1192_v24, %v1196_v25  ;;  %7120 = vst [vmem:[#allocation52_spill] sm:$0xff] %v5237_v15 }
  0x99   :  { %612 = vmatmul.mubr.bf16.gmra.mrb[4].mxu0 %v5111_v27  ;;  %685 = vmatmul.mubr.bf16.gmra.mrb[4].mxu1 %v5111_v27 }
  0x9a   :  { %720 = vmatpush1.bf16.msra.mxu0 %v4134_v30  ;;  %793 = vmatpush1.bf16.msra.mxu1 %v4136_v31  ;;  %v5151_v30 = vcombine.low %v1184_v16, %v1188_v17  ;;  %v5153_v31 = vcombine.high %v1191_v22, %v1195_v23  ;;  %7098 = vst [vmem:[#allocation30_spill] sm:$0xff] %v5161_v34  ;;  %7099 = vst [vmem:[#allocation31_spill] sm:$0xff] %v5165_v37  ;;  %v1247_v17 = vld [vmem:[#allocation9 + $0x240] sm:$0xff]  ;;  %v6790_v23 = vmov 0.0|0.0  }
  0x9b   :  { %721 = vmatprep.subr.bf16.mxu0 %v4143_v32  ;;  %794 = vmatprep.subr.bf16.mxu1 %v4145_v33  ;;  %v1200_v32 = vld [vmem:[#allocation9 + $0xc8] sm:$0xff]  ;;  %v5156_v33 = vcombine.high %v1192_v24, %v1196_v25  ;;  %v1251_v22 = vld [vmem:[#allocation9 + $0x260] sm:$0xff] }
  0x9c   :  { %621 = vmatprep.mubr.bf16.mxu0 %v4973_v0  ;;  %694 = vmatprep.mubr.bf16.mxu1 %v4973_v0  ;;  %7095 = vst [vmem:[#allocation27_spill] sm:$0xff] %v5151_v30  ;;  %7096 = vst [vmem:[#allocation28_spill] sm:$0xff] %v5153_v31  ;;  %v1248_v24 = vld [vmem:[#allocation9 + $0x248] sm:$0xff] }
  0x9d   :  { %7097 = vst [vmem:[#allocation29_spill] sm:$0xff] %v5156_v33  ;;  %v1252_v25 = vld [vmem:[#allocation9 + $0x268] sm:$0xff] }
  0x9e   :  { %722 = vmatpush1.bf16.msra.mxu0 %v4142_v38  ;;  %795 = vmatpush1.bf16.msra.mxu1 %v4144_v39  ;;  %v5167_v38 = vcombine.high %v1199_v28, %v1203_v29  ;;  %v1208_v39 = vld [vmem:[#allocation9 + $0x108] sm:$0xff]  ;;  %v5251_v29 = vcombine.high %v1247_v17, %v1251_v22 }
  0x9f   :  { %723 = vmatprep.subr.bf16.mxu0 %v4151_v40  ;;  %796 = vmatprep.subr.bf16.mxu1 %v4153_v41  ;;  %v1212_v40 = vld [vmem:[#allocation9 + $0x128] sm:$0xff] }
  0xa0   :  { %7100 = vst [vmem:[#allocation32_spill] sm:$0xff] %v5167_v38  ;;  %v5193_v53 = vcombine.low %v1208_v39, %v1212_v40  ;;  %7124 = vst [vmem:[#allocation56_spill] sm:$0xff] %v5251_v29 }
  0xa1   :  { %622 = vmatmul.mubr.bf16.gmra.mrb[8].mxu0 %v5117_v44  ;;  %695 = vmatmul.mubr.bf16.gmra.mrb[8].mxu1 %v5117_v44 }
  0xa2   :  { %724 = vmatpush1.bf16.msra.mxu0 %v4150_v47  ;;  %797 = vmatpush1.bf16.msra.mxu1 %v4152_v48  ;;  %v5181_v47 = vcombine.high %v1207_v35, %v1211_v36  ;;  %v1216_v48 = vld [vmem:[#allocation9 + $0x148] sm:$0xff]  ;;  %7107 = vst [vmem:[#allocation39_spill] sm:$0xff] %v5193_v53 }
  0xa3   :  { %725 = vmatprep.subr.bf16.mxu0 %v4159_v49  ;;  %798 = vmatprep.subr.bf16.mxu1 %v4161_v50  ;;  %v1220_v49 = vld [vmem:[#allocation9 + $0x168] sm:$0xff]  ;;  %v5184_v50 = vcombine.high %v1208_v39, %v1212_v40  ;;  %v5257_v40 = vcombine.low %v1247_v17, %v1251_v22 }
  0xa4   :  { %631 = vmatprep.mubr.bf16.mxu0 %v4973_v0  ;;  %704 = vmatprep.mubr.bf16.mxu1 %v4973_v0  ;;  %7104 = vst [vmem:[#allocation36_spill] sm:$0xff] %v5181_v47  ;;  %v5207_v59 = vcombine.low %v1216_v48, %v1220_v49  ;;  %v1260_v39 = vld [vmem:[#allocation9 + $0x2a8] sm:$0xff] }
  0xa5   :  { %7105 = vst [vmem:[#allocation37_spill] sm:$0xff] %v5184_v50  ;;  %7126 = vst [vmem:[#allocation58_spill] sm:$0xff] %v5257_v40 }
  0xa6   :  { %726 = vmatpush1.bf16.msra.mxu0 %v4158_v55  ;;  %799 = vmatpush1.bf16.msra.mxu1 %v4160_v56  ;;  %v1224_v55 = vld [vmem:[#allocation9 + $0x188] sm:$0xff]  ;;  %7111 = vst [vmem:[#allocation43_spill] sm:$0xff] %v5207_v59 }
  0xa7   :  { %727 = vmatprep.subr.bf16.mxu0 %v4167_v57  ;;  %800 = vmatprep.subr.bf16.mxu1 %v4169_v58  ;;  %v1228_v56 = vld [vmem:[#allocation9 + $0x1a8] sm:$0xff]  ;;  %v5198_v57 = vcombine.high %v1216_v48, %v1220_v49  ;;  %v5202_v58 = vcombine.low %v1215_v43, %v1219_v45  ;;  %v5261_v43 = vcombine.low %v1248_v24, %v1252_v25  ;;  %v1263_v49 = vld [vmem:[#allocation9 + $0x2c0] sm:$0xff] }
  0xa8   :  { %v5212_v62 = vcombine.high %v1224_v55, %v1228_v56 }
  0xa9   :  { %632 = vmatmul.mubr.bf16.gmra.mrb[12].mxu0 %v5123_v61  ;;  %705 = vmatmul.mubr.bf16.gmra.mrb[12].mxu1 %v5123_v61  ;;  %7109 = vst [vmem:[#allocation41_spill] sm:$0xff] %v5198_v57  ;;  %7110 = vst [vmem:[#allocation42_spill] sm:$0xff] %v5202_v58 }
  0xaa   :  { %728 = vmatpush1.bf16.msra.mxu0 %v4166_v1  ;;  %801 = vmatpush1.bf16.msra.mxu1 %v4168_v2  ;;  %7113 = vst [vmem:[#allocation45_spill] sm:$0xff] %v5212_v62  ;;  %v1235_v1 = vld [vmem:[#allocation9 + $0x1e0] sm:$0xff]  ;;  %v1232_v2 = vld [vmem:[#allocation9 + $0x1c8] sm:$0xff]  ;;  %7127 = vst [vmem:[#allocation59_spill] sm:$0xff] %v5261_v43 }
  0xab   :  { %729 = vmatprep.subr.bf16.mxu0 %v4175_v3  ;;  %802 = vmatprep.subr.bf16.mxu1 %v4177_v4  ;;  %v1236_v3 = vld [vmem:[#allocation9 + $0x1e8] sm:$0xff]  ;;  %v5221_v4 = vcombine.low %v1224_v55, %v1228_v56  ;;  %v5223_v5 = vcombine.high %v1231_v63, %v1235_v1 }
  0xac   :  { %747 = vmatprep.mubr.bf16.mxu0 %v4973_v0  ;;  %820 = vmatprep.mubr.bf16.mxu1 %v4973_v0  ;;  %v5226_v6 = vcombine.high %v1232_v2, %v1236_v3  ;;  %v5235_v14 = vcombine.low %v1232_v2, %v1236_v3  ;;  %v1268_v55 = vld [vmem:[#allocation9 + $0x2e8] sm:$0xff]  ;;  %v1271_v3 = vld [vmem:[#allocation9 + $0x300] sm:$0xff] }
  0xad   :  { %7115 = vst [vmem:[#allocation47_spill] sm:$0xff] %v5221_v4  ;;  %7116 = vst [vmem:[#allocation48_spill] sm:$0xff] %v5223_v5 }
  0xae   :  { %730 = vmatpush1.bf16.msra.mxu0 %v4174_v9  ;;  %803 = vmatpush1.bf16.msra.mxu1 %v4176_v11  ;;  %7117 = vst [vmem:[#allocation49_spill] sm:$0xff] %v5226_v6  ;;  %v1240_v9 = vld [vmem:[#allocation9 + $0x208] sm:$0xff]  ;;  %v5230_v11 = vcombine.low %v1231_v63, %v1235_v1  ;;  %7119 = vst [vmem:[#allocation51_spill] sm:$0xff] %v5235_v14 }
  0xaf   :  { %1943 = vmatprep.subr.bf16.mxu0 %v5128_v12  ;;  %1984 = vmatprep.subr.bf16.mxu1 %v5131_v13 }
  0xb0   :  { %7118 = vst [vmem:[#allocation50_spill] sm:$0xff] %v5230_v11 }
  0xb1   :  { %748 = vmatmul.mubr.bf16.vlgmr.msra.gmra.mrb[16].mxu0 %v5106_v10  ;;  %821 = vmatmul.mubr.bf16.vlgmr.msra.gmra.mrb[16].mxu1 %v5106_v10  ;;  %v1204_v10 = vld [vmem:[#allocation9 + $0xe8] sm:$0xff] }
  0xb2   :  { %1944 = vmatpush1.bf16.msra.mxu0 %v5134_v18  ;;  %1985 = vmatpush1.bf16.msra.mxu1 %v5137_v19  ;;  %v5170_v41 = vcombine.high %v1200_v32, %v1204_v10  ;;  %v5179_v46 = vcombine.low %v1200_v32, %v1204_v10  ;;  %v5254_v32 = vcombine.high %v1248_v24, %v1252_v25  ;;  %v1255_v10 = vld [vmem:[#allocation9 + $0x280] sm:$0xff] }
  0xb3   :  { %1945 = vmatprep.subr.bf16.mxu0 %v5139_v20  ;;  %1986 = vmatprep.subr.bf16.mxu1 %v5142_v21  ;;  %v1279_v25 = vld [vmem:[#allocation9 + $0x340] sm:$0xff] }
  0xb4   :  { %757 = vmatprep.mubr.bf16.mxu0 %v4973_v0  ;;  %830 = vmatprep.mubr.bf16.mxu1 %v4973_v0  ;;  %7101 = vst [vmem:[#allocation33_spill] sm:$0xff] %v5170_v41  ;;  %7103 = vst [vmem:[#allocation35_spill] sm:$0xff] %v5179_v46 }
  0xb5   :  { %7125 = vst [vmem:[#allocation57_spill] sm:$0xff] %v5254_v32 }
  0xb6   :  { %1946 = vmatpush1.bf16.msra.mxu0 %v5147_v26  ;;  %1987 = vmatpush1.bf16.msra.mxu1 %v5151_v30 }
  0xb7   :  { %1947 = vmatprep.subr.bf16.mxu0 %v5153_v31  ;;  %1988 = vmatprep.subr.bf16.mxu1 %v5156_v33 }
  0xb9   :  { %758 = vmatmul.mubr.bf16.gmra.mrb[20].mxu0 %v5111_v27  ;;  %831 = vmatmul.mubr.bf16.gmra.mrb[20].mxu1 %v5111_v27  ;;  %v5189_v27 = vcombine.low %v1207_v35, %v1211_v36  ;;  %v1259_v35 = vld [vmem:[#allocation9 + $0x2a0] sm:$0xff]  ;;  %v1256_v36 = vld [vmem:[#allocation9 + $0x288] sm:$0xff] }
  0xba   :  { %1948 = vmatpush1.bf16.msra.mxu0 %v5161_v34  ;;  %1989 = vmatpush1.bf16.msra.mxu1 %v5165_v37  ;;  %v5263_v45 = vcombine.high %v1255_v10, %v1259_v35  ;;  %v5266_v48 = vcombine.high %v1256_v36, %v1260_v39  ;;  %v5269_v56 = vcombine.low %v1255_v10, %v1259_v35  ;;  %v1283_v10 = vld [vmem:[#allocation9 + $0x360] sm:$0xff]  ;;  %v1280_v35 = vld [vmem:[#allocation9 + $0x348] sm:$0xff] }
  0xbb   :  { %1949 = vmatprep.subr.bf16.mxu0 %v5167_v38  ;;  %1990 = vmatprep.subr.bf16.mxu1 %v5170_v41  ;;  %7106 = vst [vmem:[#allocation38_spill] sm:$0xff] %v5189_v27  ;;  %v5273_v63 = vcombine.low %v1256_v36, %v1260_v39  ;;  %v1284_v36 = vld [vmem:[#allocation9 + $0x368] sm:$0xff] }
  0xbc   :  { %767 = vmatprep.mubr.bf16.mxu0 %v4973_v0  ;;  %840 = vmatprep.mubr.bf16.mxu1 %v4973_v0  ;;  %7128 = vst [vmem:[#allocation60_spill] sm:$0xff] %v5263_v45  ;;  %7129 = vst [vmem:[#allocation61_spill] sm:$0xff] %v5266_v48 }
  0xbd   :  { %7130 = vst [vmem:[#allocation62_spill] sm:$0xff] %v5269_v56  ;;  %7131 = vst [vmem:[#allocation63_spill] sm:$0xff] %v5273_v63 }
  0xbe   :  { %1950 = vmatpush1.bf16.msra.mxu0 %v5174_v42  ;;  %1991 = vmatpush1.bf16.msra.mxu1 %v5179_v46 }
  0xbf   :  { %1951 = vmatprep.subr.bf16.mxu0 %v5181_v47  ;;  %1992 = vmatprep.subr.bf16.mxu1 %v5184_v50 }
  0xc1   :  { %768 = vmatmul.mubr.bf16.gmra.mrb[24].mxu0 %v5117_v44  ;;  %841 = vmatmul.mubr.bf16.gmra.mrb[24].mxu1 %v5117_v44  ;;  %v5217_v44 = vcombine.low %v1223_v51, %v1227_v52  ;;  %v1267_v51 = vld [vmem:[#allocation9 + $0x2e0] sm:$0xff]  ;;  %v1264_v52 = vld [vmem:[#allocation9 + $0x2c8] sm:$0xff] }
  0xc2   :  { %1952 = vmatpush1.bf16.msra.mxu0 %v5189_v27  ;;  %1993 = vmatpush1.bf16.msra.mxu1 %v5193_v53  ;;  %v5275_v1 = vcombine.high %v1263_v49, %v1267_v51  ;;  %v5278_v2 = vcombine.high %v1264_v52, %v1268_v55  ;;  %v5285_v17 = vcombine.low %v1264_v52, %v1268_v55  ;;  %v1287_v55 = vld [vmem:[#allocation9 + $0x380] sm:$0xff] }
  0xc3   :  { %1953 = vmatprep.subr.bf16.mxu0 %v5195_v54  ;;  %1994 = vmatprep.subr.bf16.mxu1 %v5198_v57  ;;  %7114 = vst [vmem:[#allocation46_spill] sm:$0xff] %v5217_v44  ;;  %v5302_v52 = vcombine.high %v1280_v35, %v1284_v36 }
  0xc4   :  { %777 = vmatprep.mubr.bf16.mxu0 %v4973_v0  ;;  %850 = vmatprep.mubr.bf16.mxu1 %v4973_v0  ;;  %v1244_v0 = vld [vmem:[#allocation9 + $0x228] sm:$0xff]  ;;  %7132 = vst [vmem:[#allocation64_spill] sm:$0xff] %v5275_v1  ;;  %7133 = vst [vmem:[#allocation65_spill] sm:$0xff] %v5278_v2 }
  0xc5   :  { %v5240_v16 = vcombine.high %v1240_v9, %v1244_v0  ;;  %v5249_v28 = vcombine.low %v1240_v9, %v1244_v0  ;;  %v1276_v9 = vld [vmem:[#allocation9 + $0x328] sm:$0xff]  ;;  %v5281_v0 = vcombine.low %v1263_v49, %v1267_v51  ;;  %7135 = vst [vmem:[#allocation67_spill] sm:$0xff] %v5285_v17  ;;  %v5299_v51 = vcombine.high %v1279_v25, %v1283_v10 }
  0xc6   :  { %1954 = vmatpush1.bf16.msra.mxu0 %v5202_v58  ;;  %1995 = vmatpush1.bf16.msra.mxu1 %v5207_v59  ;;  %7141 = vst [vmem:[#allocation73_spill] sm:$0xff] %v5302_v52 }
  0xc7   :  { %1955 = vmatprep.subr.bf16.mxu0 %v5209_v60  ;;  %1996 = vmatprep.subr.bf16.mxu1 %v5212_v62  ;;  %7121 = vst [vmem:[#allocation53_spill] sm:$0xff] %v5240_v16  ;;  %7123 = vst [vmem:[#allocation55_spill] sm:$0xff] %v5249_v28 }
  0xc8   :  { %7134 = vst [vmem:[#allocation66_spill] sm:$0xff] %v5281_v0  ;;  %7140 = vst [vmem:[#allocation72_spill] sm:$0xff] %v5299_v51 }
  0xc9   :  { %778 = vmatmul.mubr.bf16.gmra.mrb[28].mxu0 %v5123_v61  ;;  %851 = vmatmul.mubr.bf16.gmra.mrb[28].mxu1 %v5123_v61  ;;  %v5245_v61 = vcombine.low %v1239_v7, %v1243_v8  ;;  %v1275_v7 = vld [vmem:[#allocation9 + $0x320] sm:$0xff]  ;;  %v1272_v8 = vld [vmem:[#allocation9 + $0x308] sm:$0xff] }
  0xca   :  { %1956 = vmatpush1.bf16.msra.mxu0 %v5217_v44  ;;  %1997 = vmatpush1.bf16.msra.mxu1 %v5221_v4  ;;  %v5287_v22 = vcombine.high %v1271_v3, %v1275_v7  ;;  %v5290_v24 = vcombine.high %v1272_v8, %v1276_v9  ;;  %v5293_v39 = vcombine.low %v1271_v3, %v1275_v7 }
  0xcb   :  { %1957 = vmatprep.subr.bf16.mxu0 %v5223_v5  ;;  %1998 = vmatprep.subr.bf16.mxu1 %v5226_v6  ;;  %7122 = vst [vmem:[#allocation54_spill] sm:$0xff] %v5245_v61  ;;  %v5297_v49 = vcombine.low %v1272_v8, %v1276_v9  ;;  %v5305_v3 = vcombine.low %v1279_v25, %v1283_v10 }
  0xcc   :  { %1975 = vmatprep.mubr.bf16.mxu0 %v6790_v23  ;;  %2016 = vmatprep.mubr.bf16.mxu1 %v6790_v23  ;;  %7136 = vst [vmem:[#allocation68_spill] sm:$0xff] %v5287_v22  ;;  %7137 = vst [vmem:[#allocation69_spill] sm:$0xff] %v5290_v24  ;;  %v1291_v23 = vld [vmem:[#allocation9 + $0x3a0] sm:$0xff]  ;;  %v5309_v7 = vcombine.low %v1280_v35, %v1284_v36 }
  0xcd   :  { %7138 = vst [vmem:[#allocation70_spill] sm:$0xff] %v5293_v39  ;;  %7139 = vst [vmem:[#allocation71_spill] sm:$0xff] %v5297_v49  ;;  %v5311_v8 = vcombine.high %v1287_v55, %v1291_v23  ;;  %v5317_v25 = vcombine.low %v1287_v55, %v1291_v23 }
  0xce   :  { %1958 = vmatpush1.bf16.msra.mxu0 %v5230_v11  ;;  %1999 = vmatpush1.bf16.msra.mxu1 %v5235_v14  ;;  %7142 = vst [vmem:[#allocation74_spill] sm:$0xff] %v5305_v3  ;;  %7143 = vst [vmem:[#allocation75_spill] sm:$0xff] %v5309_v7 }
  0xcf   :  { %1959 = vmatprep.subr.bf16.mxu0 %v5237_v15  ;;  %2000 = vmatprep.subr.bf16.mxu1 %v5240_v16  ;;  %7144 = vst [vmem:[#allocation76_spill] sm:$0xff] %v5311_v8  ;;  %7146 = vst [vmem:[#allocation78_spill] sm:$0xff] %v5317_v25 }
  0xd2   :  { %1960 = vmatpush1.bf16.msra.mxu0 %v5245_v61  ;;  %2001 = vmatpush1.bf16.msra.mxu1 %v5249_v28 }
  0xd3   :  { %1961 = vmatprep.subr.bf16.mxu0 %v5251_v29  ;;  %2002 = vmatprep.subr.bf16.mxu1 %v5254_v32 }
  0xd6   :  { %1962 = vmatpush1.bf16.msra.mxu0 %v5257_v40  ;;  %2003 = vmatpush1.bf16.msra.mxu1 %v5261_v43 }
  0xd7   :  { %1963 = vmatprep.subr.bf16.mxu0 %v5263_v45  ;;  %2004 = vmatprep.subr.bf16.mxu1 %v5266_v48 }
  0xda   :  { %1964 = vmatpush1.bf16.msra.mxu0 %v5269_v56  ;;  %2005 = vmatpush1.bf16.msra.mxu1 %v5273_v63  ;;  %v1214_v63 = vld [vmem:[#allocation9 + $0x138] sm:$0xff] }
  0xdb   :  { %1965 = vmatprep.subr.bf16.mxu0 %v5275_v1  ;;  %2006 = vmatprep.subr.bf16.mxu1 %v5278_v2  ;;  %v1288_v2 = vld [vmem:[#allocation9 + $0x388] sm:$0xff] }
  0xdc   :  { %v1292_v1 = vld [vmem:[#allocation9 + $0x3a8] sm:$0xff] }
  0xdd   :  { %v5314_v9 = vcombine.high %v1288_v2, %v1292_v1  ;;  %v5321_v10 = vcombine.low %v1288_v2, %v1292_v1 }
  0xde   :  { %1966 = vmatpush1.bf16.msra.mxu0 %v5281_v0  ;;  %2007 = vmatpush1.bf16.msra.mxu1 %v5285_v17  ;;  %v1296_v17 = vld [vmem:[#allocation9 + $0x3c8] sm:$0xff] }
  0xdf   :  { %1967 = vmatprep.subr.bf16.mxu0 %v5287_v22  ;;  %2008 = vmatprep.subr.bf16.mxu1 %v5290_v24  ;;  %7145 = vst [vmem:[#allocation77_spill] sm:$0xff] %v5314_v9  ;;  %v1295_v24 = vld [vmem:[#allocation9 + $0x3c0] sm:$0xff]  ;;  %v1300_v0 = vld [vmem:[#allocation9 + $0x3e8] sm:$0xff]  ;;  %7147 = vst [vmem:[#allocation79_spill] sm:$0xff] %v5321_v10 }
  0xe0   :  { %v1299_v22 = vld [vmem:[#allocation9 + $0x3e0] sm:$0xff]  ;;  %v5326_v36 = vcombine.high %v1296_v17, %v1300_v0  ;;  %v5333_v1 = vcombine.low %v1296_v17, %v1300_v0 }
  0xe1   :  { %v5323_v35 = vcombine.high %v1295_v24, %v1299_v22  ;;  %v5329_v23 = vcombine.low %v1295_v24, %v1299_v22 }
  0xe2   :  { %1968 = vmatpush1.bf16.msra.mxu0 %v5293_v39  ;;  %2009 = vmatpush1.bf16.msra.mxu1 %v5297_v49  ;;  %7149 = vst [vmem:[#allocation81_spill] sm:$0xff] %v5326_v36  ;;  %v1178_v49 = vld [vmem:[#allocation9 + $0x18] sm:$0xff]  ;;  %7151 = vst [vmem:[#allocation83_spill] sm:$0xff] %v5333_v1 }
  0xe3   :  { %1969 = vmatprep.subr.bf16.mxu0 %v5299_v51  ;;  %2010 = vmatprep.subr.bf16.mxu1 %v5302_v52  ;;  %7148 = vst [vmem:[#allocation80_spill] sm:$0xff] %v5323_v35  ;;  %v1177_v52 = vld [vmem:[#allocation9 + $0x10] sm:$0xff]  ;;  %v1182_v39 = vld [vmem:[#allocation9 + $0x38] sm:$0xff]  ;;  %7150 = vst [vmem:[#allocation82_spill] sm:$0xff] %v5329_v23 }
  0xe4   :  { %v1181_v51 = vld [vmem:[#allocation9 + $0x30] sm:$0xff]  ;;  %v5338_v55 = vcombine.high %v1178_v49, %v1182_v39  ;;  %v5345_v0 = vcombine.low %v1178_v49, %v1182_v39 }
  0xe5   :  { %v5335_v2 = vcombine.high %v1177_v52, %v1181_v51  ;;  %v5341_v22 = vcombine.low %v1177_v52, %v1181_v51 }
  0xe6   :  { %1970 = vmatpush1.bf16.msra.mxu0 %v5305_v3  ;;  %2011 = vmatpush1.bf16.msra.mxu1 %v5309_v7  ;;  %7153 = vst [vmem:[#allocation85_spill] sm:$0xff] %v5338_v55  ;;  %v1186_v7 = vld [vmem:[#allocation9 + $0x58] sm:$0xff]  ;;  %7155 = vst [vmem:[#allocation87_spill] sm:$0xff] %v5345_v0 }
  0xe7   :  { %1971 = vmatprep.subr.bf16.mxu0 %v5311_v8  ;;  %2012 = vmatprep.subr.bf16.mxu1 %v5314_v9  ;;  %7152 = vst [vmem:[#allocation84_spill] sm:$0xff] %v5335_v2  ;;  %v1185_v9 = vld [vmem:[#allocation9 + $0x50] sm:$0xff]  ;;  %v1190_v3 = vld [vmem:[#allocation9 + $0x78] sm:$0xff]  ;;  %7154 = vst [vmem:[#allocation86_spill] sm:$0xff] %v5341_v22 }
  0xe8   :  { %v1189_v8 = vld [vmem:[#allocation9 + $0x70] sm:$0xff]  ;;  %v5350_v24 = vcombine.high %v1186_v7, %v1190_v3  ;;  %v5359_v39 = vcombine.low %v1186_v7, %v1190_v3 }
  0xe9   :  { %v5347_v17 = vcombine.high %v1185_v9, %v1189_v8  ;;  %v5355_v51 = vcombine.low %v1185_v9, %v1189_v8 }
  0xea   :  { %1972 = vmatpush1.bf16.msra.mxu0 %v5317_v25  ;;  %2013 = vmatpush1.bf16.msra.mxu1 %v5321_v10  ;;  %7157 = vst [vmem:[#allocation89_spill] sm:$0xff] %v5350_v24  ;;  %v7158_v10 = vmov 0.0|0.0   ;;  %v1194_v25 = vld [vmem:[#allocation9 + $0x98] sm:$0xff]  ;;  %7160 = vst [vmem:[#allocation91_spill] sm:$0xff] %v5359_v39 }
  0xeb   :  { %1973 = vmatprep.subr.bf16.mxu0 %v5323_v35  ;;  %2014 = vmatprep.subr.bf16.mxu1 %v5326_v36  ;;  %7156 = vst [vmem:[#allocation88_spill] sm:$0xff] %v5347_v17  ;;  %v1193_v36 = vld [vmem:[#allocation9 + $0x90] sm:$0xff]  ;;  %7159 = vst [vmem:[#allocation90_spill] sm:$0xff] %v5355_v51 }
  0xec   :  { %v1197_v35 = vld [vmem:[#allocation9 + $0xb0] sm:$0xff] }
  0xed   :  { %v5361_v49 = vcombine.high %v1193_v36, %v1197_v35  ;;  %v5369_v8 = vcombine.low %v1193_v36, %v1197_v35 }
  0xee   :  { %1974 = vmatpush1.bf16.msra.mxu0 %v5329_v23  ;;  %2015 = vmatpush1.bf16.msra.mxu1 %v5333_v1  ;;  %v1198_v23 = vld [vmem:[#allocation9 + $0xb8] sm:$0xff] }
  0xef   :  { %2025 = vmatprep.subr.bf16.mxu0 %v5335_v2  ;;  %2066 = vmatprep.subr.bf16.mxu1 %v5338_v55  ;;  %7161 = vst [vmem:[#allocation92_spill] sm:$0xff] %v5361_v49  ;;  %v5364_v52 = vcombine.high %v1194_v25, %v1198_v23  ;;  %v1201_v55 = vld [vmem:[#allocation9 + $0xd0] sm:$0xff]  ;;  %v1202_v1 = vld [vmem:[#allocation9 + $0xd8] sm:$0xff]  ;;  %7163 = vst [vmem:[#allocation94_spill] sm:$0xff] %v5369_v8  ;;  %v5373_v3 = vcombine.low %v1194_v25, %v1198_v23 }
  0xf0   :  { %v1205_v2 = vld [vmem:[#allocation9 + $0xf0] sm:$0xff] }
  0xf1   :  { %1976 = vmatmul.mubr.bf16.vlgmr.msra.gmra.mrb[32].mxu0 %v7158_v10  ;;  %2017 = vmatmul.mubr.bf16.vlgmr.msra.gmra.mrb[32].mxu1 %v7158_v10  ;;  %7162 = vst [vmem:[#allocation93_spill] sm:$0xff] %v5364_v52  ;;  %7164 = vst [vmem:[#allocation95_spill] sm:$0xff] %v5373_v3  ;;  %v5375_v7 = vcombine.high %v1201_v55, %v1205_v2  ;;  %v5381_v35 = vcombine.low %v1201_v55, %v1205_v2 }
  0xf2   :  { %2026 = vmatpush1.bf16.msra.mxu0 %v5341_v22  ;;  %2067 = vmatpush1.bf16.msra.mxu1 %v5345_v0  ;;  %v1206_v22 = vld [vmem:[#allocation9 + $0xf8] sm:$0xff] }
  0xf3   :  { %2027 = vmatprep.subr.bf16.mxu0 %v5347_v17  ;;  %2068 = vmatprep.subr.bf16.mxu1 %v5350_v24  ;;  %7165 = vst [vmem:[#allocation96_spill] sm:$0xff] %v5375_v7  ;;  %v5378_v9 = vcombine.high %v1202_v1, %v1206_v22  ;;  %v1209_v24 = vld [vmem:[#allocation9 + $0x110] sm:$0xff]  ;;  %v1210_v0 = vld [vmem:[#allocation9 + $0x118] sm:$0xff]  ;;  %7167 = vst [vmem:[#allocation98_spill] sm:$0xff] %v5381_v35  ;;  %v5385_v25 = vcombine.low %v1202_v1, %v1206_v22 }
  0xf4   :  { %2057 = vmatprep.mubr.bf16.mxu0 %v7158_v10  ;;  %2098 = vmatprep.mubr.bf16.mxu1 %v7158_v10  ;;  %v1213_v17 = vld [vmem:[#allocation9 + $0x130] sm:$0xff]  ;;  %v5390_v23 = vcombine.high %v1210_v0, %v1214_v63  ;;  %v5397_v1 = vcombine.low %v1210_v0, %v1214_v63 }
  0xf5   :  { %7166 = vst [vmem:[#allocation97_spill] sm:$0xff] %v5378_v9  ;;  %7168 = vst [vmem:[#allocation99_spill] sm:$0xff] %v5385_v25  ;;  %v5387_v36 = vcombine.high %v1209_v24, %v1213_v17  ;;  %v5393_v2 = vcombine.low %v1209_v24, %v1213_v17 }
  0xf6   :  { %2028 = vmatpush1.bf16.msra.mxu0 %v5355_v51  ;;  %2069 = vmatpush1.bf16.msra.mxu1 %v5359_v39  ;;  %7170 = vst [vmem:[#allocation101_spill] sm:$0xff] %v5390_v23  ;;  %v1218_v39 = vld [vmem:[#allocation9 + $0x158] sm:$0xff]  ;;  %7172 = vst [vmem:[#allocation103_spill] sm:$0xff] %v5397_v1 }
  0xf7   :  { %2029 = vmatprep.subr.bf16.mxu0 %v5361_v49  ;;  %2070 = vmatprep.subr.bf16.mxu1 %v5364_v52  ;;  %7169 = vst [vmem:[#allocation100_spill] sm:$0xff] %v5387_v36  ;;  %v1217_v52 = vld [vmem:[#allocation9 + $0x150] sm:$0xff]  ;;  %v1222_v51 = vld [vmem:[#allocation9 + $0x178] sm:$0xff]  ;;  %7171 = vst [vmem:[#allocation102_spill] sm:$0xff] %v5393_v2 }
  0xf8   :  { %v1221_v49 = vld [vmem:[#allocation9 + $0x170] sm:$0xff]  ;;  %v5402_v22 = vcombine.high %v1218_v39, %v1222_v51  ;;  %v5409_v63 = vcombine.low %v1218_v39, %v1222_v51 }
  0xf9   :  { %v5399_v55 = vcombine.high %v1217_v52, %v1221_v49  ;;  %v5405_v17 = vcombine.low %v1217_v52, %v1221_v49 }
  0xfa   :  { %2030 = vmatpush1.bf16.msra.mxu0 %v5369_v8  ;;  %2071 = vmatpush1.bf16.msra.mxu1 %v5373_v3  ;;  %7174 = vst [vmem:[#allocation105_spill] sm:$0xff] %v5402_v22  ;;  %v1226_v3 = vld [vmem:[#allocation9 + $0x198] sm:$0xff]  ;;  %7176 = vst [vmem:[#allocation107_spill] sm:$0xff] %v5409_v63 }
  0xfb   :  { %2031 = vmatprep.subr.bf16.mxu0 %v5375_v7  ;;  %2072 = vmatprep.subr.bf16.mxu1 %v5378_v9  ;;  %7173 = vst [vmem:[#allocation104_spill] sm:$0xff] %v5399_v55  ;;  %v1225_v9 = vld [vmem:[#allocation9 + $0x190] sm:$0xff]  ;;  %v1230_v8 = vld [vmem:[#allocation9 + $0x1b8] sm:$0xff]  ;;  %7175 = vst [vmem:[#allocation106_spill] sm:$0xff] %v5405_v17 }
  0xfc   :  { %v1229_v7 = vld [vmem:[#allocation9 + $0x1b0] sm:$0xff]  ;;  %v5414_v24 = vcombine.high %v1226_v3, %v1230_v8  ;;  %v5421_v51 = vcombine.low %v1226_v3, %v1230_v8 }
  0xfd   :  { %v5411_v0 = vcombine.high %v1225_v9, %v1229_v7  ;;  %v5417_v49 = vcombine.low %v1225_v9, %v1229_v7 }
  0xfe   :  { %2032 = vmatpush1.bf16.msra.mxu0 %v5381_v35  ;;  %2073 = vmatpush1.bf16.msra.mxu1 %v5385_v25  ;;  %7178 = vst [vmem:[#allocation109_spill] sm:$0xff] %v5414_v24  ;;  %v1234_v25 = vld [vmem:[#allocation9 + $0x1d8] sm:$0xff]  ;;  %7180 = vst [vmem:[#allocation111_spill] sm:$0xff] %v5421_v51 }
  0xff   :  { %2033 = vmatprep.subr.bf16.mxu0 %v5387_v36  ;;  %2074 = vmatprep.subr.bf16.mxu1 %v5390_v23  ;;  %7177 = vst [vmem:[#allocation108_spill] sm:$0xff] %v5411_v0  ;;  %v1233_v23 = vld [vmem:[#allocation9 + $0x1d0] sm:$0xff]  ;;  %v1238_v35 = vld [vmem:[#allocation9 + $0x1f8] sm:$0xff]  ;;  %7179 = vst [vmem:[#allocation110_spill] sm:$0xff] %v5417_v49 }
 0x100   :  { %v1237_v36 = vld [vmem:[#allocation9 + $0x1f0] sm:$0xff]  ;;  %v5426_v52 = vcombine.high %v1234_v25, %v1238_v35  ;;  %v5433_v8 = vcombine.low %v1234_v25, %v1238_v35 }
 0x101   :  { %v5423_v39 = vcombine.high %v1233_v23, %v1237_v36  ;;  %v5429_v7 = vcombine.low %v1233_v23, %v1237_v36 }
 0x102   :  { %2034 = vmatpush1.bf16.msra.mxu0 %v5393_v2  ;;  %2075 = vmatpush1.bf16.msra.mxu1 %v5397_v1  ;;  %7182 = vst [vmem:[#allocation113_spill] sm:$0xff] %v5426_v52  ;;  %v1242_v1 = vld [vmem:[#allocation9 + $0x218] sm:$0xff]  ;;  %7184 = vst [vmem:[#allocation115_spill] sm:$0xff] %v5433_v8 }
 0x103   :  { %2035 = vmatprep.subr.bf16.mxu0 %v5399_v55  ;;  %2076 = vmatprep.subr.bf16.mxu1 %v5402_v22  ;;  %7181 = vst [vmem:[#allocation112_spill] sm:$0xff] %v5423_v39  ;;  %v1241_v22 = vld [vmem:[#allocation9 + $0x210] sm:$0xff]  ;;  %v1246_v2 = vld [vmem:[#allocation9 + $0x238] sm:$0xff]  ;;  %7183 = vst [vmem:[#allocation114_spill] sm:$0xff] %v5429_v7 }
 0x104   :  { %v1245_v55 = vld [vmem:[#allocation9 + $0x230] sm:$0xff]  ;;  %v5438_v9 = vcombine.high %v1242_v1, %v1246_v2  ;;  %v5445_v35 = vcombine.low %v1242_v1, %v1246_v2 }
 0x105   :  { %v5435_v3 = vcombine.high %v1241_v22, %v1245_v55  ;;  %v5441_v36 = vcombine.low %v1241_v22, %v1245_v55 }
 0x106   :  { %2036 = vmatpush1.bf16.msra.mxu0 %v5405_v17  ;;  %2077 = vmatpush1.bf16.msra.mxu1 %v5409_v63  ;;  %7186 = vst [vmem:[#allocation117_spill] sm:$0xff] %v5438_v9  ;;  %v1250_v63 = vld [vmem:[#allocation9 + $0x258] sm:$0xff]  ;;  %7188 = vst [vmem:[#allocation119_spill] sm:$0xff] %v5445_v35 }
 0x107   :  { %2037 = vmatprep.subr.bf16.mxu0 %v5411_v0  ;;  %2078 = vmatprep.subr.bf16.mxu1 %v5414_v24  ;;  %7185 = vst [vmem:[#allocation116_spill] sm:$0xff] %v5435_v3  ;;  %v1249_v24 = vld [vmem:[#allocation9 + $0x250] sm:$0xff]  ;;  %v1254_v17 = vld [vmem:[#allocation9 + $0x278] sm:$0xff]  ;;  %7187 = vst [vmem:[#allocation118_spill] sm:$0xff] %v5441_v36 }
 0x108   :  { %v1253_v0 = vld [vmem:[#allocation9 + $0x270] sm:$0xff]  ;;  %v5450_v23 = vcombine.high %v1250_v63, %v1254_v17  ;;  %v5457_v2 = vcombine.low %v1250_v63, %v1254_v17 }
 0x109   :  { %v5447_v25 = vcombine.high %v1249_v24, %v1253_v0  ;;  %v5453_v55 = vcombine.low %v1249_v24, %v1253_v0 }
 0x10a   :  { %2038 = vmatpush1.bf16.msra.mxu0 %v5417_v49  ;;  %2079 = vmatpush1.bf16.msra.mxu1 %v5421_v51  ;;  %7190 = vst [vmem:[#allocation121_spill] sm:$0xff] %v5450_v23  ;;  %v1258_v51 = vld [vmem:[#allocation9 + $0x298] sm:$0xff]  ;;  %7192 = vst [vmem:[#allocation123_spill] sm:$0xff] %v5457_v2 }
 0x10b   :  { %2039 = vmatprep.subr.bf16.mxu0 %v5423_v39  ;;  %2080 = vmatprep.subr.bf16.mxu1 %v5426_v52  ;;  %7189 = vst [vmem:[#allocation120_spill] sm:$0xff] %v5447_v25  ;;  %v1257_v52 = vld [vmem:[#allocation9 + $0x290] sm:$0xff]  ;;  %v1262_v49 = vld [vmem:[#allocation9 + $0x2b8] sm:$0xff]  ;;  %7191 = vst [vmem:[#allocation122_spill] sm:$0xff] %v5453_v55 }
 0x10c   :  { %v1261_v39 = vld [vmem:[#allocation9 + $0x2b0] sm:$0xff]  ;;  %v5462_v22 = vcombine.high %v1258_v51, %v1262_v49  ;;  %v5469_v17 = vcombine.low %v1258_v51, %v1262_v49 }
 0x10d   :  { %v5459_v1 = vcombine.high %v1257_v52, %v1261_v39  ;;  %v5465_v0 = vcombine.low %v1257_v52, %v1261_v39 }
 0x10e   :  { %2040 = vmatpush1.bf16.msra.mxu0 %v5429_v7  ;;  %2081 = vmatpush1.bf16.msra.mxu1 %v5433_v8  ;;  %7194 = vst [vmem:[#allocation125_spill] sm:$0xff] %v5462_v22  ;;  %v1266_v8 = vld [vmem:[#allocation9 + $0x2d8] sm:$0xff]  ;;  %7196 = vst [vmem:[#allocation127_spill] sm:$0xff] %v5469_v17 }
 0x10f   :  { %2041 = vmatprep.subr.bf16.mxu0 %v5435_v3  ;;  %2082 = vmatprep.subr.bf16.mxu1 %v5438_v9  ;;  %7193 = vst [vmem:[#allocation124_spill] sm:$0xff] %v5459_v1  ;;  %v1265_v9 = vld [vmem:[#allocation9 + $0x2d0] sm:$0xff]  ;;  %v1270_v7 = vld [vmem:[#allocation9 + $0x2f8] sm:$0xff]  ;;  %7195 = vst [vmem:[#allocation126_spill] sm:$0xff] %v5465_v0 }
 0x110   :  { %v1269_v3 = vld [vmem:[#allocation9 + $0x2f0] sm:$0xff]  ;;  %v5474_v24 = vcombine.high %v1266_v8, %v1270_v7  ;;  %v5481_v49 = vcombine.low %v1266_v8, %v1270_v7 }
 0x111   :  { %v5471_v63 = vcombine.high %v1265_v9, %v1269_v3  ;;  %v5477_v39 = vcombine.low %v1265_v9, %v1269_v3 }
 0x112   :  { %2042 = vmatpush1.bf16.msra.mxu0 %v5441_v36  ;;  %2083 = vmatpush1.bf16.msra.mxu1 %v5445_v35  ;;  %7198 = vst [vmem:[#allocation129_spill] sm:$0xff] %v5474_v24  ;;  %v1274_v35 = vld [vmem:[#allocation9 + $0x318] sm:$0xff]  ;;  %7200 = vst [vmem:[#allocation131_spill] sm:$0xff] %v5481_v49 }
 0x113   :  { %2043 = vmatprep.subr.bf16.mxu0 %v5447_v25  ;;  %2084 = vmatprep.subr.bf16.mxu1 %v5450_v23  ;;  %7197 = vst [vmem:[#allocation128_spill] sm:$0xff] %v5471_v63  ;;  %v1273_v23 = vld [vmem:[#allocation9 + $0x310] sm:$0xff]  ;;  %v1278_v36 = vld [vmem:[#allocation9 + $0x338] sm:$0xff]  ;;  %7199 = vst [vmem:[#allocation130_spill] sm:$0xff] %v5477_v39 }
 0x114   :  { %v1277_v25 = vld [vmem:[#allocation9 + $0x330] sm:$0xff]  ;;  %v5486_v52 = vcombine.high %v1274_v35, %v1278_v36  ;;  %v5493_v7 = vcombine.low %v1274_v35, %v1278_v36 }
 0x115   :  { %v5483_v51 = vcombine.high %v1273_v23, %v1277_v25  ;;  %v5489_v3 = vcombine.low %v1273_v23, %v1277_v25 }
 0x116   :  { %2044 = vmatpush1.bf16.msra.mxu0 %v5453_v55  ;;  %2085 = vmatpush1.bf16.msra.mxu1 %v5457_v2  ;;  %7202 = vst [vmem:[#allocation133_spill] sm:$0xff] %v5486_v52  ;;  %v1282_v2 = vld [vmem:[#allocation9 + $0x358] sm:$0xff]  ;;  %7204 = vst [vmem:[#allocation135_spill] sm:$0xff] %v5493_v7 }
 0x117   :  { %2045 = vmatprep.subr.bf16.mxu0 %v5459_v1  ;;  %2086 = vmatprep.subr.bf16.mxu1 %v5462_v22  ;;  %7201 = vst [vmem:[#allocation132_spill] sm:$0xff] %v5483_v51  ;;  %v1281_v22 = vld [vmem:[#allocation9 + $0x350] sm:$0xff]  ;;  %v1286_v55 = vld [vmem:[#allocation9 + $0x378] sm:$0xff]  ;;  %7203 = vst [vmem:[#allocation134_spill] sm:$0xff] %v5489_v3 }
 0x118   :  { %v1285_v1 = vld [vmem:[#allocation9 + $0x370] sm:$0xff]  ;;  %v5498_v9 = vcombine.high %v1282_v2, %v1286_v55  ;;  %v5505_v36 = vcombine.low %v1282_v2, %v1286_v55 }
 0x119   :  { %v5495_v8 = vcombine.high %v1281_v22, %v1285_v1  ;;  %v5501_v25 = vcombine.low %v1281_v22, %v1285_v1 }
 0x11a   :  { %2046 = vmatpush1.bf16.msra.mxu0 %v5465_v0  ;;  %2087 = vmatpush1.bf16.msra.mxu1 %v5469_v17  ;;  %7206 = vst [vmem:[#allocation137_spill] sm:$0xff] %v5498_v9  ;;  %v1290_v17 = vld [vmem:[#allocation9 + $0x398] sm:$0xff]  ;;  %7208 = vst [vmem:[#allocation139_spill] sm:$0xff] %v5505_v36 }
 0x11b   :  { %2047 = vmatprep.subr.bf16.mxu0 %v5471_v63  ;;  %2088 = vmatprep.subr.bf16.mxu1 %v5474_v24  ;;  %7205 = vst [vmem:[#allocation136_spill] sm:$0xff] %v5495_v8  ;;  %v1289_v24 = vld [vmem:[#allocation9 + $0x390] sm:$0xff]  ;;  %v1294_v0 = vld [vmem:[#allocation9 + $0x3b8] sm:$0xff]  ;;  %7207 = vst [vmem:[#allocation138_spill] sm:$0xff] %v5501_v25 }
 0x11c   :  { %v1293_v63 = vld [vmem:[#allocation9 + $0x3b0] sm:$0xff]  ;;  %v5510_v23 = vcombine.high %v1290_v17, %v1294_v0  ;;  %v5517_v55 = vcombine.low %v1290_v17, %v1294_v0  ;;  %v7217_v17 = vld [vmem:[#allocation63_spill] sm:$0xff] }
 0x11d   :  { %v5507_v35 = vcombine.high %v1289_v24, %v1293_v63  ;;  %v5513_v1 = vcombine.low %v1289_v24, %v1293_v63  ;;  %v7218_v24 = vld [vmem:[#allocation64_spill] sm:$0xff] }
 0x11e   :  { %2048 = vmatpush1.bf16.msra.mxu0 %v5477_v39  ;;  %2089 = vmatpush1.bf16.msra.mxu1 %v5481_v49  ;;  %7210 = vst [vmem:[#allocation141_spill] sm:$0xff] %v5510_v23  ;;  %v1298_v49 = vld [vmem:[#allocation9 + $0x3d8] sm:$0xff]  ;;  %7212 = vst [vmem:[#allocation143_spill] sm:$0xff] %v5517_v55 }
 0x11f   :  { %2049 = vmatprep.subr.bf16.mxu0 %v5483_v51  ;;  %2090 = vmatprep.subr.bf16.mxu1 %v5486_v52  ;;  %7209 = vst [vmem:[#allocation140_spill] sm:$0xff] %v5507_v35  ;;  %v1297_v52 = vld [vmem:[#allocation9 + $0x3d0] sm:$0xff]  ;;  %v1302_v39 = vld [vmem:[#allocation9 + $0x3f8] sm:$0xff]  ;;  %7211 = vst [vmem:[#allocation142_spill] sm:$0xff] %v5513_v1 }
 0x120   :  { %v1301_v51 = vld [vmem:[#allocation9 + $0x3f0] sm:$0xff]  ;;  %v5522_v22 = vcombine.high %v1298_v49, %v1302_v39  ;;  %v5529_v63 = vcombine.low %v1298_v49, %v1302_v39 }
 0x121   :  { %v5519_v2 = vcombine.high %v1297_v52, %v1301_v51  ;;  %v7219_v39 = vld [vmem:[#allocation65_spill] sm:$0xff] }
 0x122   :  { %2050 = vmatpush1.bf16.msra.mxu0 %v5489_v3  ;;  %2091 = vmatpush1.bf16.msra.mxu1 %v5493_v7  ;;  %7214 = vst [vmem:[#allocation145_spill] sm:$0xff] %v5522_v22  ;;  %7216 = vst [vmem:[#allocation147_spill] sm:$0xff] %v5529_v63 }
 0x123   :  { %2051 = vmatprep.subr.bf16.mxu0 %v5495_v8  ;;  %2092 = vmatprep.subr.bf16.mxu1 %v5498_v9  ;;  %7213 = vst [vmem:[#allocation144_spill] sm:$0xff] %v5519_v2  ;;  %v5525_v9 = vcombine.low %v1297_v52, %v1301_v51  ;;  %v5585_v51 = vld [vmem:[#allocation8] sm:$0xff] }
 0x125   :  { %7215 = vst [vmem:[#allocation146_spill] sm:$0xff] %v5525_v9 }
 0x126   :  { %2052 = vmatpush1.bf16.msra.mxu0 %v5501_v25  ;;  %2093 = vmatpush1.bf16.msra.mxu1 %v5505_v36 }
 0x127   :  { %2053 = vmatprep.subr.bf16.mxu0 %v5507_v35  ;;  %2094 = vmatprep.subr.bf16.mxu1 %v5510_v23 }
 0x12a   :  { %2054 = vmatpush1.bf16.msra.mxu0 %v5513_v1  ;;  %2095 = vmatpush1.bf16.msra.mxu1 %v5517_v55 }
 0x12b   :  { %2055 = vmatprep.subr.bf16.mxu0 %v5519_v2  ;;  %2096 = vmatprep.subr.bf16.mxu1 %v5522_v22 }
 0x12e   :  { %2056 = vmatpush1.bf16.msra.mxu0 %v5525_v9  ;;  %2097 = vmatpush1.bf16.msra.mxu1 %v5529_v63 }
 0x12f   :  { %2191 = vmatprep.subr.bf16.mxu0 %v5128_v12  ;;  %2232 = vmatprep.subr.bf16.mxu1 %v5131_v13 }
 0x131   :  { %2058 = vmatmul.mubr.bf16.vlgmr.msra.gmra.mrb[36].mxu0 %v7158_v10  ;;  %2099 = vmatmul.mubr.bf16.vlgmr.msra.gmra.mrb[36].mxu1 %v7158_v10  ;;  %v185_v10 = vlaneseq }
 0x132   :  { %2192 = vmatpush1.bf16.msra.mxu0 %v5134_v18  ;;  %2233 = vmatpush1.bf16.msra.mxu1 %v5137_v19 }
 0x133   :  { %2193 = vmatprep.subr.bf16.mxu0 %v5139_v20  ;;  %2234 = vmatprep.subr.bf16.mxu1 %v5142_v21  ;;  %v5578_v0 = vshrl.u32 %v185_v10, 7 }
 0x135   :  { %v187_v49 = vsub.s32 0, %v5578_v0  ;;  %v191_v52 = vsub.s32 1, %v5578_v0  ;;  %v199_v10 = vsub.s32 3, %v5578_v0 }
 0x136   :  { %2194 = vmatpush1.bf16.msra.mxu0 %v5147_v26  ;;  %2235 = vmatpush1.bf16.msra.mxu1 %v5151_v30 }
 0x137   :  { %2195 = vmatprep.subr.bf16.mxu0 %v5153_v31  ;;  %2236 = vmatprep.subr.bf16.mxu1 %v5156_v33 }
 0x13a   :  { %2196 = vmatpush1.bf16.msra.mxu0 %v5161_v34  ;;  %2237 = vmatpush1.bf16.msra.mxu1 %v5165_v37 }
 0x13b   :  { %2197 = vmatprep.subr.bf16.mxu0 %v5167_v38  ;;  %2238 = vmatprep.subr.bf16.mxu1 %v5170_v41 }
 0x13e   :  { %2198 = vmatpush1.bf16.msra.mxu0 %v5174_v42  ;;  %2239 = vmatpush1.bf16.msra.mxu1 %v5179_v46 }
 0x13f   :  { %2199 = vmatprep.subr.bf16.mxu0 %v5181_v47  ;;  %2240 = vmatprep.subr.bf16.mxu1 %v5184_v50 }
 0x142   :  { %2200 = vmatpush1.bf16.msra.mxu0 %v5189_v27  ;;  %2241 = vmatpush1.bf16.msra.mxu1 %v5193_v53 }
 0x143   :  { %2201 = vmatprep.subr.bf16.mxu0 %v5195_v54  ;;  %2242 = vmatprep.subr.bf16.mxu1 %v5198_v57 }
 0x146   :  { %2202 = vmatpush1.bf16.msra.mxu0 %v5202_v58  ;;  %2243 = vmatpush1.bf16.msra.mxu1 %v5207_v59 }
 0x147   :  { %2203 = vmatprep.subr.bf16.mxu0 %v5209_v60  ;;  %2244 = vmatprep.subr.bf16.mxu1 %v5212_v62 }
 0x14a   :  { %2204 = vmatpush1.bf16.msra.mxu0 %v5217_v44  ;;  %2245 = vmatpush1.bf16.msra.mxu1 %v5221_v4  ;;  %v7243_v44 = vld [vmem:[#allocation85_spill] sm:$0xff] }
 0x14b   :  { %2205 = vmatprep.subr.bf16.mxu0 %v5223_v5  ;;  %2246 = vmatprep.subr.bf16.mxu1 %v5226_v6  ;;  %v7231_v5 = vld [vmem:[#allocation77_spill] sm:$0xff] }
 0x14e   :  { %2206 = vmatpush1.bf16.msra.mxu0 %v5230_v11  ;;  %2247 = vmatpush1.bf16.msra.mxu1 %v5235_v14  ;;  %v7229_v11 = vld [vmem:[#allocation75_spill] sm:$0xff] }
 0x14f   :  { %2207 = vmatprep.subr.bf16.mxu0 %v5237_v15  ;;  %2248 = vmatprep.subr.bf16.mxu1 %v5240_v16  ;;  %v7228_v15 = vld [vmem:[#allocation74_spill] sm:$0xff] }
 0x152   :  { %2208 = vmatpush1.bf16.msra.mxu0 %v5245_v61  ;;  %2249 = vmatpush1.bf16.msra.mxu1 %v5249_v28 }
 0x153   :  { %2209 = vmatprep.subr.bf16.mxu0 %v5251_v29  ;;  %2250 = vmatprep.subr.bf16.mxu1 %v5254_v32  ;;  %v7224_v32 = vld [vmem:[#allocation70_spill] sm:$0xff]  ;;  %v7225_v29 = vld [vmem:[#allocation71_spill] sm:$0xff] }
 0x156   :  { %2210 = vmatpush1.bf16.msra.mxu0 %v5257_v40  ;;  %2251 = vmatpush1.bf16.msra.mxu1 %v5261_v43  ;;  %v7220_v43 = vld [vmem:[#allocation66_spill] sm:$0xff] }
 0x157   :  { %2211 = vmatprep.subr.bf16.mxu0 %v5263_v45  ;;  %2252 = vmatprep.subr.bf16.mxu1 %v5266_v48  ;;  %v195_v45 = vsub.s32 2, %v5578_v0  ;;  %v7221_v48 = vld [vmem:[#allocation67_spill] sm:$0xff] }
 0x159   :  { %v5601_v40 = vrot.slane %v5585_v51, %v195_v45 }
 0x15a   :  { %2212 = vmatpush1.bf16.msra.mxu0 %v5269_v56  ;;  %2253 = vmatpush1.bf16.msra.mxu1 %v7217_v17  ;;  %v7222_v56 = vld [vmem:[#allocation68_spill] sm:$0xff]  ;;  %v7223_v17 = vld [vmem:[#allocation69_spill] sm:$0xff] }
 0x15b   :  { %2213 = vmatprep.subr.bf16.mxu0 %v7218_v24  ;;  %2254 = vmatprep.subr.bf16.mxu1 %v7219_v39  ;;  %v5595_v39 = vrot.slane %v5585_v51, %v187_v49  ;;  %v5598_v24 = vrot.slane %v5585_v51, %v191_v52 }
 0x15e   :  { %2214 = vmatpush1.bf16.msra.mxu0 %v7220_v43  ;;  %2255 = vmatpush1.bf16.msra.mxu1 %v7221_v48  ;;  %v5605_v43 = vrot.slane %v5585_v51, %v199_v10  ;;  %v7226_v48 = vld [vmem:[#allocation72_spill] sm:$0xff] }
 0x15f   :  { %2215 = vmatprep.subr.bf16.mxu0 %v7222_v56  ;;  %2256 = vmatprep.subr.bf16.mxu1 %v7223_v17  ;;  %v7227_v17 = vld [vmem:[#allocation73_spill] sm:$0xff] }
 0x162   :  { %2216 = vmatpush1.bf16.msra.mxu0 %v7224_v32  ;;  %2257 = vmatpush1.bf16.msra.mxu1 %v7225_v29 }
 0x163   :  { %2217 = vmatprep.subr.bf16.mxu0 %v7226_v48  ;;  %2258 = vmatprep.subr.bf16.mxu1 %v7227_v17  ;;  %v7230_v17 = vld [vmem:[#allocation76_spill] sm:$0xff] }
 0x164   :  { %v603_v56 = vpop.f32.mrb[0].mxu0  ;;  %v676_v52 = vpop.f32.mrb[0].mxu1 }
 0x165   :  { %v604_v49 = vadd.f32 %v603_v56, %v5595_v39  ;;  %v605_v28 = vpop.f32.mrb[1].mxu0  ;;  %v677_v16 = vadd.f32 %v676_v52, %v5601_v40  ;;  %v678_v32 = vpop.f32.mrb[1].mxu1 }
 0x166   :  { %v606_v61 = vadd.f32 %v605_v28, %v5598_v24  ;;  %v607_v45 = vpop.f32.mrb[2].mxu0  ;;  %2218 = vmatpush1.bf16.msra.mxu0 %v7228_v15  ;;  %v679_v48 = vadd.f32 %v678_v32, %v5605_v43  ;;  %v680_v14 = vpop.f32.mrb[2].mxu1  ;;  %2259 = vmatpush1.bf16.msra.mxu1 %v7229_v11  ;;  %v7234_v32 = vld [vmem:[#allocation78_spill] sm:$0xff] }
 0x167   :  { %v608_v10 = vadd.f32 %v607_v45, %v5595_v39  ;;  %v609_v29 = vpop.f32.mrb[3].mxu0  ;;  %2219 = vmatprep.subr.bf16.mxu0 %v7230_v17  ;;  %v681_v6 = vadd.f32 %v680_v14, %v5601_v40  ;;  %v682_v52 = vpop.f32.mrb[3].mxu1  ;;  %2260 = vmatprep.subr.bf16.mxu1 %v7231_v5  ;;  %v7236_v17 = vld [vmem:[#allocation79_spill] sm:$0xff] }
 0x168   :  { %v5618_v56 = vpack.c.bf16 %v606_v61, %v604_v49  ;;  %v610_v28 = vadd.f32 %v609_v29, %v5598_v24  ;;  %v5623_v15 = vpack.c.bf16 %v679_v48, %v677_v16  ;;  %v683_v45 = vadd.f32 %v682_v52, %v5605_v43  ;;  %v7237_v61 = vld [vmem:[#allocation80_spill] sm:$0xff]  ;;  %v7238_v49 = vld [vmem:[#allocation81_spill] sm:$0xff] }
 0x16a   :  { %7232 = vst [vmem:[#allocation148_spill] sm:$0xff] %v5623_v15  ;;  %v5626_v4 = vpack.c.bf16 %v610_v28, %v608_v10  ;;  %2220 = vmatpush1.bf16.msra.mxu0 %v7234_v32  ;;  %v5629_v11 = vpack.c.bf16 %v683_v45, %v681_v6  ;;  %2261 = vmatpush1.bf16.msra.mxu1 %v7236_v17  ;;  %v7240_v17 = vld [vmem:[#allocation83_spill] sm:$0xff] }
 0x16b   :  { %2221 = vmatprep.subr.bf16.mxu0 %v7237_v61  ;;  %2262 = vmatprep.subr.bf16.mxu1 %v7238_v49  ;;  %v7241_v49 = vld [vmem:[#allocation84_spill] sm:$0xff] }
 0x16c   :  { %7233 = vst [vmem:[#allocation149_spill] sm:$0xff] %v5626_v4  ;;  %7235 = vst [vmem:[#allocation150_spill] sm:$0xff] %v5629_v11  ;;  %v613_v29 = vpop.f32.mrb[4].mxu0  ;;  %v686_v16 = vpop.f32.mrb[4].mxu1  ;;  %v7239_v4 = vld [vmem:[#allocation82_spill] sm:$0xff] }
 0x16d   :  { %v614_v14 = vadd.f32 %v613_v29, %v5595_v39  ;;  %v615_v5 = vpop.f32.mrb[5].mxu0  ;;  %v687_v10 = vadd.f32 %v686_v16, %v5601_v40  ;;  %v688_v28 = vpop.f32.mrb[5].mxu1 }
 0x16e   :  { %v616_v48 = vadd.f32 %v615_v5, %v5598_v24  ;;  %v617_v52 = vpop.f32.mrb[6].mxu0  ;;  %2222 = vmatpush1.bf16.msra.mxu0 %v7239_v4  ;;  %v689_v11 = vadd.f32 %v688_v28, %v5605_v43  ;;  %v690_v61 = vpop.f32.mrb[6].mxu1  ;;  %2263 = vmatpush1.bf16.msra.mxu1 %v7240_v17 }
 0x16f   :  { %v618_v6 = vadd.f32 %v617_v52, %v5595_v39  ;;  %v619_v45 = vpop.f32.mrb[7].mxu0  ;;  %2273 = vmatprep.subr.bf16.mxu0 %v7241_v49  ;;  %v691_v32 = vadd.f32 %v690_v61, %v5601_v40  ;;  %v692_v16 = vpop.f32.mrb[7].mxu1  ;;  %2314 = vmatprep.subr.bf16.mxu1 %v7243_v44 }
 0x170   :  { %v5642_v29 = vpack.c.bf16 %v616_v48, %v614_v14  ;;  %v620_v5 = vadd.f32 %v619_v45, %v5598_v24  ;;  %v5647_v4 = vpack.c.bf16 %v689_v11, %v687_v10  ;;  %v693_v52 = vadd.f32 %v692_v16, %v5605_v43 }
 0x172   :  { %7242 = vst [vmem:[#allocation151_spill] sm:$0xff] %v5642_v29  ;;  %7244 = vst [vmem:[#allocation152_spill] sm:$0xff] %v5647_v4  ;;  %v5650_v62 = vpack.c.bf16 %v620_v5, %v618_v6  ;;  %v5652_v28 = vpack.c.bf16 %v693_v52, %v691_v32 }
 0x174   :  { %7245 = vst [vmem:[#allocation153_spill] sm:$0xff] %v5650_v62  ;;  %7246 = vst [vmem:[#allocation154_spill] sm:$0xff] %v5652_v28  ;;  %v623_v17 = vpop.f32.mrb[8].mxu0  ;;  %v696_v48 = vpop.f32.mrb[8].mxu1 }
 0x175   :  { %v624_v49 = vadd.f32 %v623_v17, %v5595_v39  ;;  %v625_v14 = vpop.f32.mrb[9].mxu0  ;;  %v697_v61 = vadd.f32 %v696_v48, %v5601_v40  ;;  %v698_v60 = vpop.f32.mrb[9].mxu1 }
 0x176   :  { %v626_v45 = vadd.f32 %v625_v14, %v5598_v24  ;;  %v627_v29 = vpop.f32.mrb[10].mxu0  ;;  %v699_v16 = vadd.f32 %v698_v60, %v5605_v43  ;;  %v700_v6 = vpop.f32.mrb[10].mxu1 }
 0x177   :  { %v628_v11 = vadd.f32 %v627_v29, %v5595_v39  ;;  %v629_v10 = vpop.f32.mrb[11].mxu0  ;;  %v701_v17 = vadd.f32 %v700_v6, %v5601_v40  ;;  %v702_v52 = vpop.f32.mrb[11].mxu1  ;;  %v207_v6 = vsub.s32 5, %v5578_v0 }
 0x178   :  { %v5659_v5 = vpack.c.bf16 %v626_v45, %v624_v49  ;;  %v630_v32 = vadd.f32 %v629_v10, %v5598_v24  ;;  %v5663_v28 = vpack.c.bf16 %v699_v16, %v697_v61  ;;  %v703_v14 = vadd.f32 %v702_v52, %v5605_v43 }
 0x179   :  { %v203_v49 = vsub.s32 4, %v5578_v0 }
 0x17a   :  { %7247 = vst [vmem:[#allocation155_spill] sm:$0xff] %v5659_v5  ;;  %7248 = vst [vmem:[#allocation156_spill] sm:$0xff] %v5663_v28  ;;  %v5666_v62 = vpack.c.bf16 %v630_v32, %v628_v11  ;;  %v5668_v48 = vpack.c.bf16 %v703_v14, %v701_v17  ;;  %v211_v11 = vsub.s32 6, %v5578_v0 }
 0x17c   :  { %7249 = vst [vmem:[#allocation157_spill] sm:$0xff] %v5666_v62  ;;  %7250 = vst [vmem:[#allocation158_spill] sm:$0xff] %v5668_v48  ;;  %v633_v29 = vpop.f32.mrb[12].mxu0  ;;  %v706_v45 = vpop.f32.mrb[12].mxu1 }
 0x17d   :  { %v634_v4 = vadd.f32 %v633_v29, %v5595_v39  ;;  %v635_v60 = vpop.f32.mrb[13].mxu0  ;;  %v707_v61 = vadd.f32 %v706_v45, %v5601_v40  ;;  %v708_v16 = vpop.f32.mrb[13].mxu1  ;;  %v215_v29 = vsub.s32 7, %v5578_v0  ;;  %v5684_v45 = vrot.slane %v5585_v51, %v203_v49 }
 0x17e   :  { %v636_v10 = vadd.f32 %v635_v60, %v5598_v24  ;;  %v637_v5 = vpop.f32.mrb[14].mxu0  ;;  %v709_v52 = vadd.f32 %v708_v16, %v5605_v43  ;;  %v710_v14 = vpop.f32.mrb[14].mxu1  ;;  %v5692_v16 = vrot.slane %v5585_v51, %v207_v6 }
 0x17f   :  { %v638_v32 = vadd.f32 %v637_v5, %v5595_v39  ;;  %v639_v17 = vpop.f32.mrb[15].mxu0  ;;  %v711_v28 = vadd.f32 %v710_v14, %v5601_v40  ;;  %v712_v48 = vpop.f32.mrb[15].mxu1  ;;  %v5700_v40 = vrot.slane %v5585_v51, %v215_v29 }
 0x180   :  { %v5679_v62 = vpack.c.bf16 %v636_v10, %v634_v4  ;;  %v640_v60 = vadd.f32 %v639_v17, %v5598_v24  ;;  %v5686_v44 = vpack.c.bf16 %v709_v52, %v707_v61  ;;  %v713_v39 = vadd.f32 %v712_v48, %v5605_v43 }
 0x181   :  { %v5695_v4 = vrot.slane %v5585_v51, %v211_v11 }
 0x182   :  { %7251 = vst [vmem:[#allocation159_spill] sm:$0xff] %v5679_v62  ;;  %7252 = vst [vmem:[#allocation160_spill] sm:$0xff] %v5686_v44  ;;  %v5689_v5 = vpack.c.bf16 %v640_v60, %v638_v32  ;;  %v5697_v0 = vpack.c.bf16 %v713_v39, %v711_v28 }
 0x184   :  { %7253 = vst [vmem:[#allocation161_spill] sm:$0xff] %v5689_v5  ;;  %7254 = vst [vmem:[#allocation162_spill] sm:$0xff] %v5697_v0  ;;  %v749_v24 = vpop.f32.mrb[16].mxu0  ;;  %v822_v61 = vpop.f32.mrb[16].mxu1 }
 0x185   :  { %v750_v49 = vadd.f32 %v749_v24, %v5684_v45  ;;  %v751_v10 = vpop.f32.mrb[17].mxu0  ;;  %v823_v32 = vadd.f32 %v822_v61, %v5695_v4  ;;  %v824_v6 = vpop.f32.mrb[17].mxu1 }
 0x186   :  { %v752_v43 = vadd.f32 %v751_v10, %v5692_v16  ;;  %v753_v48 = vpop.f32.mrb[18].mxu0  ;;  %v825_v28 = vadd.f32 %v824_v6, %v5700_v40  ;;  %v826_v52 = vpop.f32.mrb[18].mxu1 }
 0x187   :  { %v754_v17 = vadd.f32 %v753_v48, %v5684_v45  ;;  %v755_v11 = vpop.f32.mrb[19].mxu0  ;;  %v827_v29 = vadd.f32 %v826_v52, %v5695_v4  ;;  %v828_v60 = vpop.f32.mrb[19].mxu1 }
 0x188   :  { %v5707_v14 = vpack.c.bf16 %v752_v43, %v750_v49  ;;  %v756_v51 = vadd.f32 %v755_v11, %v5692_v16  ;;  %v5711_v39 = vpack.c.bf16 %v825_v28, %v823_v32  ;;  %v829_v24 = vadd.f32 %v828_v60, %v5700_v40 }
 0x18a   :  { %7255 = vst [vmem:[#allocation163_spill] sm:$0xff] %v5707_v14  ;;  %7256 = vst [vmem:[#allocation164_spill] sm:$0xff] %v5711_v39  ;;  %v5714_v10 = vpack.c.bf16 %v756_v51, %v754_v17  ;;  %v5716_v61 = vpack.c.bf16 %v829_v24, %v827_v29 }
 0x18c   :  { %7257 = vst [vmem:[#allocation165_spill] sm:$0xff] %v5714_v10  ;;  %7258 = vst [vmem:[#allocation166_spill] sm:$0xff] %v5716_v61  ;;  %v759_v48 = vpop.f32.mrb[20].mxu0  ;;  %v832_v62 = vpop.f32.mrb[20].mxu1 }
 0x18d   :  { %v760_v5 = vadd.f32 %v759_v48, %v5684_v45  ;;  %v761_v6 = vpop.f32.mrb[21].mxu0  ;;  %v833_v11 = vadd.f32 %v832_v62, %v5695_v4  ;;  %v834_v52 = vpop.f32.mrb[21].mxu1 }
 0x18e   :  { %v762_v49 = vadd.f32 %v761_v6, %v5692_v16  ;;  %v763_v43 = vpop.f32.mrb[22].mxu0  ;;  %v835_v60 = vadd.f32 %v834_v52, %v5700_v40  ;;  %v836_v17 = vpop.f32.mrb[22].mxu1 }
 0x18f   :  { %v764_v32 = vadd.f32 %v763_v43, %v5684_v45  ;;  %v765_v28 = vpop.f32.mrb[23].mxu0  ;;  %v837_v24 = vadd.f32 %v836_v17, %v5695_v4  ;;  %v838_v48 = vpop.f32.mrb[23].mxu1 }
 0x190   :  { %v5723_v51 = vpack.c.bf16 %v762_v49, %v760_v5  ;;  %v766_v29 = vadd.f32 %v765_v28, %v5692_v16  ;;  %v5727_v14 = vpack.c.bf16 %v835_v60, %v833_v11  ;;  %v839_v6 = vadd.f32 %v838_v48, %v5700_v40 }
 0x192   :  { %7259 = vst [vmem:[#allocation167_spill] sm:$0xff] %v5723_v51  ;;  %7260 = vst [vmem:[#allocation168_spill] sm:$0xff] %v5727_v14  ;;  %v5730_v10 = vpack.c.bf16 %v766_v29, %v764_v32  ;;  %v5732_v62 = vpack.c.bf16 %v839_v6, %v837_v24 }
 0x194   :  { %7261 = vst [vmem:[#allocation169_spill] sm:$0xff] %v5730_v10  ;;  %7262 = vst [vmem:[#allocation170_spill] sm:$0xff] %v5732_v62  ;;  %v769_v43 = vpop.f32.mrb[24].mxu0  ;;  %v842_v44 = vpop.f32.mrb[24].mxu1 }
 0x195   :  { %v770_v61 = vadd.f32 %v769_v43, %v5684_v45  ;;  %v771_v52 = vpop.f32.mrb[25].mxu0  ;;  %v843_v28 = vadd.f32 %v842_v44, %v5695_v4  ;;  %v844_v17 = vpop.f32.mrb[25].mxu1 }
 0x196   :  { %v772_v5 = vadd.f32 %v771_v52, %v5692_v16  ;;  %v773_v49 = vpop.f32.mrb[26].mxu0  ;;  %v845_v48 = vadd.f32 %v844_v17, %v5700_v40  ;;  %v846_v32 = vpop.f32.mrb[26].mxu1 }
 0x197   :  { %v774_v11 = vadd.f32 %v773_v49, %v5684_v45  ;;  %v775_v60 = vpop.f32.mrb[27].mxu0  ;;  %v847_v6 = vadd.f32 %v846_v32, %v5695_v4  ;;  %v848_v43 = vpop.f32.mrb[27].mxu1 }
 0x198   :  { %v5739_v29 = vpack.c.bf16 %v772_v5, %v770_v61  ;;  %v776_v24 = vadd.f32 %v775_v60, %v5692_v16  ;;  %v5743_v51 = vpack.c.bf16 %v845_v48, %v843_v28  ;;  %v849_v52 = vadd.f32 %v848_v43, %v5700_v40 }
 0x19a   :  { %7263 = vst [vmem:[#allocation171_spill] sm:$0xff] %v5739_v29  ;;  %7264 = vst [vmem:[#allocation172_spill] sm:$0xff] %v5743_v51  ;;  %v5746_v10 = vpack.c.bf16 %v776_v24, %v774_v11  ;;  %v5748_v44 = vpack.c.bf16 %v849_v52, %v847_v6 }
 0x19c   :  { %7265 = vst [vmem:[#allocation173_spill] sm:$0xff] %v5746_v10  ;;  %7266 = vst [vmem:[#allocation174_spill] sm:$0xff] %v5748_v44  ;;  %v779_v49 = vpop.f32.mrb[28].mxu0  ;;  %v852_v14 = vpop.f32.mrb[28].mxu1 }
 0x19d   :  { %v780_v62 = vadd.f32 %v779_v49, %v5684_v45  ;;  %v781_v17 = vpop.f32.mrb[29].mxu0  ;;  %v853_v60 = vadd.f32 %v852_v14, %v5695_v4  ;;  %v854_v32 = vpop.f32.mrb[29].mxu1 }
 0x19e   :  { %v782_v61 = vadd.f32 %v781_v17, %v5692_v16  ;;  %v783_v5 = vpop.f32.mrb[30].mxu0  ;;  %v855_v43 = vadd.f32 %v854_v32, %v5700_v40  ;;  %v856_v11 = vpop.f32.mrb[30].mxu1  ;;  %v1155_v32 = vunpack.c.l.bf16 %v5623_v15 }
 0x19f   :  { %v784_v28 = vadd.f32 %v783_v5, %v5684_v45  ;;  %v785_v48 = vpop.f32.mrb[31].mxu0  ;;  %v857_v52 = vadd.f32 %v856_v11, %v5695_v4  ;;  %v858_v49 = vpop.f32.mrb[31].mxu1  ;;  %v1153_v45 = vunpack.c.l.bf16 %v5618_v56  ;;  %v1169_v4 = vunpack.c.h.bf16 %v5697_v0 }
 0x1a0   :  { %v5755_v24 = vpack.c.bf16 %v782_v61, %v780_v62  ;;  %v786_v6 = vadd.f32 %v785_v48, %v5692_v16  ;;  %v5759_v51 = vpack.c.bf16 %v855_v43, %v853_v60  ;;  %v859_v17 = vadd.f32 %v858_v49, %v5700_v40 }
 0x1a1   :  { %v1154_v62 = vunpack.c.h.bf16 %v5618_v56 }
 0x1a2   :  { %7267 = vst [vmem:[#allocation175_spill] sm:$0xff] %v5759_v51  ;;  %v4443_v29 = vpack.c.bf16 %v786_v6, %v784_v28  ;;  %v5762_v14 = vpack.c.bf16 %v859_v17, %v857_v52 }
 0x1a4   :  { %7268 = vst [vmem:[#allocation176_spill] sm:$0xff] %v5762_v14  ;;  %v1170_v0 = vunpack.c.l.bf16 %v4443_v29 }
 0x1c4   :  { %v1977_v5 = vpop.f32.mrb[32].mxu0  ;;  %v2018_v44 = vpop.f32.mrb[32].mxu1 }
 0x1c5   :  { %v2107_v61 = vadd.f32 %v1977_v5, %v1153_v45  ;;  %v1979_v16 = vpop.f32.mrb[33].mxu0  ;;  %v2109_v48 = vadd.f32 %v2018_v44, %v1155_v32  ;;  %v2020_v43 = vpop.f32.mrb[33].mxu1  ;;  %v1159_v32 = vunpack.c.l.bf16 %v5711_v39  ;;  %v7290_v39 = vld [vmem:[#allocation107_spill] sm:$0xff] }
 0x1c6   :  { %v2108_v60 = vadd.f32 %v1979_v16, %v1154_v62  ;;  %v1981_v11 = vpop.f32.mrb[34].mxu0  ;;  %v2110_v40 = vadd.f32 %v2020_v43, %v1169_v4  ;;  %v2022_v6 = vpop.f32.mrb[34].mxu1  ;;  %v1171_v62 = vunpack.c.h.bf16 %v4443_v29 }
 0x1c7   :  { %v1982_v28 = vpop.f32.mrb[35].mxu0  ;;  %v2023_v52 = vpop.f32.mrb[35].mxu1  ;;  %v4338_v17 = vmul.f32 -1.442695, %v2107_v61 }
 0x1c8   :  { %v4339_v49 = vmul.f32 -1.442695, %v2108_v60  ;;  %v4341_v10 = vmul.f32 -1.442695, %v2110_v40  ;;  %v1173_v60 = vunpack.c.h.bf16 %v5762_v14  ;;  %v7291_v14 = vld [vmem:[#allocation108_spill] sm:$0xff] }
 0x1ca   :  { %4539 = vpow2.f32 %v4339_v49 }
 0x1cb   :  { %4541 = vpow2.f32 %v4338_v17 }
 0x1cc   :  { %4543 = vpow2.f32 %v4341_v10 }
 0x1d4   :  { %v4540_v56 = vpop.eup %4539 }
 0x1d5   :  { %v4542_v45 = vpop.eup %4541  ;;  %v2132_v5 = vadd.f32 1.0, %v4540_v56 }
 0x1d6   :  { %v4544_v15 = vpop.eup %4543  ;;  %v2131_v51 = vadd.f32 1.0, %v4542_v45 }
 0x1d7   :  { %4545 = vrcp.f32 %v2132_v5  ;;  %v2134_v61 = vadd.f32 1.0, %v4544_v15 }
 0x1d8   :  { %4547 = vrcp.f32 %v2131_v51 }
 0x1e1   :  { %v4546_v45 = vpop.eup %4545 }
 0x204   :  { %v2059_v44 = vpop.f32.mrb[36].mxu0  ;;  %v2100_v4 = vpop.f32.mrb[36].mxu1 }
 0x205   :  { %v2111_v16 = vadd.f32 %v2059_v44, %v1170_v0  ;;  %v2061_v43 = vpop.f32.mrb[37].mxu0  ;;  %v2149_v11 = vadd.f32 %v2100_v4, %v1159_v32  ;;  %v2102_v10 = vpop.f32.mrb[37].mxu1  ;;  %v4340_v0 = vmul.f32 -1.442695, %v2109_v48  ;;  %v2153_v32 = vmul.f32 0.0, %v4546_v45 }
 0x206   :  { %v2112_v40 = vadd.f32 %v2061_v43, %v1171_v62  ;;  %v2063_v28 = vpop.f32.mrb[38].mxu0  ;;  %v2150_v52 = vadd.f32 %v2102_v10, %v1173_v60  ;;  %v2104_v17 = vpop.f32.mrb[38].mxu1 }
 0x207   :  { %v4342_v6 = vmul.f32 -1.442695, %v2111_v16  ;;  %v2064_v49 = vpop.f32.mrb[39].mxu0  ;;  %4549 = vtanh.f32 %v2149_v11  ;;  %v2105_v56 = vpop.f32.mrb[39].mxu1 }
 0x208   :  { %v4343_v29 = vmul.f32 -1.442695, %v2112_v40  ;;  %v4548_v44 = vpop.eup %4547 }
 0x209   :  { %4551 = vpow2.f32 %v4342_v6 }
 0x20a   :  { %4553 = vrcp.f32 %v2134_v61 }
 0x20b   :  { %4555 = vtanh.f32 %v2150_v52 }
 0x20c   :  { %4557 = vpow2.f32 %v4340_v0 }
 0x20d   :  { %4559 = vpow2.f32 %v4343_v29 }
 0x211   :  { %v4550_v5 = vpop.eup %4549 }
 0x212   :  { %v2154_v62 = vmul.f32 %v4550_v5, %v4548_v44  ;;  %v7269_v5 = vld [vmem:[#allocation86_spill] sm:$0xff] }
 0x213   :  { %v4552_v15 = vpop.eup %4551 }
 0x214   :  { %v4554_v51 = vpop.eup %4553  ;;  %v2135_v16 = vadd.f32 1.0, %v4552_v15  ;;  %v5770_v43 = vadd.f32 %v2154_v62, %v2153_v32  ;;  %v7270_v15 = vld [vmem:[#allocation87_spill] sm:$0xff]  ;;  %v7271_v32 = vld [vmem:[#allocation88_spill] sm:$0xff]  ;;  %v7272_v62 = vld [vmem:[#allocation89_spill] sm:$0xff] }
 0x215   :  { %v4556_v4 = vpop.eup %4555 }
 0x216   :  { %4561 = vrcp.f32 %v2135_v16  ;;  %v2157_v60 = vmul.f32 %v4556_v4, %v4554_v51  ;;  %v4558_v11 = vpop.eup %4557  ;;  %v7273_v51 = vld [vmem:[#allocation90_spill] sm:$0xff]  ;;  %v7274_v16 = vld [vmem:[#allocation91_spill] sm:$0xff]  ;;  %v7275_v4 = vld [vmem:[#allocation92_spill] sm:$0xff] }
 0x217   :  { %v4560_v61 = vpop.eup %4559  ;;  %v2133_v10 = vadd.f32 1.0, %v4558_v11  ;;  %4563 = vtanh.f32 %v5770_v43  ;;  %v7277_v11 = vld [vmem:[#allocation94_spill] sm:$0xff] }
 0x218   :  { %v2136_v40 = vadd.f32 1.0, %v4560_v61  ;;  %v7278_v61 = vld [vmem:[#allocation95_spill] sm:$0xff] }
 0x219   :  { %4565 = vrcp.f32 %v2133_v10  ;;  %v7279_v10 = vld [vmem:[#allocation96_spill] sm:$0xff] }
 0x21a   :  { %4567 = vrcp.f32 %v2136_v40  ;;  %v7281_v40 = vld [vmem:[#allocation98_spill] sm:$0xff] }
 0x220   :  { %v4562_v48 = vpop.eup %4561 }
 0x221   :  { %v2156_v28 = vmul.f32 0.0, %v4562_v48  ;;  %v4564_v52 = vpop.eup %4563  ;;  %v7280_v48 = vld [vmem:[#allocation97_spill] sm:$0xff] }
 0x223   :  { %v5773_v6 = vadd.f32 %v2157_v60, %v2156_v28  ;;  %v4566_v49 = vpop.eup %4565  ;;  %v7276_v60 = vld [vmem:[#allocation93_spill] sm:$0xff]  ;;  %v7282_v28 = vld [vmem:[#allocation99_spill] sm:$0xff] }
 0x224   :  { %v4568_v17 = vpop.eup %4567  ;;  %v2160_v0 = vmul.f32 %v4566_v49, %v4564_v52  ;;  %v7283_v52 = vld [vmem:[#allocation100_spill] sm:$0xff]  ;;  %v7284_v49 = vld [vmem:[#allocation101_spill] sm:$0xff] }
 0x225   :  { %4569 = vtanh.f32 %v5773_v6 }
 0x226   :  { %v5776_v44 = vpack.c.bf16 %v2160_v0, %v2160_v0  ;;  %v7287_v0 = vld [vmem:[#allocation104_spill] sm:$0xff] }
 0x22f   :  { %v4570_v56 = vpop.eup %4569 }
 0x230   :  { %v2162_v29 = vmul.f32 %v4570_v56, %v4568_v17  ;;  %v7285_v17 = vld [vmem:[#allocation102_spill] sm:$0xff]  ;;  %v7286_v56 = vld [vmem:[#allocation103_spill] sm:$0xff] }
 0x232   :  { %v2190_v45 = vpack.c.bf16 %v2162_v29, %v2162_v29  ;;  %v7288_v29 = vld [vmem:[#allocation105_spill] sm:$0xff] }
 0x234   :  { %2223 = vmatprep.mubr.bf16.mxu0 %v2190_v45  ;;  %2264 = vmatprep.mubr.bf16.mxu1 %v2190_v45 }
 0x235   :  { %2224 = vmatmul.mubr.bf16.vlgmr.msra.gmra.mrb[40].mxu0 %v5776_v44  ;;  %2265 = vmatmul.mubr.bf16.vlgmr.msra.gmra.mrb[40].mxu1 %v5776_v44 }
 0x236   :  { %2274 = vmatpush1.bf16.msra.mxu0 %v7269_v5  ;;  %2315 = vmatpush1.bf16.msra.mxu1 %v7270_v15 }
 0x237   :  { %2305 = vmatprep.mubr.bf16.mxu0 %v2190_v45  ;;  %2346 = vmatprep.mubr.bf16.mxu1 %v2190_v45  ;;  %v7289_v45 = vld [vmem:[#allocation106_spill] sm:$0xff] }
 0x238   :  { %2275 = vmatprep.subr.bf16.mxu0 %v7271_v32  ;;  %2316 = vmatprep.subr.bf16.mxu1 %v7272_v62 }
 0x23a   :  { %2276 = vmatpush1.bf16.msra.mxu0 %v7273_v51  ;;  %2317 = vmatpush1.bf16.msra.mxu1 %v7274_v16 }
 0x23b   :  { %2277 = vmatprep.subr.bf16.mxu0 %v7275_v4  ;;  %2318 = vmatprep.subr.bf16.mxu1 %v7276_v60 }
 0x23e   :  { %2278 = vmatpush1.bf16.msra.mxu0 %v7277_v11  ;;  %2319 = vmatpush1.bf16.msra.mxu1 %v7278_v61 }
 0x23f   :  { %2279 = vmatprep.subr.bf16.mxu0 %v7279_v10  ;;  %2320 = vmatprep.subr.bf16.mxu1 %v7280_v48 }
 0x242   :  { %2280 = vmatpush1.bf16.msra.mxu0 %v7281_v40  ;;  %2321 = vmatpush1.bf16.msra.mxu1 %v7282_v28  ;;  %v7292_v40 = vld [vmem:[#allocation109_spill] sm:$0xff]  ;;  %v7293_v28 = vld [vmem:[#allocation110_spill] sm:$0xff] }
 0x243   :  { %2281 = vmatprep.subr.bf16.mxu0 %v7283_v52  ;;  %2322 = vmatprep.subr.bf16.mxu1 %v7284_v49  ;;  %v7294_v52 = vld [vmem:[#allocation111_spill] sm:$0xff]  ;;  %v7295_v49 = vld [vmem:[#allocation112_spill] sm:$0xff] }
 0x246   :  { %2282 = vmatpush1.bf16.msra.mxu0 %v7285_v17  ;;  %2323 = vmatpush1.bf16.msra.mxu1 %v7286_v56  ;;  %v7296_v17 = vld [vmem:[#allocation113_spill] sm:$0xff]  ;;  %v7297_v56 = vld [vmem:[#allocation114_spill] sm:$0xff] }
 0x247   :  { %2283 = vmatprep.subr.bf16.mxu0 %v7287_v0  ;;  %2324 = vmatprep.subr.bf16.mxu1 %v7288_v29  ;;  %v7298_v0 = vld [vmem:[#allocation115_spill] sm:$0xff]  ;;  %v7299_v29 = vld [vmem:[#allocation116_spill] sm:$0xff] }
 0x24a   :  { %2284 = vmatpush1.bf16.msra.mxu0 %v7289_v45  ;;  %2325 = vmatpush1.bf16.msra.mxu1 %v7290_v39  ;;  %v7300_v45 = vld [vmem:[#allocation117_spill] sm:$0xff]  ;;  %v7301_v39 = vld [vmem:[#allocation118_spill] sm:$0xff] }
 0x24b   :  { %2285 = vmatprep.subr.bf16.mxu0 %v7291_v14  ;;  %2326 = vmatprep.subr.bf16.mxu1 %v7292_v40  ;;  %v7302_v14 = vld [vmem:[#allocation119_spill] sm:$0xff]  ;;  %v7303_v40 = vld [vmem:[#allocation120_spill] sm:$0xff] }
 0x24e   :  { %2286 = vmatpush1.bf16.msra.mxu0 %v7293_v28  ;;  %2327 = vmatpush1.bf16.msra.mxu1 %v7294_v52  ;;  %v7304_v28 = vld [vmem:[#allocation121_spill] sm:$0xff]  ;;  %v7305_v52 = vld [vmem:[#allocation122_spill] sm:$0xff] }
 0x24f   :  { %2287 = vmatprep.subr.bf16.mxu0 %v7295_v49  ;;  %2328 = vmatprep.subr.bf16.mxu1 %v7296_v17  ;;  %v7306_v49 = vld [vmem:[#allocation123_spill] sm:$0xff]  ;;  %v7307_v17 = vld [vmem:[#allocation124_spill] sm:$0xff] }
 0x252   :  { %2288 = vmatpush1.bf16.msra.mxu0 %v7297_v56  ;;  %2329 = vmatpush1.bf16.msra.mxu1 %v7298_v0  ;;  %v7308_v56 = vld [vmem:[#allocation125_spill] sm:$0xff]  ;;  %v7309_v0 = vld [vmem:[#allocation126_spill] sm:$0xff] }
 0x253   :  { %2289 = vmatprep.subr.bf16.mxu0 %v7299_v29  ;;  %2330 = vmatprep.subr.bf16.mxu1 %v7300_v45  ;;  %v7310_v29 = vld [vmem:[#allocation127_spill] sm:$0xff]  ;;  %v7311_v45 = vld [vmem:[#allocation128_spill] sm:$0xff] }
 0x256   :  { %2290 = vmatpush1.bf16.msra.mxu0 %v7301_v39  ;;  %2331 = vmatpush1.bf16.msra.mxu1 %v7302_v14  ;;  %v7312_v39 = vld [vmem:[#allocation129_spill] sm:$0xff]  ;;  %v7313_v14 = vld [vmem:[#allocation130_spill] sm:$0xff] }
 0x257   :  { %2291 = vmatprep.subr.bf16.mxu0 %v7303_v40  ;;  %2332 = vmatprep.subr.bf16.mxu1 %v7304_v28  ;;  %v7314_v40 = vld [vmem:[#allocation131_spill] sm:$0xff]  ;;  %v7315_v28 = vld [vmem:[#allocation132_spill] sm:$0xff] }
 0x25a   :  { %2292 = vmatpush1.bf16.msra.mxu0 %v7305_v52  ;;  %2333 = vmatpush1.bf16.msra.mxu1 %v7306_v49  ;;  %v7316_v52 = vld [vmem:[#allocation133_spill] sm:$0xff] }
 0x25b   :  { %2293 = vmatprep.subr.bf16.mxu0 %v7307_v17  ;;  %2334 = vmatprep.subr.bf16.mxu1 %v7308_v56 }
 0x25e   :  { %2294 = vmatpush1.bf16.msra.mxu0 %v7309_v0  ;;  %2335 = vmatpush1.bf16.msra.mxu1 %v7310_v29  ;;  %v7317_v0 = vld [vmem:[#allocation137_spill] sm:$0xff] }
 0x25f   :  { %2295 = vmatprep.subr.bf16.mxu0 %v7311_v45  ;;  %2336 = vmatprep.subr.bf16.mxu1 %v7312_v39 }
 0x262   :  { %2296 = vmatpush1.bf16.msra.mxu0 %v7313_v14  ;;  %2337 = vmatpush1.bf16.msra.mxu1 %v7314_v40 }
 0x263   :  { %2297 = vmatprep.subr.bf16.mxu0 %v7315_v28  ;;  %2338 = vmatprep.subr.bf16.mxu1 %v7316_v52 }
 0x266   :  { %2298 = vmatpush1.bf16.msra.mxu0 %v5489_v3  ;;  %2339 = vmatpush1.bf16.msra.mxu1 %v5493_v7 }
 0x267   :  { %2299 = vmatprep.subr.bf16.mxu0 %v5495_v8  ;;  %2340 = vmatprep.subr.bf16.mxu1 %v7317_v0 }
 0x26a   :  { %2300 = vmatpush1.bf16.msra.mxu0 %v5501_v25  ;;  %2341 = vmatpush1.bf16.msra.mxu1 %v5505_v36 }
 0x26b   :  { %2301 = vmatprep.subr.bf16.mxu0 %v5507_v35  ;;  %2342 = vmatprep.subr.bf16.mxu1 %v5510_v23 }
 0x26e   :  { %2302 = vmatpush1.bf16.msra.mxu0 %v5513_v1  ;;  %2343 = vmatpush1.bf16.msra.mxu1 %v5517_v55 }
 0x26f   :  { %2303 = vmatprep.subr.bf16.mxu0 %v5519_v2  ;;  %2344 = vmatprep.subr.bf16.mxu1 %v5522_v22 }
 0x272   :  { %2304 = vmatpush1.bf16.msra.mxu0 %v5525_v9  ;;  %2345 = vmatpush1.bf16.msra.mxu1 %v5529_v63 }
 0x273   :  { %2439 = vmatprep.subr.bf16.mxu0 %v5128_v12  ;;  %2480 = vmatprep.subr.bf16.mxu1 %v5131_v13 }
 0x275   :  { %2306 = vmatmul.mubr.bf16.vlgmr.msra.gmra.mrb[44].mxu0 %v5776_v44  ;;  %2347 = vmatmul.mubr.bf16.vlgmr.msra.gmra.mrb[44].mxu1 %v5776_v44  ;;  %v7318_v44 = vld [vmem:[#allocation44_spill] sm:$0xff] }
 0x276   :  { %2440 = vmatpush1.bf16.msra.mxu0 %v5134_v18  ;;  %2481 = vmatpush1.bf16.msra.mxu1 %v5137_v19 }
 0x277   :  { %2441 = vmatprep.subr.bf16.mxu0 %v5139_v20  ;;  %2482 = vmatprep.subr.bf16.mxu1 %v5142_v21 }
 0x27a   :  { %2442 = vmatpush1.bf16.msra.mxu0 %v5147_v26  ;;  %2483 = vmatpush1.bf16.msra.mxu1 %v5151_v30 }
 0x27b   :  { %2443 = vmatprep.subr.bf16.mxu0 %v5153_v31  ;;  %2484 = vmatprep.subr.bf16.mxu1 %v5156_v33 }
 0x27e   :  { %2444 = vmatpush1.bf16.msra.mxu0 %v5161_v34  ;;  %2485 = vmatpush1.bf16.msra.mxu1 %v5165_v37  ;;  %v7362_v37 = vld [vmem:[#allocation160_spill] sm:$0xff] }
 0x27f   :  { %2445 = vmatprep.subr.bf16.mxu0 %v5167_v38  ;;  %2486 = vmatprep.subr.bf16.mxu1 %v5170_v41  ;;  %v7361_v41 = vld [vmem:[#allocation150_spill] sm:$0xff] }
 0x282   :  { %2446 = vmatpush1.bf16.msra.mxu0 %v5174_v42  ;;  %2487 = vmatpush1.bf16.msra.mxu1 %v5179_v46  ;;  %v7319_v42 = vld [vmem:[#allocation45_spill] sm:$0xff]  ;;  %v7320_v46 = vld [vmem:[#allocation46_spill] sm:$0xff] }
 0x283   :  { %2447 = vmatprep.subr.bf16.mxu0 %v5181_v47  ;;  %2488 = vmatprep.subr.bf16.mxu1 %v5184_v50  ;;  %v7321_v47 = vld [vmem:[#allocation47_spill] sm:$0xff]  ;;  %v7322_v50 = vld [vmem:[#allocation48_spill] sm:$0xff] }
 0x286   :  { %2448 = vmatpush1.bf16.msra.mxu0 %v5189_v27  ;;  %2489 = vmatpush1.bf16.msra.mxu1 %v5193_v53  ;;  %v7323_v27 = vld [vmem:[#allocation49_spill] sm:$0xff]  ;;  %v7324_v53 = vld [vmem:[#allocation50_spill] sm:$0xff] }
 0x287   :  { %2449 = vmatprep.subr.bf16.mxu0 %v5195_v54  ;;  %2490 = vmatprep.subr.bf16.mxu1 %v5198_v57  ;;  %v7325_v54 = vld [vmem:[#allocation51_spill] sm:$0xff]  ;;  %v7326_v57 = vld [vmem:[#allocation52_spill] sm:$0xff] }
 0x28a   :  { %2450 = vmatpush1.bf16.msra.mxu0 %v5202_v58  ;;  %2491 = vmatpush1.bf16.msra.mxu1 %v5207_v59  ;;  %v7327_v58 = vld [vmem:[#allocation53_spill] sm:$0xff]  ;;  %v7328_v59 = vld [vmem:[#allocation54_spill] sm:$0xff] }
 0x28b   :  { %2451 = vmatprep.subr.bf16.mxu0 %v7318_v44  ;;  %2492 = vmatprep.subr.bf16.mxu1 %v7319_v42  ;;  %v7329_v44 = vld [vmem:[#allocation55_spill] sm:$0xff]  ;;  %v7330_v42 = vld [vmem:[#allocation56_spill] sm:$0xff] }
 0x28e   :  { %2452 = vmatpush1.bf16.msra.mxu0 %v7320_v46  ;;  %2493 = vmatpush1.bf16.msra.mxu1 %v7321_v47  ;;  %v7331_v46 = vld [vmem:[#allocation57_spill] sm:$0xff]  ;;  %v7332_v47 = vld [vmem:[#allocation58_spill] sm:$0xff] }
 0x28f   :  { %2453 = vmatprep.subr.bf16.mxu0 %v7322_v50  ;;  %2494 = vmatprep.subr.bf16.mxu1 %v7323_v27  ;;  %v7333_v50 = vld [vmem:[#allocation59_spill] sm:$0xff]  ;;  %v7334_v27 = vld [vmem:[#allocation60_spill] sm:$0xff] }
 0x292   :  { %2454 = vmatpush1.bf16.msra.mxu0 %v7324_v53  ;;  %2495 = vmatpush1.bf16.msra.mxu1 %v7325_v54  ;;  %v7335_v53 = vld [vmem:[#allocation61_spill] sm:$0xff]  ;;  %v7336_v54 = vld [vmem:[#allocation62_spill] sm:$0xff] }
 0x293   :  { %2455 = vmatprep.subr.bf16.mxu0 %v7326_v57  ;;  %2496 = vmatprep.subr.bf16.mxu1 %v7327_v58  ;;  %v7337_v57 = vld [vmem:[#allocation63_spill] sm:$0xff]  ;;  %v7338_v58 = vld [vmem:[#allocation64_spill] sm:$0xff] }
 0x296   :  { %2456 = vmatpush1.bf16.msra.mxu0 %v7328_v59  ;;  %2497 = vmatpush1.bf16.msra.mxu1 %v7329_v44  ;;  %v7339_v59 = vld [vmem:[#allocation65_spill] sm:$0xff]  ;;  %v7340_v44 = vld [vmem:[#allocation66_spill] sm:$0xff] }
 0x297   :  { %2457 = vmatprep.subr.bf16.mxu0 %v7330_v42  ;;  %2498 = vmatprep.subr.bf16.mxu1 %v7331_v46  ;;  %v7341_v42 = vld [vmem:[#allocation67_spill] sm:$0xff]  ;;  %v7342_v46 = vld [vmem:[#allocation68_spill] sm:$0xff] }
 0x29a   :  { %2458 = vmatpush1.bf16.msra.mxu0 %v7332_v47  ;;  %2499 = vmatpush1.bf16.msra.mxu1 %v7333_v50  ;;  %v7343_v47 = vld [vmem:[#allocation69_spill] sm:$0xff]  ;;  %v7344_v50 = vld [vmem:[#allocation70_spill] sm:$0xff] }
 0x29b   :  { %2459 = vmatprep.subr.bf16.mxu0 %v7334_v27  ;;  %2500 = vmatprep.subr.bf16.mxu1 %v7335_v53  ;;  %v7345_v27 = vld [vmem:[#allocation71_spill] sm:$0xff]  ;;  %v7346_v53 = vld [vmem:[#allocation72_spill] sm:$0xff] }
 0x29e   :  { %2460 = vmatpush1.bf16.msra.mxu0 %v7336_v54  ;;  %2501 = vmatpush1.bf16.msra.mxu1 %v7337_v57  ;;  %v7347_v54 = vld [vmem:[#allocation73_spill] sm:$0xff]  ;;  %v7348_v57 = vld [vmem:[#allocation74_spill] sm:$0xff] }
 0x29f   :  { %2461 = vmatprep.subr.bf16.mxu0 %v7338_v58  ;;  %2502 = vmatprep.subr.bf16.mxu1 %v7339_v59  ;;  %v7349_v58 = vld [vmem:[#allocation75_spill] sm:$0xff]  ;;  %v7350_v59 = vld [vmem:[#allocation76_spill] sm:$0xff] }
 0x2a2   :  { %2462 = vmatpush1.bf16.msra.mxu0 %v7340_v44  ;;  %2503 = vmatpush1.bf16.msra.mxu1 %v7341_v42  ;;  %v7351_v44 = vld [vmem:[#allocation77_spill] sm:$0xff]  ;;  %v7352_v42 = vld [vmem:[#allocation78_spill] sm:$0xff] }
 0x2a3   :  { %2463 = vmatprep.subr.bf16.mxu0 %v7342_v46  ;;  %2504 = vmatprep.subr.bf16.mxu1 %v7343_v47  ;;  %v7353_v46 = vld [vmem:[#allocation79_spill] sm:$0xff]  ;;  %v7354_v47 = vld [vmem:[#allocation80_spill] sm:$0xff] }
 0x2a6   :  { %2464 = vmatpush1.bf16.msra.mxu0 %v7344_v50  ;;  %2505 = vmatpush1.bf16.msra.mxu1 %v7345_v27  ;;  %v7355_v50 = vld [vmem:[#allocation81_spill] sm:$0xff]  ;;  %v7356_v27 = vld [vmem:[#allocation82_spill] sm:$0xff] }
 0x2a7   :  { %2465 = vmatprep.subr.bf16.mxu0 %v7346_v53  ;;  %2506 = vmatprep.subr.bf16.mxu1 %v7347_v54  ;;  %v7357_v53 = vld [vmem:[#allocation83_spill] sm:$0xff]  ;;  %v7358_v54 = vld [vmem:[#allocation84_spill] sm:$0xff] }
 0x2aa   :  { %2466 = vmatpush1.bf16.msra.mxu0 %v7348_v57  ;;  %2507 = vmatpush1.bf16.msra.mxu1 %v7349_v58  ;;  %v7359_v57 = vld [vmem:[#allocation85_spill] sm:$0xff] }
 0x2ab   :  { %2467 = vmatprep.subr.bf16.mxu0 %v7350_v59  ;;  %2508 = vmatprep.subr.bf16.mxu1 %v7351_v44  ;;  %v7360_v58 = vld [vmem:[#allocation149_spill] sm:$0xff]  ;;  %v2170_v44 = vunpack.c.l.bf16 %v7361_v41 }
 0x2ac   :  { %v2168_v59 = vunpack.c.l.bf16 %v7360_v58 }
 0x2ae   :  { %2468 = vmatpush1.bf16.msra.mxu0 %v7352_v42  ;;  %2509 = vmatpush1.bf16.msra.mxu1 %v7353_v46  ;;  %v2169_v46 = vunpack.c.h.bf16 %v7360_v58 }
 0x2af   :  { %2469 = vmatprep.subr.bf16.mxu0 %v7354_v47  ;;  %2510 = vmatprep.subr.bf16.mxu1 %v7355_v50  ;;  %v2184_v47 = vunpack.c.h.bf16 %v7362_v37 }
 0x2b2   :  { %2470 = vmatpush1.bf16.msra.mxu0 %v7356_v27  ;;  %2511 = vmatpush1.bf16.msra.mxu1 %v7357_v53 }
 0x2b3   :  { %2521 = vmatprep.subr.bf16.mxu0 %v7358_v54  ;;  %2562 = vmatprep.subr.bf16.mxu1 %v7359_v57 }
 0x308   :  { %v2225_v38 = vpop.f32.mrb[40].mxu0  ;;  %v2266_v42 = vpop.f32.mrb[40].mxu1 }
 0x309   :  { %v2355_v34 = vadd.f32 %v2225_v38, %v2168_v59  ;;  %v2357_v50 = vadd.f32 %v2266_v42, %v2170_v44  ;;  %v2227_v33 = vpop.f32.mrb[41].mxu0  ;;  %v2268_v27 = vpop.f32.mrb[41].mxu1  ;;  %v2185_v59 = vunpack.c.l.bf16 %v5755_v24 }
 0x30a   :  { %v2356_v31 = vadd.f32 %v2227_v33, %v2169_v46  ;;  %v2358_v53 = vadd.f32 %v2268_v27, %v2184_v47  ;;  %v2229_v30 = vpop.f32.mrb[42].mxu0  ;;  %v2270_v54 = vpop.f32.mrb[42].mxu1  ;;  %v7363_v33 = vld [vmem:[#allocation166_spill] sm:$0xff] }
 0x30b   :  { %v2230_v26 = vpop.f32.mrb[43].mxu0  ;;  %v2271_v57 = vpop.f32.mrb[43].mxu1  ;;  %v4344_v21 = vmul.f32 -1.442695, %v2355_v34  ;;  %v2174_v46 = vunpack.c.l.bf16 %v7363_v33  ;;  %v2186_v34 = vunpack.c.h.bf16 %v5755_v24  ;;  %v4346_v24 = vmul.f32 -1.442695, %v2357_v50 }
 0x30c   :  { %v4345_v20 = vmul.f32 -1.442695, %v2356_v31  ;;  %v4347_v19 = vmul.f32 -1.442695, %v2358_v53  ;;  %v7364_v31 = vld [vmem:[#allocation175_spill] sm:$0xff] }
 0x30d   :  { %4571 = vpow2.f32 %v4344_v21  ;;  %v2188_v47 = vunpack.c.h.bf16 %v7364_v31 }
 0x30e   :  { %4573 = vpow2.f32 %v4345_v20 }
 0x30f   :  { %4575 = vpow2.f32 %v4347_v19 }
 0x317   :  { %v4572_v41 = vpop.eup %4571 }
 0x318   :  { %v4574_v58 = vpop.eup %4573  ;;  %v2379_v37 = vadd.f32 1.0, %v4572_v41 }
 0x319   :  { %v4576_v18 = vpop.eup %4575  ;;  %v2380_v38 = vadd.f32 1.0, %v4574_v58 }
 0x31a   :  { %v2382_v42 = vadd.f32 1.0, %v4576_v18  ;;  %4577 = vrcp.f32 %v2379_v37 }
 0x31b   :  { %4579 = vrcp.f32 %v2380_v38 }
 0x31c   :  { %4581 = vrcp.f32 %v2382_v42 }
 0x324   :  { %v4578_v58 = vpop.eup %4577 }
 0x325   :  { %v4580_v33 = vpop.eup %4579 }
 0x326   :  { %v4582_v38 = vpop.eup %4581  ;;  %v2401_v42 = vmul.f32 %v4580_v33, %v5770_v43 }
 0x348   :  { %v2307_v30 = vpop.f32.mrb[44].mxu0  ;;  %v2348_v26 = vpop.f32.mrb[44].mxu1 }
 0x349   :  { %v2359_v20 = vadd.f32 %v2307_v30, %v2185_v59  ;;  %v2397_v19 = vadd.f32 %v2348_v26, %v2174_v46  ;;  %v2309_v21 = vpop.f32.mrb[45].mxu0  ;;  %v2350_v27 = vpop.f32.mrb[45].mxu1 }
 0x34a   :  { %v2360_v41 = vadd.f32 %v2309_v21, %v2186_v34  ;;  %v2398_v53 = vadd.f32 %v2350_v27, %v2188_v47  ;;  %v2311_v18 = vpop.f32.mrb[46].mxu0  ;;  %v2352_v54 = vpop.f32.mrb[46].mxu1 }
 0x34b   :  { %v4348_v57 = vmul.f32 -1.442695, %v2359_v20  ;;  %4583 = vtanh.f32 %v2397_v19  ;;  %v2312_v44 = vpop.f32.mrb[47].mxu0  ;;  %v2353_v37 = vpop.f32.mrb[47].mxu1 }
 0x34c   :  { %4585 = vtanh.f32 %v2398_v53  ;;  %v4349_v31 = vmul.f32 -1.442695, %v2360_v41 }
 0x34d   :  { %4587 = vpow2.f32 %v4348_v57 }
 0x34e   :  { %4589 = vpow2.f32 %v4346_v24  ;;  %v7366_v24 = vld [vmem:[#allocation99_spill] sm:$0xff] }
 0x34f   :  { %4591 = vpow2.f32 %v4349_v31 }
 0x355   :  { %v4584_v59 = vpop.eup %4583 }
 0x356   :  { %v4586_v46 = vpop.eup %4585  ;;  %v2402_v30 = vmul.f32 %v4584_v59, %v4578_v58  ;;  %v7368_v59 = vld [vmem:[#allocation101_spill] sm:$0xff] }
 0x357   :  { %v4588_v26 = vpop.eup %4587  ;;  %v2405_v34 = vmul.f32 %v4586_v46, %v4582_v38  ;;  %v7367_v38 = vld [vmem:[#allocation100_spill] sm:$0xff]  ;;  %v7369_v46 = vld [vmem:[#allocation102_spill] sm:$0xff] }
 0x358   :  { %v2383_v47 = vadd.f32 1.0, %v4588_v26  ;;  %v5919_v20 = vadd.f32 %v2402_v30, %v2401_v42  ;;  %v4590_v19 = vpop.eup %4589  ;;  %v7370_v42 = vld [vmem:[#allocation103_spill] sm:$0xff]  ;;  %v7371_v30 = vld [vmem:[#allocation104_spill] sm:$0xff]  ;;  %v7372_v26 = vld [vmem:[#allocation105_spill] sm:$0xff] }
 0x359   :  { %v4592_v21 = vpop.eup %4591  ;;  %v2381_v27 = vadd.f32 1.0, %v4590_v19  ;;  %v7375_v19 = vld [vmem:[#allocation108_spill] sm:$0xff] }
 0x35a   :  { %4593 = vrcp.f32 %v2383_v47  ;;  %v2384_v53 = vadd.f32 1.0, %v4592_v21  ;;  %v7374_v47 = vld [vmem:[#allocation107_spill] sm:$0xff]  ;;  %v7376_v21 = vld [vmem:[#allocation109_spill] sm:$0xff] }
 0x35b   :  { %4595 = vtanh.f32 %v5919_v20 }
 0x35c   :  { %4597 = vrcp.f32 %v2381_v27  ;;  %v7377_v27 = vld [vmem:[#allocation110_spill] sm:$0xff] }
 0x35d   :  { %4599 = vrcp.f32 %v2384_v53  ;;  %v7379_v53 = vld [vmem:[#allocation112_spill] sm:$0xff] }
 0x364   :  { %v4594_v50 = vpop.eup %4593 }
 0x365   :  { %v2404_v41 = vmul.f32 %v4594_v50, %v5773_v6  ;;  %v4596_v43 = vpop.eup %4595  ;;  %v7365_v6 = vld [vmem:[#allocation98_spill] sm:$0xff]  ;;  %v7378_v50 = vld [vmem:[#allocation111_spill] sm:$0xff] }
 0x366   :  { %v4598_v33 = vpop.eup %4597 }
 0x367   :  { %v5923_v18 = vadd.f32 %v2405_v34, %v2404_v41  ;;  %v4600_v31 = vpop.eup %4599  ;;  %v2408_v57 = vmul.f32 %v4598_v33, %v4596_v43  ;;  %v7373_v34 = vld [vmem:[#allocation106_spill] sm:$0xff]  ;;  %v7380_v41 = vld [vmem:[#allocation113_spill] sm:$0xff]  ;;  %v7382_v33 = vld [vmem:[#allocation115_spill] sm:$0xff] }
 0x368   :  { %v7381_v43 = vld [vmem:[#allocation114_spill] sm:$0xff] }
 0x369   :  { %4601 = vtanh.f32 %v5923_v18  ;;  %v5926_v58 = vpack.c.bf16 %v2408_v57, %v2408_v57  ;;  %v7385_v57 = vld [vmem:[#allocation118_spill] sm:$0xff] }
 0x373   :  { %v4602_v54 = vpop.eup %4601 }
 0x374   :  { %v2410_v44 = vmul.f32 %v4602_v54, %v4600_v31  ;;  %v7383_v31 = vld [vmem:[#allocation116_spill] sm:$0xff]  ;;  %v7384_v54 = vld [vmem:[#allocation117_spill] sm:$0xff] }
 0x376   :  { %v2438_v37 = vpack.c.bf16 %v2410_v44, %v2410_v44  ;;  %v7386_v44 = vld [vmem:[#allocation119_spill] sm:$0xff] }
 0x378   :  { %2471 = vmatprep.mubr.bf16.mxu0 %v2438_v37  ;;  %2512 = vmatprep.mubr.bf16.mxu1 %v2438_v37 }
 0x379   :  { %2472 = vmatmul.mubr.bf16.vlgmr.msra.gmra.mrb[48].mxu0 %v5926_v58  ;;  %2513 = vmatmul.mubr.bf16.vlgmr.msra.gmra.mrb[48].mxu1 %v5926_v58 }
 0x37a   :  { %2522 = vmatpush1.bf16.msra.mxu0 %v7269_v5  ;;  %2563 = vmatpush1.bf16.msra.mxu1 %v7270_v15 }
 0x37b   :  { %2553 = vmatprep.mubr.bf16.mxu0 %v2438_v37  ;;  %2594 = vmatprep.mubr.bf16.mxu1 %v2438_v37  ;;  %v7387_v37 = vld [vmem:[#allocation120_spill] sm:$0xff] }
 0x37c   :  { %2523 = vmatprep.subr.bf16.mxu0 %v7271_v32  ;;  %2564 = vmatprep.subr.bf16.mxu1 %v7272_v62 }
 0x37e   :  { %2524 = vmatpush1.bf16.msra.mxu0 %v7273_v51  ;;  %2565 = vmatpush1.bf16.msra.mxu1 %v7274_v16 }
 0x37f   :  { %2525 = vmatprep.subr.bf16.mxu0 %v7275_v4  ;;  %2566 = vmatprep.subr.bf16.mxu1 %v7276_v60 }
 0x382   :  { %2526 = vmatpush1.bf16.msra.mxu0 %v7277_v11  ;;  %2567 = vmatpush1.bf16.msra.mxu1 %v7278_v61 }
 0x383   :  { %2527 = vmatprep.subr.bf16.mxu0 %v7279_v10  ;;  %2568 = vmatprep.subr.bf16.mxu1 %v7280_v48 }
 0x386   :  { %2528 = vmatpush1.bf16.msra.mxu0 %v7365_v6  ;;  %2569 = vmatpush1.bf16.msra.mxu1 %v7366_v24 }
 0x387   :  { %2529 = vmatprep.subr.bf16.mxu0 %v7367_v38  ;;  %2570 = vmatprep.subr.bf16.mxu1 %v7368_v59 }
 0x38a   :  { %2530 = vmatpush1.bf16.msra.mxu0 %v7369_v46  ;;  %2571 = vmatpush1.bf16.msra.mxu1 %v7370_v42 }
 0x38b   :  { %2531 = vmatprep.subr.bf16.mxu0 %v7371_v30  ;;  %2572 = vmatprep.subr.bf16.mxu1 %v7372_v26 }
 0x38e   :  { %2532 = vmatpush1.bf16.msra.mxu0 %v7373_v34  ;;  %2573 = vmatpush1.bf16.msra.mxu1 %v7374_v47 }
 0x38f   :  { %2533 = vmatprep.subr.bf16.mxu0 %v7375_v19  ;;  %2574 = vmatprep.subr.bf16.mxu1 %v7376_v21 }
 0x392   :  { %2534 = vmatpush1.bf16.msra.mxu0 %v7377_v27  ;;  %2575 = vmatpush1.bf16.msra.mxu1 %v7378_v50  ;;  %v7388_v27 = vld [vmem:[#allocation121_spill] sm:$0xff]  ;;  %v7389_v50 = vld [vmem:[#allocation122_spill] sm:$0xff] }
 0x393   :  { %2535 = vmatprep.subr.bf16.mxu0 %v7379_v53  ;;  %2576 = vmatprep.subr.bf16.mxu1 %v7380_v41 }
 0x396   :  { %2536 = vmatpush1.bf16.msra.mxu0 %v7381_v43  ;;  %2577 = vmatpush1.bf16.msra.mxu1 %v7382_v33  ;;  %v7390_v33 = vld [vmem:[#allocation126_spill] sm:$0xff] }
 0x397   :  { %2537 = vmatprep.subr.bf16.mxu0 %v7383_v31  ;;  %2578 = vmatprep.subr.bf16.mxu1 %v7384_v54 }
 0x39a   :  { %2538 = vmatpush1.bf16.msra.mxu0 %v7385_v57  ;;  %2579 = vmatpush1.bf16.msra.mxu1 %v7386_v44 }
 0x39b   :  { %2539 = vmatprep.subr.bf16.mxu0 %v7387_v37  ;;  %2580 = vmatprep.subr.bf16.mxu1 %v7388_v27 }
 0x39e   :  { %2540 = vmatpush1.bf16.msra.mxu0 %v7389_v50  ;;  %2581 = vmatpush1.bf16.msra.mxu1 %v7306_v49 }
 0x39f   :  { %2541 = vmatprep.subr.bf16.mxu0 %v7307_v17  ;;  %2582 = vmatprep.subr.bf16.mxu1 %v7308_v56 }
 0x3a2   :  { %2542 = vmatpush1.bf16.msra.mxu0 %v7390_v33  ;;  %2583 = vmatpush1.bf16.msra.mxu1 %v7310_v29 }
 0x3a3   :  { %2543 = vmatprep.subr.bf16.mxu0 %v7311_v45  ;;  %2584 = vmatprep.subr.bf16.mxu1 %v7312_v39 }
 0x3a6   :  { %2544 = vmatpush1.bf16.msra.mxu0 %v7313_v14  ;;  %2585 = vmatpush1.bf16.msra.mxu1 %v7314_v40 }
 0x3a7   :  { %2545 = vmatprep.subr.bf16.mxu0 %v7315_v28  ;;  %2586 = vmatprep.subr.bf16.mxu1 %v7316_v52 }
 0x3aa   :  { %2546 = vmatpush1.bf16.msra.mxu0 %v5489_v3  ;;  %2587 = vmatpush1.bf16.msra.mxu1 %v5493_v7 }
 0x3ab   :  { %2547 = vmatprep.subr.bf16.mxu0 %v5495_v8  ;;  %2588 = vmatprep.subr.bf16.mxu1 %v7317_v0  ;;  %v7457_v0 = vld [vmem:[#allocation158_spill] sm:$0xff] }
 0x3ae   :  { %2548 = vmatpush1.bf16.msra.mxu0 %v5501_v25  ;;  %2589 = vmatpush1.bf16.msra.mxu1 %v5505_v36  ;;  %v7456_v36 = vld [vmem:[#allocation152_spill] sm:$0xff] }
 0x3af   :  { %2549 = vmatprep.subr.bf16.mxu0 %v5507_v35  ;;  %2590 = vmatprep.subr.bf16.mxu1 %v5510_v23  ;;  %v7391_v23 = vld [vmem:[#allocation22_spill] sm:$0xff]  ;;  %v7400_v35 = vld [vmem:[#allocation31_spill] sm:$0xff] }
 0x3b2   :  { %2550 = vmatpush1.bf16.msra.mxu0 %v5513_v1  ;;  %2591 = vmatpush1.bf16.msra.mxu1 %v5517_v55  ;;  %v7392_v1 = vld [vmem:[#allocation23_spill] sm:$0xff]  ;;  %v7393_v55 = vld [vmem:[#allocation24_spill] sm:$0xff] }
 0x3b3   :  { %2551 = vmatprep.subr.bf16.mxu0 %v5519_v2  ;;  %2592 = vmatprep.subr.bf16.mxu1 %v5522_v22  ;;  %v7394_v2 = vld [vmem:[#allocation25_spill] sm:$0xff]  ;;  %v7395_v22 = vld [vmem:[#allocation26_spill] sm:$0xff] }
 0x3b6   :  { %2552 = vmatpush1.bf16.msra.mxu0 %v5525_v9  ;;  %2593 = vmatpush1.bf16.msra.mxu1 %v5529_v63  ;;  %v7396_v9 = vld [vmem:[#allocation27_spill] sm:$0xff]  ;;  %v7397_v63 = vld [vmem:[#allocation28_spill] sm:$0xff] }
 0x3b7   :  { %2687 = vmatprep.subr.bf16.mxu0 %v5128_v12  ;;  %2728 = vmatprep.subr.bf16.mxu1 %v5131_v13  ;;  %v7398_v12 = vld [vmem:[#allocation29_spill] sm:$0xff]  ;;  %v7399_v13 = vld [vmem:[#allocation30_spill] sm:$0xff] }
 0x3b9   :  { %2554 = vmatmul.mubr.bf16.vlgmr.msra.gmra.mrb[52].mxu0 %v5926_v58  ;;  %2595 = vmatmul.mubr.bf16.vlgmr.msra.gmra.mrb[52].mxu1 %v5926_v58  ;;  %v7401_v58 = vld [vmem:[#allocation32_spill] sm:$0xff] }
 0x3ba   :  { %2688 = vmatpush1.bf16.msra.mxu0 %v7391_v23  ;;  %2729 = vmatpush1.bf16.msra.mxu1 %v7392_v1  ;;  %v7402_v23 = vld [vmem:[#allocation33_spill] sm:$0xff]  ;;  %v7403_v1 = vld [vmem:[#allocation34_spill] sm:$0xff] }
 0x3bb   :  { %2689 = vmatprep.subr.bf16.mxu0 %v7393_v55  ;;  %2730 = vmatprep.subr.bf16.mxu1 %v7394_v2  ;;  %v7404_v55 = vld [vmem:[#allocation35_spill] sm:$0xff]  ;;  %v7405_v2 = vld [vmem:[#allocation36_spill] sm:$0xff] }
 0x3be   :  { %2690 = vmatpush1.bf16.msra.mxu0 %v7395_v22  ;;  %2731 = vmatpush1.bf16.msra.mxu1 %v7396_v9  ;;  %v7406_v22 = vld [vmem:[#allocation37_spill] sm:$0xff]  ;;  %v7407_v9 = vld [vmem:[#allocation38_spill] sm:$0xff] }
 0x3bf   :  { %2691 = vmatprep.subr.bf16.mxu0 %v7397_v63  ;;  %2732 = vmatprep.subr.bf16.mxu1 %v7398_v12  ;;  %v7408_v63 = vld [vmem:[#allocation39_spill] sm:$0xff]  ;;  %v7409_v12 = vld [vmem:[#allocation40_spill] sm:$0xff] }
 0x3c2   :  { %2692 = vmatpush1.bf16.msra.mxu0 %v7399_v13  ;;  %2733 = vmatpush1.bf16.msra.mxu1 %v7400_v35  ;;  %v7410_v13 = vld [vmem:[#allocation41_spill] sm:$0xff]  ;;  %v7411_v35 = vld [vmem:[#allocation42_spill] sm:$0xff] }
 0x3c3   :  { %2693 = vmatprep.subr.bf16.mxu0 %v7401_v58  ;;  %2734 = vmatprep.subr.bf16.mxu1 %v7402_v23  ;;  %v7412_v58 = vld [vmem:[#allocation43_spill] sm:$0xff]  ;;  %v7413_v23 = vld [vmem:[#allocation44_spill] sm:$0xff] }
 0x3c6   :  { %2694 = vmatpush1.bf16.msra.mxu0 %v7403_v1  ;;  %2735 = vmatpush1.bf16.msra.mxu1 %v7404_v55  ;;  %v7414_v1 = vld [vmem:[#allocation45_spill] sm:$0xff]  ;;  %v7415_v55 = vld [vmem:[#allocation46_spill] sm:$0xff] }
 0x3c7   :  { %2695 = vmatprep.subr.bf16.mxu0 %v7405_v2  ;;  %2736 = vmatprep.subr.bf16.mxu1 %v7406_v22  ;;  %v7416_v2 = vld [vmem:[#allocation47_spill] sm:$0xff]  ;;  %v7417_v22 = vld [vmem:[#allocation48_spill] sm:$0xff] }
 0x3ca   :  { %2696 = vmatpush1.bf16.msra.mxu0 %v7407_v9  ;;  %2737 = vmatpush1.bf16.msra.mxu1 %v7408_v63  ;;  %v7418_v9 = vld [vmem:[#allocation49_spill] sm:$0xff]  ;;  %v7419_v63 = vld [vmem:[#allocation50_spill] sm:$0xff] }
 0x3cb   :  { %2697 = vmatprep.subr.bf16.mxu0 %v7409_v12  ;;  %2738 = vmatprep.subr.bf16.mxu1 %v7410_v13  ;;  %v7420_v12 = vld [vmem:[#allocation51_spill] sm:$0xff]  ;;  %v7421_v13 = vld [vmem:[#allocation52_spill] sm:$0xff] }
 0x3ce   :  { %2698 = vmatpush1.bf16.msra.mxu0 %v7411_v35  ;;  %2739 = vmatpush1.bf16.msra.mxu1 %v7412_v58  ;;  %v7422_v35 = vld [vmem:[#allocation53_spill] sm:$0xff]  ;;  %v7423_v58 = vld [vmem:[#allocation54_spill] sm:$0xff] }
 0x3cf   :  { %2699 = vmatprep.subr.bf16.mxu0 %v7413_v23  ;;  %2740 = vmatprep.subr.bf16.mxu1 %v7414_v1  ;;  %v7424_v23 = vld [vmem:[#allocation55_spill] sm:$0xff]  ;;  %v7425_v1 = vld [vmem:[#allocation56_spill] sm:$0xff] }
 0x3d2   :  { %2700 = vmatpush1.bf16.msra.mxu0 %v7415_v55  ;;  %2741 = vmatpush1.bf16.msra.mxu1 %v7416_v2  ;;  %v7426_v55 = vld [vmem:[#allocation57_spill] sm:$0xff]  ;;  %v7427_v2 = vld [vmem:[#allocation58_spill] sm:$0xff] }
 0x3d3   :  { %2701 = vmatprep.subr.bf16.mxu0 %v7417_v22  ;;  %2742 = vmatprep.subr.bf16.mxu1 %v7418_v9  ;;  %v7428_v22 = vld [vmem:[#allocation59_spill] sm:$0xff]  ;;  %v7429_v9 = vld [vmem:[#allocation60_spill] sm:$0xff] }
 0x3d6   :  { %2702 = vmatpush1.bf16.msra.mxu0 %v7419_v63  ;;  %2743 = vmatpush1.bf16.msra.mxu1 %v7420_v12  ;;  %v7430_v63 = vld [vmem:[#allocation61_spill] sm:$0xff]  ;;  %v7431_v12 = vld [vmem:[#allocation62_spill] sm:$0xff] }
 0x3d7   :  { %2703 = vmatprep.subr.bf16.mxu0 %v7421_v13  ;;  %2744 = vmatprep.subr.bf16.mxu1 %v7422_v35  ;;  %v7432_v13 = vld [vmem:[#allocation63_spill] sm:$0xff]  ;;  %v7433_v35 = vld [vmem:[#allocation64_spill] sm:$0xff] }
 0x3da   :  { %2704 = vmatpush1.bf16.msra.mxu0 %v7423_v58  ;;  %2745 = vmatpush1.bf16.msra.mxu1 %v7424_v23  ;;  %v7434_v58 = vld [vmem:[#allocation65_spill] sm:$0xff]  ;;  %v7435_v23 = vld [vmem:[#allocation66_spill] sm:$0xff] }
 0x3db   :  { %2705 = vmatprep.subr.bf16.mxu0 %v7425_v1  ;;  %2746 = vmatprep.subr.bf16.mxu1 %v7426_v55  ;;  %v7436_v1 = vld [vmem:[#allocation67_spill] sm:$0xff]  ;;  %v7437_v55 = vld [vmem:[#allocation68_spill] sm:$0xff] }
 0x3de   :  { %2706 = vmatpush1.bf16.msra.mxu0 %v7427_v2  ;;  %2747 = vmatpush1.bf16.msra.mxu1 %v7428_v22  ;;  %v7438_v2 = vld [vmem:[#allocation69_spill] sm:$0xff]  ;;  %v7439_v22 = vld [vmem:[#allocation70_spill] sm:$0xff] }
 0x3df   :  { %2707 = vmatprep.subr.bf16.mxu0 %v7429_v9  ;;  %2748 = vmatprep.subr.bf16.mxu1 %v7430_v63  ;;  %v7440_v9 = vld [vmem:[#allocation71_spill] sm:$0xff]  ;;  %v7441_v63 = vld [vmem:[#allocation72_spill] sm:$0xff] }
 0x3e2   :  { %2708 = vmatpush1.bf16.msra.mxu0 %v7431_v12  ;;  %2749 = vmatpush1.bf16.msra.mxu1 %v7432_v13  ;;  %v7442_v12 = vld [vmem:[#allocation73_spill] sm:$0xff]  ;;  %v7443_v13 = vld [vmem:[#allocation74_spill] sm:$0xff] }
 0x3e3   :  { %2709 = vmatprep.subr.bf16.mxu0 %v7433_v35  ;;  %2750 = vmatprep.subr.bf16.mxu1 %v7434_v58  ;;  %v7444_v35 = vld [vmem:[#allocation75_spill] sm:$0xff]  ;;  %v7445_v58 = vld [vmem:[#allocation76_spill] sm:$0xff] }
 0x3e6   :  { %2710 = vmatpush1.bf16.msra.mxu0 %v7435_v23  ;;  %2751 = vmatpush1.bf16.msra.mxu1 %v7436_v1  ;;  %v7446_v23 = vld [vmem:[#allocation77_spill] sm:$0xff]  ;;  %v7447_v1 = vld [vmem:[#allocation78_spill] sm:$0xff] }
 0x3e7   :  { %2711 = vmatprep.subr.bf16.mxu0 %v7437_v55  ;;  %2752 = vmatprep.subr.bf16.mxu1 %v7438_v2  ;;  %v7448_v55 = vld [vmem:[#allocation79_spill] sm:$0xff]  ;;  %v7449_v2 = vld [vmem:[#allocation80_spill] sm:$0xff] }
 0x3ea   :  { %2712 = vmatpush1.bf16.msra.mxu0 %v7439_v22  ;;  %2753 = vmatpush1.bf16.msra.mxu1 %v7440_v9  ;;  %v7450_v22 = vld [vmem:[#allocation81_spill] sm:$0xff]  ;;  %v7451_v9 = vld [vmem:[#allocation82_spill] sm:$0xff] }
 0x3eb   :  { %2713 = vmatprep.subr.bf16.mxu0 %v7441_v63  ;;  %2754 = vmatprep.subr.bf16.mxu1 %v7442_v12  ;;  %v7452_v63 = vld [vmem:[#allocation83_spill] sm:$0xff]  ;;  %v7453_v12 = vld [vmem:[#allocation84_spill] sm:$0xff] }
 0x3ee   :  { %2714 = vmatpush1.bf16.msra.mxu0 %v7443_v13  ;;  %2755 = vmatpush1.bf16.msra.mxu1 %v7444_v35  ;;  %v7454_v13 = vld [vmem:[#allocation85_spill] sm:$0xff]  ;;  %v7455_v35 = vld [vmem:[#allocation151_spill] sm:$0xff] }
 0x3ef   :  { %2715 = vmatprep.subr.bf16.mxu0 %v7445_v58  ;;  %2756 = vmatprep.subr.bf16.mxu1 %v7446_v23  ;;  %v2416_v58 = vunpack.c.l.bf16 %v7455_v35  ;;  %v2418_v23 = vunpack.c.l.bf16 %v7456_v36 }
 0x3f2   :  { %2716 = vmatpush1.bf16.msra.mxu0 %v7447_v1  ;;  %2757 = vmatpush1.bf16.msra.mxu1 %v7448_v55  ;;  %v2417_v55 = vunpack.c.h.bf16 %v7455_v35 }
 0x3f3   :  { %2717 = vmatprep.subr.bf16.mxu0 %v7449_v2  ;;  %2758 = vmatprep.subr.bf16.mxu1 %v7450_v22  ;;  %v2432_v2 = vunpack.c.h.bf16 %v7457_v0 }
 0x3f6   :  { %2718 = vmatpush1.bf16.msra.mxu0 %v7451_v9  ;;  %2759 = vmatpush1.bf16.msra.mxu1 %v7452_v63 }
 0x3f7   :  { %2769 = vmatprep.subr.bf16.mxu0 %v7453_v12  ;;  %2810 = vmatprep.subr.bf16.mxu1 %v7454_v13 }
 0x44c   :  { %v2473_v25 = vpop.f32.mrb[48].mxu0  ;;  %v2514_v1 = vpop.f32.mrb[48].mxu1 }
 0x44d   :  { %v2603_v8 = vadd.f32 %v2473_v25, %v2416_v58  ;;  %v2605_v22 = vadd.f32 %v2514_v1, %v2418_v23  ;;  %v2475_v7 = vpop.f32.mrb[49].mxu0  ;;  %v2516_v9 = vpop.f32.mrb[49].mxu1  ;;  %v7458_v1 = vld [vmem:[#allocation173_spill] sm:$0xff] }
 0x44e   :  { %v2604_v3 = vadd.f32 %v2475_v7, %v2417_v55  ;;  %v2606_v63 = vadd.f32 %v2516_v9, %v2432_v2  ;;  %v2477_v52 = vpop.f32.mrb[50].mxu0  ;;  %v2518_v12 = vpop.f32.mrb[50].mxu1  ;;  %v2433_v58 = vunpack.c.l.bf16 %v7458_v1  ;;  %v7459_v7 = vld [vmem:[#allocation168_spill] sm:$0xff] }
 0x44f   :  { %v2478_v28 = vpop.f32.mrb[51].mxu0  ;;  %v2519_v13 = vpop.f32.mrb[51].mxu1  ;;  %v4350_v40 = vmul.f32 -1.442695, %v2603_v8  ;;  %v2422_v9 = vunpack.c.l.bf16 %v7459_v7 }
 0x450   :  { %v4351_v14 = vmul.f32 -1.442695, %v2604_v3  ;;  %v4353_v39 = vmul.f32 -1.442695, %v2606_v63  ;;  %v2434_v13 = vunpack.c.h.bf16 %v7458_v1  ;;  %v7460_v3 = vld [vmem:[#allocation174_spill] sm:$0xff] }
 0x451   :  { %4603 = vpow2.f32 %v4350_v40  ;;  %v2436_v8 = vunpack.c.h.bf16 %v7460_v3  ;;  %v4352_v1 = vmul.f32 -1.442695, %v2605_v22 }
 0x452   :  { %4605 = vpow2.f32 %v4351_v14 }
 0x453   :  { %4607 = vpow2.f32 %v4353_v39 }
 0x45b   :  { %v4604_v36 = vpop.eup %4603 }
 0x45c   :  { %v4606_v35 = vpop.eup %4605  ;;  %v2627_v0 = vadd.f32 1.0, %v4604_v36 }
 0x45d   :  { %v4608_v45 = vpop.eup %4607  ;;  %v2628_v25 = vadd.f32 1.0, %v4606_v35 }
 0x45e   :  { %v2630_v23 = vadd.f32 1.0, %v4608_v45  ;;  %4609 = vrcp.f32 %v2627_v0 }
 0x45f   :  { %4611 = vrcp.f32 %v2628_v25 }
 0x460   :  { %4613 = vrcp.f32 %v2630_v23 }
 0x468   :  { %v4610_v7 = vpop.eup %4609 }
 0x469   :  { %v4612_v29 = vpop.eup %4611 }
 0x46a   :  { %v4614_v25 = vpop.eup %4613  ;;  %v2649_v23 = vmul.f32 %v4612_v29, %v5919_v20 }
 0x48c   :  { %v2555_v12 = vpop.f32.mrb[52].mxu0  ;;  %v2596_v55 = vpop.f32.mrb[52].mxu1 }
 0x48d   :  { %v2607_v2 = vadd.f32 %v2555_v12, %v2433_v58  ;;  %v2645_v63 = vadd.f32 %v2596_v55, %v2422_v9  ;;  %v2557_v39 = vpop.f32.mrb[53].mxu0  ;;  %v2598_v14 = vpop.f32.mrb[53].mxu1 }
 0x48e   :  { %v2608_v36 = vadd.f32 %v2557_v39, %v2434_v13  ;;  %v2646_v40 = vadd.f32 %v2598_v14, %v2436_v8  ;;  %v2559_v28 = vpop.f32.mrb[54].mxu0  ;;  %v2600_v52 = vpop.f32.mrb[54].mxu1 }
 0x48f   :  { %v4354_v45 = vmul.f32 -1.442695, %v2607_v2  ;;  %4615 = vtanh.f32 %v2645_v63  ;;  %v2560_v35 = vpop.f32.mrb[55].mxu0  ;;  %v2601_v0 = vpop.f32.mrb[55].mxu1 }
 0x490   :  { %4617 = vtanh.f32 %v2646_v40  ;;  %v4355_v3 = vmul.f32 -1.442695, %v2608_v36 }
 0x491   :  { %4619 = vpow2.f32 %v4354_v45 }
 0x492   :  { %4621 = vpow2.f32 %v4352_v1  ;;  %v7462_v1 = vld [vmem:[#allocation111_spill] sm:$0xff] }
 0x493   :  { %4623 = vpow2.f32 %v4355_v3 }
 0x499   :  { %v4616_v58 = vpop.eup %4615 }
 0x49a   :  { %v4618_v9 = vpop.eup %4617  ;;  %v2650_v12 = vmul.f32 %v4616_v58, %v4610_v7  ;;  %v7464_v58 = vld [vmem:[#allocation127_spill] sm:$0xff] }
 0x49b   :  { %v4620_v55 = vpop.eup %4619  ;;  %v2653_v13 = vmul.f32 %v4618_v9, %v4614_v25  ;;  %v7463_v25 = vld [vmem:[#allocation115_spill] sm:$0xff]  ;;  %v7465_v9 = vld [vmem:[#allocation128_spill] sm:$0xff] }
 0x49c   :  { %v2631_v8 = vadd.f32 1.0, %v4620_v55  ;;  %v6069_v2 = vadd.f32 %v2650_v12, %v2649_v23  ;;  %v4622_v63 = vpop.eup %4621  ;;  %v7466_v23 = vld [vmem:[#allocation129_spill] sm:$0xff]  ;;  %v7467_v12 = vld [vmem:[#allocation130_spill] sm:$0xff]  ;;  %v7468_v55 = vld [vmem:[#allocation131_spill] sm:$0xff] }
 0x49d   :  { %v4624_v39 = vpop.eup %4623  ;;  %v2629_v14 = vadd.f32 1.0, %v4622_v63  ;;  %v7471_v63 = vld [vmem:[#allocation134_spill] sm:$0xff] }
 0x49e   :  { %4625 = vrcp.f32 %v2631_v8  ;;  %v2632_v40 = vadd.f32 1.0, %v4624_v39  ;;  %v7470_v8 = vld [vmem:[#allocation133_spill] sm:$0xff]  ;;  %v7472_v39 = vld [vmem:[#allocation135_spill] sm:$0xff] }
 0x49f   :  { %4627 = vtanh.f32 %v6069_v2 }
 0x4a0   :  { %4629 = vrcp.f32 %v2629_v14  ;;  %v7473_v14 = vld [vmem:[#allocation136_spill] sm:$0xff] }
 0x4a1   :  { %4631 = vrcp.f32 %v2632_v40  ;;  %v7475_v40 = vld [vmem:[#allocation138_spill] sm:$0xff] }
 0x4a8   :  { %v4626_v22 = vpop.eup %4625 }
 0x4a9   :  { %v2652_v36 = vmul.f32 %v4626_v22, %v5923_v18  ;;  %v4628_v29 = vpop.eup %4627  ;;  %v7461_v18 = vld [vmem:[#allocation110_spill] sm:$0xff]  ;;  %v7474_v22 = vld [vmem:[#allocation137_spill] sm:$0xff] }
 0x4aa   :  { %v4630_v20 = vpop.eup %4629 }
 0x4ab   :  { %v6073_v28 = vadd.f32 %v2653_v13, %v2652_v36  ;;  %v4632_v7 = vpop.eup %4631  ;;  %v2656_v52 = vmul.f32 %v4630_v20, %v4628_v29  ;;  %v7469_v13 = vld [vmem:[#allocation132_spill] sm:$0xff]  ;;  %v7476_v36 = vld [vmem:[#allocation139_spill] sm:$0xff]  ;;  %v7478_v20 = vld [vmem:[#allocation141_spill] sm:$0xff] }
 0x4ac   :  { %v7477_v29 = vld [vmem:[#allocation140_spill] sm:$0xff] }
 0x4ad   :  { %4633 = vtanh.f32 %v6073_v28  ;;  %v6076_v0 = vpack.c.bf16 %v2656_v52, %v2656_v52  ;;  %v7481_v52 = vld [vmem:[#allocation144_spill] sm:$0xff] }
 0x4b7   :  { %v4634_v3 = vpop.eup %4633 }
 0x4b8   :  { %v2658_v45 = vmul.f32 %v4634_v3, %v4632_v7  ;;  %v7479_v7 = vld [vmem:[#allocation142_spill] sm:$0xff]  ;;  %v7480_v3 = vld [vmem:[#allocation143_spill] sm:$0xff] }
 0x4ba   :  { %v2686_v35 = vpack.c.bf16 %v2658_v45, %v2658_v45  ;;  %v7482_v45 = vld [vmem:[#allocation145_spill] sm:$0xff] }
 0x4bc   :  { %2719 = vmatprep.mubr.bf16.mxu0 %v2686_v35  ;;  %2760 = vmatprep.mubr.bf16.mxu1 %v2686_v35 }
 0x4bd   :  { %2720 = vmatmul.mubr.bf16.vlgmr.msra.gmra.mrb[56].mxu0 %v6076_v0  ;;  %2761 = vmatmul.mubr.bf16.vlgmr.msra.gmra.mrb[56].mxu1 %v6076_v0 }
 0x4be   :  { %2770 = vmatpush1.bf16.msra.mxu0 %v7269_v5  ;;  %2811 = vmatpush1.bf16.msra.mxu1 %v7270_v15 }
 0x4bf   :  { %2801 = vmatprep.mubr.bf16.mxu0 %v2686_v35  ;;  %2842 = vmatprep.mubr.bf16.mxu1 %v2686_v35  ;;  %v7483_v35 = vld [vmem:[#allocation146_spill] sm:$0xff] }
 0x4c0   :  { %2771 = vmatprep.subr.bf16.mxu0 %v7271_v32  ;;  %2812 = vmatprep.subr.bf16.mxu1 %v7272_v62 }
 0x4c2   :  { %2772 = vmatpush1.bf16.msra.mxu0 %v7273_v51  ;;  %2813 = vmatpush1.bf16.msra.mxu1 %v7274_v16 }
 0x4c3   :  { %2773 = vmatprep.subr.bf16.mxu0 %v7275_v4  ;;  %2814 = vmatprep.subr.bf16.mxu1 %v7276_v60 }
 0x4c6   :  { %2774 = vmatpush1.bf16.msra.mxu0 %v7277_v11  ;;  %2815 = vmatpush1.bf16.msra.mxu1 %v7278_v61 }
 0x4c7   :  { %2775 = vmatprep.subr.bf16.mxu0 %v7279_v10  ;;  %2816 = vmatprep.subr.bf16.mxu1 %v7280_v48 }
 0x4ca   :  { %2776 = vmatpush1.bf16.msra.mxu0 %v7365_v6  ;;  %2817 = vmatpush1.bf16.msra.mxu1 %v7366_v24 }
 0x4cb   :  { %2777 = vmatprep.subr.bf16.mxu0 %v7367_v38  ;;  %2818 = vmatprep.subr.bf16.mxu1 %v7368_v59 }
 0x4ce   :  { %2778 = vmatpush1.bf16.msra.mxu0 %v7369_v46  ;;  %2819 = vmatpush1.bf16.msra.mxu1 %v7370_v42 }
 0x4cf   :  { %2779 = vmatprep.subr.bf16.mxu0 %v7371_v30  ;;  %2820 = vmatprep.subr.bf16.mxu1 %v7372_v26 }
 0x4d2   :  { %2780 = vmatpush1.bf16.msra.mxu0 %v7373_v34  ;;  %2821 = vmatpush1.bf16.msra.mxu1 %v7374_v47 }
 0x4d3   :  { %2781 = vmatprep.subr.bf16.mxu0 %v7375_v19  ;;  %2822 = vmatprep.subr.bf16.mxu1 %v7376_v21 }
 0x4d6   :  { %2782 = vmatpush1.bf16.msra.mxu0 %v7461_v18  ;;  %2823 = vmatpush1.bf16.msra.mxu1 %v7462_v1 }
 0x4d7   :  { %2783 = vmatprep.subr.bf16.mxu0 %v7379_v53  ;;  %2824 = vmatprep.subr.bf16.mxu1 %v7380_v41 }
 0x4da   :  { %2784 = vmatpush1.bf16.msra.mxu0 %v7381_v43  ;;  %2825 = vmatpush1.bf16.msra.mxu1 %v7463_v25 }
 0x4db   :  { %2785 = vmatprep.subr.bf16.mxu0 %v7383_v31  ;;  %2826 = vmatprep.subr.bf16.mxu1 %v7384_v54 }
 0x4de   :  { %2786 = vmatpush1.bf16.msra.mxu0 %v7385_v57  ;;  %2827 = vmatpush1.bf16.msra.mxu1 %v7386_v44 }
 0x4df   :  { %2787 = vmatprep.subr.bf16.mxu0 %v7387_v37  ;;  %2828 = vmatprep.subr.bf16.mxu1 %v7388_v27 }
 0x4e2   :  { %2788 = vmatpush1.bf16.msra.mxu0 %v7389_v50  ;;  %2829 = vmatpush1.bf16.msra.mxu1 %v7306_v49 }
 0x4e3   :  { %2789 = vmatprep.subr.bf16.mxu0 %v7307_v17  ;;  %2830 = vmatprep.subr.bf16.mxu1 %v7308_v56 }
 0x4e6   :  { %2790 = vmatpush1.bf16.msra.mxu0 %v7390_v33  ;;  %2831 = vmatpush1.bf16.msra.mxu1 %v7464_v58 }
 0x4e7   :  { %2791 = vmatprep.subr.bf16.mxu0 %v7465_v9  ;;  %2832 = vmatprep.subr.bf16.mxu1 %v7466_v23 }
 0x4ea   :  { %2792 = vmatpush1.bf16.msra.mxu0 %v7467_v12  ;;  %2833 = vmatpush1.bf16.msra.mxu1 %v7468_v55 }
 0x4eb   :  { %2793 = vmatprep.subr.bf16.mxu0 %v7469_v13  ;;  %2834 = vmatprep.subr.bf16.mxu1 %v7470_v8 }
 0x4ee   :  { %2794 = vmatpush1.bf16.msra.mxu0 %v7471_v63  ;;  %2835 = vmatpush1.bf16.msra.mxu1 %v7472_v39  ;;  %v7553_v63 = vld [vmem:[#allocation156_spill] sm:$0xff] }
 0x4ef   :  { %2795 = vmatprep.subr.bf16.mxu0 %v7473_v14  ;;  %2836 = vmatprep.subr.bf16.mxu1 %v7474_v22  ;;  %v7484_v14 = vld [vmem:[#allocation147_spill] sm:$0xff]  ;;  %v7485_v22 = vld [vmem:[#allocation20_spill] sm:$0xff] }
 0x4f2   :  { %2796 = vmatpush1.bf16.msra.mxu0 %v7475_v40  ;;  %2837 = vmatpush1.bf16.msra.mxu1 %v7476_v36  ;;  %v7486_v40 = vld [vmem:[#allocation21_spill] sm:$0xff]  ;;  %v7552_v36 = vld [vmem:[#allocation154_spill] sm:$0xff] }
 0x4f3   :  { %2797 = vmatprep.subr.bf16.mxu0 %v7477_v29  ;;  %2838 = vmatprep.subr.bf16.mxu1 %v7478_v20  ;;  %v7487_v20 = vld [vmem:[#allocation22_spill] sm:$0xff]  ;;  %v7496_v29 = vld [vmem:[#allocation31_spill] sm:$0xff] }
 0x4f6   :  { %2798 = vmatpush1.bf16.msra.mxu0 %v7479_v7  ;;  %2839 = vmatpush1.bf16.msra.mxu1 %v7480_v3  ;;  %v7488_v7 = vld [vmem:[#allocation23_spill] sm:$0xff]  ;;  %v7489_v3 = vld [vmem:[#allocation24_spill] sm:$0xff] }
 0x4f7   :  { %2799 = vmatprep.subr.bf16.mxu0 %v7481_v52  ;;  %2840 = vmatprep.subr.bf16.mxu1 %v7482_v45  ;;  %v7490_v52 = vld [vmem:[#allocation25_spill] sm:$0xff]  ;;  %v7491_v45 = vld [vmem:[#allocation26_spill] sm:$0xff] }
 0x4fa   :  { %2800 = vmatpush1.bf16.msra.mxu0 %v7483_v35  ;;  %2841 = vmatpush1.bf16.msra.mxu1 %v7484_v14  ;;  %v7492_v35 = vld [vmem:[#allocation27_spill] sm:$0xff]  ;;  %v7493_v14 = vld [vmem:[#allocation28_spill] sm:$0xff] }
 0x4fb   :  { %2909 = vmatprep.subr.bf16.mxu0 %v7485_v22  ;;  %2950 = vmatprep.subr.bf16.mxu1 %v7486_v40  ;;  %v7494_v22 = vld [vmem:[#allocation29_spill] sm:$0xff]  ;;  %v7495_v40 = vld [vmem:[#allocation30_spill] sm:$0xff] }
 0x4fd   :  { %2802 = vmatmul.mubr.bf16.vlgmr.msra.gmra.mrb[60].mxu0 %v6076_v0  ;;  %2843 = vmatmul.mubr.bf16.vlgmr.msra.gmra.mrb[60].mxu1 %v6076_v0  ;;  %v7497_v0 = vld [vmem:[#allocation32_spill] sm:$0xff] }
 0x4fe   :  { %2910 = vmatpush1.bf16.msra.mxu0 %v7487_v20  ;;  %2951 = vmatpush1.bf16.msra.mxu1 %v7488_v7  ;;  %v7498_v20 = vld [vmem:[#allocation33_spill] sm:$0xff]  ;;  %v7499_v7 = vld [vmem:[#allocation34_spill] sm:$0xff] }
 0x4ff   :  { %2911 = vmatprep.subr.bf16.mxu0 %v7489_v3  ;;  %2952 = vmatprep.subr.bf16.mxu1 %v7490_v52  ;;  %v7500_v3 = vld [vmem:[#allocation35_spill] sm:$0xff]  ;;  %v7501_v52 = vld [vmem:[#allocation36_spill] sm:$0xff] }
 0x502   :  { %2912 = vmatpush1.bf16.msra.mxu0 %v7491_v45  ;;  %2953 = vmatpush1.bf16.msra.mxu1 %v7492_v35  ;;  %v7502_v45 = vld [vmem:[#allocation37_spill] sm:$0xff]  ;;  %v7503_v35 = vld [vmem:[#allocation38_spill] sm:$0xff] }
 0x503   :  { %2913 = vmatprep.subr.bf16.mxu0 %v7493_v14  ;;  %2954 = vmatprep.subr.bf16.mxu1 %v7494_v22  ;;  %v7504_v14 = vld [vmem:[#allocation39_spill] sm:$0xff]  ;;  %v7505_v22 = vld [vmem:[#allocation40_spill] sm:$0xff] }
 0x506   :  { %2914 = vmatpush1.bf16.msra.mxu0 %v7495_v40  ;;  %2955 = vmatpush1.bf16.msra.mxu1 %v7496_v29  ;;  %v7506_v40 = vld [vmem:[#allocation41_spill] sm:$0xff]  ;;  %v7507_v29 = vld [vmem:[#allocation42_spill] sm:$0xff] }
 0x507   :  { %2915 = vmatprep.subr.bf16.mxu0 %v7497_v0  ;;  %2956 = vmatprep.subr.bf16.mxu1 %v7498_v20  ;;  %v7508_v0 = vld [vmem:[#allocation43_spill] sm:$0xff]  ;;  %v7509_v20 = vld [vmem:[#allocation44_spill] sm:$0xff] }
 0x50a   :  { %2916 = vmatpush1.bf16.msra.mxu0 %v7499_v7  ;;  %2957 = vmatpush1.bf16.msra.mxu1 %v7500_v3  ;;  %v7510_v7 = vld [vmem:[#allocation45_spill] sm:$0xff]  ;;  %v7511_v3 = vld [vmem:[#allocation46_spill] sm:$0xff] }
 0x50b   :  { %2917 = vmatprep.subr.bf16.mxu0 %v7501_v52  ;;  %2958 = vmatprep.subr.bf16.mxu1 %v7502_v45  ;;  %v7512_v52 = vld [vmem:[#allocation47_spill] sm:$0xff]  ;;  %v7513_v45 = vld [vmem:[#allocation48_spill] sm:$0xff] }
 0x50e   :  { %2918 = vmatpush1.bf16.msra.mxu0 %v7503_v35  ;;  %2959 = vmatpush1.bf16.msra.mxu1 %v7504_v14  ;;  %v7514_v35 = vld [vmem:[#allocation49_spill] sm:$0xff]  ;;  %v7515_v14 = vld [vmem:[#allocation50_spill] sm:$0xff] }
 0x50f   :  { %2919 = vmatprep.subr.bf16.mxu0 %v7505_v22  ;;  %2960 = vmatprep.subr.bf16.mxu1 %v7506_v40  ;;  %v7516_v22 = vld [vmem:[#allocation51_spill] sm:$0xff]  ;;  %v7517_v40 = vld [vmem:[#allocation52_spill] sm:$0xff] }
 0x512   :  { %2920 = vmatpush1.bf16.msra.mxu0 %v7507_v29  ;;  %2961 = vmatpush1.bf16.msra.mxu1 %v7508_v0  ;;  %v7518_v29 = vld [vmem:[#allocation53_spill] sm:$0xff]  ;;  %v7519_v0 = vld [vmem:[#allocation54_spill] sm:$0xff] }
 0x513   :  { %2921 = vmatprep.subr.bf16.mxu0 %v7509_v20  ;;  %2962 = vmatprep.subr.bf16.mxu1 %v7510_v7  ;;  %v7520_v20 = vld [vmem:[#allocation55_spill] sm:$0xff]  ;;  %v7521_v7 = vld [vmem:[#allocation56_spill] sm:$0xff] }
 0x516   :  { %2922 = vmatpush1.bf16.msra.mxu0 %v7511_v3  ;;  %2963 = vmatpush1.bf16.msra.mxu1 %v7512_v52  ;;  %v7522_v3 = vld [vmem:[#allocation57_spill] sm:$0xff]  ;;  %v7523_v52 = vld [vmem:[#allocation58_spill] sm:$0xff] }
 0x517   :  { %2923 = vmatprep.subr.bf16.mxu0 %v7513_v45  ;;  %2964 = vmatprep.subr.bf16.mxu1 %v7514_v35  ;;  %v7524_v45 = vld [vmem:[#allocation59_spill] sm:$0xff]  ;;  %v7525_v35 = vld [vmem:[#allocation60_spill] sm:$0xff] }
 0x51a   :  { %2924 = vmatpush1.bf16.msra.mxu0 %v7515_v14  ;;  %2965 = vmatpush1.bf16.msra.mxu1 %v7516_v22  ;;  %v7526_v14 = vld [vmem:[#allocation61_spill] sm:$0xff]  ;;  %v7527_v22 = vld [vmem:[#allocation62_spill] sm:$0xff] }
 0x51b   :  { %2925 = vmatprep.subr.bf16.mxu0 %v7517_v40  ;;  %2966 = vmatprep.subr.bf16.mxu1 %v7518_v29  ;;  %v7528_v40 = vld [vmem:[#allocation63_spill] sm:$0xff]  ;;  %v7529_v29 = vld [vmem:[#allocation64_spill] sm:$0xff] }
 0x51e   :  { %2926 = vmatpush1.bf16.msra.mxu0 %v7519_v0  ;;  %2967 = vmatpush1.bf16.msra.mxu1 %v7520_v20  ;;  %v7530_v0 = vld [vmem:[#allocation65_spill] sm:$0xff]  ;;  %v7531_v20 = vld [vmem:[#allocation66_spill] sm:$0xff] }
 0x51f   :  { %2927 = vmatprep.subr.bf16.mxu0 %v7521_v7  ;;  %2968 = vmatprep.subr.bf16.mxu1 %v7522_v3  ;;  %v7532_v7 = vld [vmem:[#allocation67_spill] sm:$0xff]  ;;  %v7533_v3 = vld [vmem:[#allocation68_spill] sm:$0xff] }
 0x522   :  { %2928 = vmatpush1.bf16.msra.mxu0 %v7523_v52  ;;  %2969 = vmatpush1.bf16.msra.mxu1 %v7524_v45  ;;  %v7534_v52 = vld [vmem:[#allocation69_spill] sm:$0xff]  ;;  %v7535_v45 = vld [vmem:[#allocation70_spill] sm:$0xff] }
 0x523   :  { %2929 = vmatprep.subr.bf16.mxu0 %v7525_v35  ;;  %2970 = vmatprep.subr.bf16.mxu1 %v7526_v14  ;;  %v7536_v35 = vld [vmem:[#allocation71_spill] sm:$0xff]  ;;  %v7537_v14 = vld [vmem:[#allocation72_spill] sm:$0xff] }
 0x526   :  { %2930 = vmatpush1.bf16.msra.mxu0 %v7527_v22  ;;  %2971 = vmatpush1.bf16.msra.mxu1 %v7528_v40  ;;  %v7538_v22 = vld [vmem:[#allocation73_spill] sm:$0xff]  ;;  %v7539_v40 = vld [vmem:[#allocation74_spill] sm:$0xff] }
 0x527   :  { %2931 = vmatprep.subr.bf16.mxu0 %v7529_v29  ;;  %2972 = vmatprep.subr.bf16.mxu1 %v7530_v0  ;;  %v7540_v29 = vld [vmem:[#allocation75_spill] sm:$0xff]  ;;  %v7541_v0 = vld [vmem:[#allocation76_spill] sm:$0xff] }
 0x52a   :  { %2932 = vmatpush1.bf16.msra.mxu0 %v7531_v20  ;;  %2973 = vmatpush1.bf16.msra.mxu1 %v7532_v7  ;;  %v7542_v20 = vld [vmem:[#allocation77_spill] sm:$0xff]  ;;  %v7543_v7 = vld [vmem:[#allocation78_spill] sm:$0xff] }
 0x52b   :  { %2933 = vmatprep.subr.bf16.mxu0 %v7533_v3  ;;  %2974 = vmatprep.subr.bf16.mxu1 %v7534_v52  ;;  %v7544_v3 = vld [vmem:[#allocation79_spill] sm:$0xff]  ;;  %v7545_v52 = vld [vmem:[#allocation80_spill] sm:$0xff] }
 0x52e   :  { %2934 = vmatpush1.bf16.msra.mxu0 %v7535_v45  ;;  %2975 = vmatpush1.bf16.msra.mxu1 %v7536_v35  ;;  %v7546_v45 = vld [vmem:[#allocation81_spill] sm:$0xff]  ;;  %v7547_v35 = vld [vmem:[#allocation82_spill] sm:$0xff] }
 0x52f   :  { %2935 = vmatprep.subr.bf16.mxu0 %v7537_v14  ;;  %2976 = vmatprep.subr.bf16.mxu1 %v7538_v22  ;;  %v7548_v14 = vld [vmem:[#allocation83_spill] sm:$0xff]  ;;  %v7549_v22 = vld [vmem:[#allocation84_spill] sm:$0xff] }
 0x532   :  { %2936 = vmatpush1.bf16.msra.mxu0 %v7539_v40  ;;  %2977 = vmatpush1.bf16.msra.mxu1 %v7540_v29  ;;  %v7550_v40 = vld [vmem:[#allocation85_spill] sm:$0xff] }
 0x533   :  { %2937 = vmatprep.subr.bf16.mxu0 %v7541_v0  ;;  %2978 = vmatprep.subr.bf16.mxu1 %v7542_v20  ;;  %v7551_v29 = vld [vmem:[#allocation153_spill] sm:$0xff]  ;;  %v2666_v20 = vunpack.c.l.bf16 %v7552_v36 }
 0x534   :  { %v2664_v0 = vunpack.c.l.bf16 %v7551_v29 }
 0x536   :  { %2938 = vmatpush1.bf16.msra.mxu0 %v7543_v7  ;;  %2979 = vmatpush1.bf16.msra.mxu1 %v7544_v3  ;;  %v2665_v3 = vunpack.c.h.bf16 %v7551_v29 }
 0x537   :  { %2939 = vmatprep.subr.bf16.mxu0 %v7545_v52  ;;  %2980 = vmatprep.subr.bf16.mxu1 %v7546_v45  ;;  %v2680_v52 = vunpack.c.h.bf16 %v7553_v63 }
 0x53a   :  { %2940 = vmatpush1.bf16.msra.mxu0 %v7547_v35  ;;  %2981 = vmatpush1.bf16.msra.mxu1 %v7548_v14 }
 0x53b   :  { %2991 = vmatprep.subr.bf16.mxu0 %v7549_v22  ;;  %3032 = vmatprep.subr.bf16.mxu1 %v7550_v40 }
 0x590   :  { %v2721_v39 = vpop.f32.mrb[56].mxu0  ;;  %v2762_v7 = vpop.f32.mrb[56].mxu1 }
 0x591   :  { %v2851_v8 = vadd.f32 %v2721_v39, %v2664_v0  ;;  %v2853_v45 = vadd.f32 %v2762_v7, %v2666_v20  ;;  %v2723_v13 = vpop.f32.mrb[57].mxu0  ;;  %v2764_v35 = vpop.f32.mrb[57].mxu1  ;;  %v7554_v7 = vld [vmem:[#allocation171_spill] sm:$0xff] }
 0x592   :  { %v2852_v55 = vadd.f32 %v2723_v13, %v2665_v3  ;;  %v2854_v14 = vadd.f32 %v2764_v35, %v2680_v52  ;;  %v2725_v12 = vpop.f32.mrb[58].mxu0  ;;  %v2766_v22 = vpop.f32.mrb[58].mxu1  ;;  %v2681_v0 = vunpack.c.l.bf16 %v7554_v7  ;;  %v7555_v13 = vld [vmem:[#allocation170_spill] sm:$0xff] }
 0x593   :  { %v2726_v23 = vpop.f32.mrb[59].mxu0  ;;  %v2767_v40 = vpop.f32.mrb[59].mxu1  ;;  %v4356_v9 = vmul.f32 -1.442695, %v2851_v8  ;;  %v2670_v3 = vunpack.c.l.bf16 %v7555_v13  ;;  %v2682_v8 = vunpack.c.h.bf16 %v7554_v7  ;;  %v4358_v7 = vmul.f32 -1.442695, %v2853_v45 }
 0x594   :  { %v4357_v58 = vmul.f32 -1.442695, %v2852_v55  ;;  %v4359_v33 = vmul.f32 -1.442695, %v2854_v14  ;;  %v7556_v55 = vld [vmem:[#allocation172_spill] sm:$0xff] }
 0x595   :  { %4635 = vpow2.f32 %v4356_v9  ;;  %v2684_v14 = vunpack.c.h.bf16 %v7556_v55 }
 0x596   :  { %4637 = vpow2.f32 %v4357_v58 }
 0x597   :  { %4639 = vpow2.f32 %v4359_v33 }
 0x59f   :  { %v4636_v36 = vpop.eup %4635 }
 0x5a0   :  { %v4638_v29 = vpop.eup %4637  ;;  %v2875_v63 = vadd.f32 1.0, %v4636_v36 }
 0x5a1   :  { %v4640_v56 = vpop.eup %4639  ;;  %v2876_v39 = vadd.f32 1.0, %v4638_v29 }
 0x5a2   :  { %v2878_v20 = vadd.f32 1.0, %v4640_v56  ;;  %4641 = vrcp.f32 %v2875_v63 }
 0x5a3   :  { %4643 = vrcp.f32 %v2876_v39 }
 0x5a4   :  { %4645 = vrcp.f32 %v2878_v20 }
 0x5ac   :  { %v4642_v13 = vpop.eup %4641 }
 0x5ad   :  { %v4644_v17 = vpop.eup %4643 }
 0x5ae   :  { %v4646_v39 = vpop.eup %4645  ;;  %v2897_v20 = vmul.f32 %v4644_v17, %v6069_v2 }
 0x5d0   :  { %v2803_v12 = vpop.f32.mrb[60].mxu0  ;;  %v2844_v23 = vpop.f32.mrb[60].mxu1 }
 0x5d1   :  { %v2855_v58 = vadd.f32 %v2803_v12, %v2681_v0  ;;  %v2893_v33 = vadd.f32 %v2844_v23, %v2670_v3  ;;  %v2805_v9 = vpop.f32.mrb[61].mxu0  ;;  %v2846_v22 = vpop.f32.mrb[61].mxu1 }
 0x5d2   :  { %v2856_v40 = vadd.f32 %v2805_v9, %v2682_v8  ;;  %v2894_v36 = vadd.f32 %v2846_v22, %v2684_v14  ;;  %v2807_v56 = vpop.f32.mrb[62].mxu0  ;;  %v2848_v52 = vpop.f32.mrb[62].mxu1 }
 0x5d3   :  { %v4360_v35 = vmul.f32 -1.442695, %v2855_v58  ;;  %4647 = vtanh.f32 %v2893_v33  ;;  %v2808_v29 = vpop.f32.mrb[63].mxu0  ;;  %v2849_v63 = vpop.f32.mrb[63].mxu1 }
 0x5d4   :  { %4649 = vtanh.f32 %v2894_v36  ;;  %v4361_v55 = vmul.f32 -1.442695, %v2856_v40 }
 0x5d5   :  { %4651 = vpow2.f32 %v4360_v35 }
 0x5d6   :  { %4653 = vpow2.f32 %v4358_v7  ;;  %v7558_v7 = vld [vmem:[#allocation125_spill] sm:$0xff] }
 0x5d7   :  { %4655 = vpow2.f32 %v4361_v55 }
 0x5dd   :  { %v4648_v0 = vpop.eup %4647 }
 0x5de   :  { %v4650_v3 = vpop.eup %4649  ;;  %v2898_v12 = vmul.f32 %v4648_v0, %v4642_v13  ;;  %v7560_v0 = vld [vmem:[#allocation127_spill] sm:$0xff] }
 0x5df   :  { %v4652_v23 = vpop.eup %4651  ;;  %v2901_v8 = vmul.f32 %v4650_v3, %v4646_v39  ;;  %v7559_v39 = vld [vmem:[#allocation126_spill] sm:$0xff]  ;;  %v7561_v3 = vld [vmem:[#allocation128_spill] sm:$0xff] }
 0x5e0   :  { %v2879_v14 = vadd.f32 1.0, %v4652_v23  ;;  %v6219_v58 = vadd.f32 %v2898_v12, %v2897_v20  ;;  %v4654_v33 = vpop.eup %4653  ;;  %v7562_v20 = vld [vmem:[#allocation129_spill] sm:$0xff]  ;;  %v7563_v12 = vld [vmem:[#allocation130_spill] sm:$0xff]  ;;  %v7564_v23 = vld [vmem:[#allocation131_spill] sm:$0xff] }
 0x5e1   :  { %v4656_v9 = vpop.eup %4655  ;;  %v2877_v22 = vadd.f32 1.0, %v4654_v33  ;;  %v7567_v33 = vld [vmem:[#allocation134_spill] sm:$0xff] }
 0x5e2   :  { %4657 = vrcp.f32 %v2879_v14  ;;  %v2880_v36 = vadd.f32 1.0, %v4656_v9  ;;  %v7566_v14 = vld [vmem:[#allocation133_spill] sm:$0xff]  ;;  %v7568_v9 = vld [vmem:[#allocation135_spill] sm:$0xff] }
 0x5e3   :  { %4659 = vtanh.f32 %v6219_v58 }
 0x5e4   :  { %4661 = vrcp.f32 %v2877_v22  ;;  %v7569_v22 = vld [vmem:[#allocation136_spill] sm:$0xff] }
 0x5e5   :  { %4663 = vrcp.f32 %v2880_v36  ;;  %v7571_v36 = vld [vmem:[#allocation138_spill] sm:$0xff] }
 0x5ec   :  { %v4658_v45 = vpop.eup %4657 }
 0x5ed   :  { %v2900_v40 = vmul.f32 %v4658_v45, %v6073_v28  ;;  %v4660_v17 = vpop.eup %4659  ;;  %v7557_v28 = vld [vmem:[#allocation124_spill] sm:$0xff]  ;;  %v7570_v45 = vld [vmem:[#allocation137_spill] sm:$0xff] }
 0x5ee   :  { %v4662_v2 = vpop.eup %4661 }
 0x5ef   :  { %v6223_v56 = vadd.f32 %v2901_v8, %v2900_v40  ;;  %v4664_v13 = vpop.eup %4663  ;;  %v2904_v52 = vmul.f32 %v4662_v2, %v4660_v17  ;;  %v7565_v8 = vld [vmem:[#allocation132_spill] sm:$0xff]  ;;  %v7572_v40 = vld [vmem:[#allocation139_spill] sm:$0xff]  ;;  %v7574_v2 = vld [vmem:[#allocation141_spill] sm:$0xff] }
 0x5f0   :  { %v7573_v17 = vld [vmem:[#allocation140_spill] sm:$0xff] }
 0x5f1   :  { %4665 = vtanh.f32 %v6223_v56  ;;  %v6226_v63 = vpack.c.bf16 %v2904_v52, %v2904_v52  ;;  %v7577_v52 = vld [vmem:[#allocation144_spill] sm:$0xff] }
 0x5fb   :  { %v4666_v55 = vpop.eup %4665 }
 0x5fc   :  { %v2906_v35 = vmul.f32 %v4666_v55, %v4664_v13  ;;  %v7575_v13 = vld [vmem:[#allocation142_spill] sm:$0xff]  ;;  %v7576_v55 = vld [vmem:[#allocation143_spill] sm:$0xff] }
 0x5fe   :  { %v2908_v29 = vpack.c.bf16 %v2906_v35, %v2906_v35  ;;  %v7578_v35 = vld [vmem:[#allocation145_spill] sm:$0xff] }
 0x600   :  { %2941 = vmatprep.mubr.bf16.mxu0 %v2908_v29  ;;  %2982 = vmatprep.mubr.bf16.mxu1 %v2908_v29 }
 0x601   :  { %2942 = vmatmul.mubr.bf16.vlgmr.msra.gmra.mrb[64].mxu0 %v6226_v63  ;;  %2983 = vmatmul.mubr.bf16.vlgmr.msra.gmra.mrb[64].mxu1 %v6226_v63 }
 0x602   :  { %2992 = vmatpush1.bf16.msra.mxu0 %v7269_v5  ;;  %3033 = vmatpush1.bf16.msra.mxu1 %v7270_v15 }
 0x603   :  { %3023 = vmatprep.mubr.bf16.mxu0 %v2908_v29  ;;  %3064 = vmatprep.mubr.bf16.mxu1 %v2908_v29  ;;  %v7579_v29 = vld [vmem:[#allocation146_spill] sm:$0xff] }
 0x604   :  { %2993 = vmatprep.subr.bf16.mxu0 %v7271_v32  ;;  %3034 = vmatprep.subr.bf16.mxu1 %v7272_v62 }
 0x606   :  { %2994 = vmatpush1.bf16.msra.mxu0 %v7273_v51  ;;  %3035 = vmatpush1.bf16.msra.mxu1 %v7274_v16 }
 0x607   :  { %2995 = vmatprep.subr.bf16.mxu0 %v7275_v4  ;;  %3036 = vmatprep.subr.bf16.mxu1 %v7276_v60 }
 0x60a   :  { %2996 = vmatpush1.bf16.msra.mxu0 %v7277_v11  ;;  %3037 = vmatpush1.bf16.msra.mxu1 %v7278_v61 }
 0x60b   :  { %2997 = vmatprep.subr.bf16.mxu0 %v7279_v10  ;;  %3038 = vmatprep.subr.bf16.mxu1 %v7280_v48 }
 0x60e   :  { %2998 = vmatpush1.bf16.msra.mxu0 %v7365_v6  ;;  %3039 = vmatpush1.bf16.msra.mxu1 %v7366_v24 }
 0x60f   :  { %2999 = vmatprep.subr.bf16.mxu0 %v7367_v38  ;;  %3040 = vmatprep.subr.bf16.mxu1 %v7368_v59 }
 0x612   :  { %3000 = vmatpush1.bf16.msra.mxu0 %v7369_v46  ;;  %3041 = vmatpush1.bf16.msra.mxu1 %v7370_v42 }
 0x613   :  { %3001 = vmatprep.subr.bf16.mxu0 %v7371_v30  ;;  %3042 = vmatprep.subr.bf16.mxu1 %v7372_v26 }
 0x616   :  { %3002 = vmatpush1.bf16.msra.mxu0 %v7373_v34  ;;  %3043 = vmatpush1.bf16.msra.mxu1 %v7374_v47 }
 0x617   :  { %3003 = vmatprep.subr.bf16.mxu0 %v7375_v19  ;;  %3044 = vmatprep.subr.bf16.mxu1 %v7376_v21 }
 0x61a   :  { %3004 = vmatpush1.bf16.msra.mxu0 %v7461_v18  ;;  %3045 = vmatpush1.bf16.msra.mxu1 %v7462_v1 }
 0x61b   :  { %3005 = vmatprep.subr.bf16.mxu0 %v7379_v53  ;;  %3046 = vmatprep.subr.bf16.mxu1 %v7380_v41 }
 0x61e   :  { %3006 = vmatpush1.bf16.msra.mxu0 %v7381_v43  ;;  %3047 = vmatpush1.bf16.msra.mxu1 %v7463_v25 }
 0x61f   :  { %3007 = vmatprep.subr.bf16.mxu0 %v7383_v31  ;;  %3048 = vmatprep.subr.bf16.mxu1 %v7384_v54 }
 0x622   :  { %3008 = vmatpush1.bf16.msra.mxu0 %v7385_v57  ;;  %3049 = vmatpush1.bf16.msra.mxu1 %v7386_v44 }
 0x623   :  { %3009 = vmatprep.subr.bf16.mxu0 %v7387_v37  ;;  %3050 = vmatprep.subr.bf16.mxu1 %v7388_v27 }
 0x626   :  { %3010 = vmatpush1.bf16.msra.mxu0 %v7389_v50  ;;  %3051 = vmatpush1.bf16.msra.mxu1 %v7306_v49 }
 0x627   :  { %3011 = vmatprep.subr.bf16.mxu0 %v7557_v28  ;;  %3052 = vmatprep.subr.bf16.mxu1 %v7558_v7 }
 0x62a   :  { %3012 = vmatpush1.bf16.msra.mxu0 %v7559_v39  ;;  %3053 = vmatpush1.bf16.msra.mxu1 %v7560_v0 }
 0x62b   :  { %3013 = vmatprep.subr.bf16.mxu0 %v7561_v3  ;;  %3054 = vmatprep.subr.bf16.mxu1 %v7562_v20 }
 0x62e   :  { %3014 = vmatpush1.bf16.msra.mxu0 %v7563_v12  ;;  %3055 = vmatpush1.bf16.msra.mxu1 %v7564_v23 }
 0x62f   :  { %3015 = vmatprep.subr.bf16.mxu0 %v7565_v8  ;;  %3056 = vmatprep.subr.bf16.mxu1 %v7566_v14 }
 0x632   :  { %3016 = vmatpush1.bf16.msra.mxu0 %v7567_v33  ;;  %3057 = vmatpush1.bf16.msra.mxu1 %v7568_v9  ;;  %v7649_v33 = vld [vmem:[#allocation154_spill] sm:$0xff] }
 0x633   :  { %3017 = vmatprep.subr.bf16.mxu0 %v7569_v22  ;;  %3058 = vmatprep.subr.bf16.mxu1 %v7570_v45  ;;  %v7580_v22 = vld [vmem:[#allocation147_spill] sm:$0xff]  ;;  %v7581_v45 = vld [vmem:[#allocation20_spill] sm:$0xff] }
 0x636   :  { %3018 = vmatpush1.bf16.msra.mxu0 %v7571_v36  ;;  %3059 = vmatpush1.bf16.msra.mxu1 %v7572_v40  ;;  %v7582_v36 = vld [vmem:[#allocation21_spill] sm:$0xff]  ;;  %v7648_v40 = vld [vmem:[#allocation156_spill] sm:$0xff] }
 0x637   :  { %3019 = vmatprep.subr.bf16.mxu0 %v7573_v17  ;;  %3060 = vmatprep.subr.bf16.mxu1 %v7574_v2  ;;  %v7583_v2 = vld [vmem:[#allocation22_spill] sm:$0xff]  ;;  %v7592_v17 = vld [vmem:[#allocation31_spill] sm:$0xff] }
 0x63a   :  { %3020 = vmatpush1.bf16.msra.mxu0 %v7575_v13  ;;  %3061 = vmatpush1.bf16.msra.mxu1 %v7576_v55  ;;  %v7584_v13 = vld [vmem:[#allocation23_spill] sm:$0xff]  ;;  %v7585_v55 = vld [vmem:[#allocation24_spill] sm:$0xff] }
 0x63b   :  { %3021 = vmatprep.subr.bf16.mxu0 %v7577_v52  ;;  %3062 = vmatprep.subr.bf16.mxu1 %v7578_v35  ;;  %v7586_v52 = vld [vmem:[#allocation25_spill] sm:$0xff]  ;;  %v7587_v35 = vld [vmem:[#allocation26_spill] sm:$0xff] }
 0x63e   :  { %3022 = vmatpush1.bf16.msra.mxu0 %v7579_v29  ;;  %3063 = vmatpush1.bf16.msra.mxu1 %v7580_v22  ;;  %v7588_v29 = vld [vmem:[#allocation27_spill] sm:$0xff]  ;;  %v7589_v22 = vld [vmem:[#allocation28_spill] sm:$0xff] }
 0x63f   :  { %3131 = vmatprep.subr.bf16.mxu0 %v7581_v45  ;;  %3172 = vmatprep.subr.bf16.mxu1 %v7582_v36  ;;  %v7590_v45 = vld [vmem:[#allocation29_spill] sm:$0xff]  ;;  %v7591_v36 = vld [vmem:[#allocation30_spill] sm:$0xff] }
 0x641   :  { %3024 = vmatmul.mubr.bf16.vlgmr.msra.gmra.mrb[68].mxu0 %v6226_v63  ;;  %3065 = vmatmul.mubr.bf16.vlgmr.msra.gmra.mrb[68].mxu1 %v6226_v63  ;;  %v7593_v63 = vld [vmem:[#allocation32_spill] sm:$0xff] }
 0x642   :  { %3132 = vmatpush1.bf16.msra.mxu0 %v7583_v2  ;;  %3173 = vmatpush1.bf16.msra.mxu1 %v7584_v13  ;;  %v7594_v2 = vld [vmem:[#allocation33_spill] sm:$0xff]  ;;  %v7595_v13 = vld [vmem:[#allocation34_spill] sm:$0xff] }
 0x643   :  { %3133 = vmatprep.subr.bf16.mxu0 %v7585_v55  ;;  %3174 = vmatprep.subr.bf16.mxu1 %v7586_v52  ;;  %v7596_v55 = vld [vmem:[#allocation35_spill] sm:$0xff]  ;;  %v7597_v52 = vld [vmem:[#allocation36_spill] sm:$0xff] }
 0x646   :  { %3134 = vmatpush1.bf16.msra.mxu0 %v7587_v35  ;;  %3175 = vmatpush1.bf16.msra.mxu1 %v7588_v29  ;;  %v7598_v35 = vld [vmem:[#allocation37_spill] sm:$0xff]  ;;  %v7599_v29 = vld [vmem:[#allocation38_spill] sm:$0xff] }
 0x647   :  { %3135 = vmatprep.subr.bf16.mxu0 %v7589_v22  ;;  %3176 = vmatprep.subr.bf16.mxu1 %v7590_v45  ;;  %v7600_v22 = vld [vmem:[#allocation39_spill] sm:$0xff]  ;;  %v7601_v45 = vld [vmem:[#allocation40_spill] sm:$0xff] }
 0x64a   :  { %3136 = vmatpush1.bf16.msra.mxu0 %v7591_v36  ;;  %3177 = vmatpush1.bf16.msra.mxu1 %v7592_v17  ;;  %v7602_v36 = vld [vmem:[#allocation41_spill] sm:$0xff]  ;;  %v7603_v17 = vld [vmem:[#allocation42_spill] sm:$0xff] }
 0x64b   :  { %3137 = vmatprep.subr.bf16.mxu0 %v7593_v63  ;;  %3178 = vmatprep.subr.bf16.mxu1 %v7594_v2  ;;  %v7604_v63 = vld [vmem:[#allocation43_spill] sm:$0xff]  ;;  %v7605_v2 = vld [vmem:[#allocation44_spill] sm:$0xff] }
 0x64e   :  { %3138 = vmatpush1.bf16.msra.mxu0 %v7595_v13  ;;  %3179 = vmatpush1.bf16.msra.mxu1 %v7596_v55  ;;  %v7606_v13 = vld [vmem:[#allocation45_spill] sm:$0xff]  ;;  %v7607_v55 = vld [vmem:[#allocation46_spill] sm:$0xff] }
 0x64f   :  { %3139 = vmatprep.subr.bf16.mxu0 %v7597_v52  ;;  %3180 = vmatprep.subr.bf16.mxu1 %v7598_v35  ;;  %v7608_v52 = vld [vmem:[#allocation47_spill] sm:$0xff]  ;;  %v7609_v35 = vld [vmem:[#allocation48_spill] sm:$0xff] }
 0x652   :  { %3140 = vmatpush1.bf16.msra.mxu0 %v7599_v29  ;;  %3181 = vmatpush1.bf16.msra.mxu1 %v7600_v22  ;;  %v7610_v29 = vld [vmem:[#allocation49_spill] sm:$0xff]  ;;  %v7611_v22 = vld [vmem:[#allocation50_spill] sm:$0xff] }
 0x653   :  { %3141 = vmatprep.subr.bf16.mxu0 %v7601_v45  ;;  %3182 = vmatprep.subr.bf16.mxu1 %v7602_v36  ;;  %v7612_v45 = vld [vmem:[#allocation51_spill] sm:$0xff]  ;;  %v7613_v36 = vld [vmem:[#allocation52_spill] sm:$0xff] }
 0x656   :  { %3142 = vmatpush1.bf16.msra.mxu0 %v7603_v17  ;;  %3183 = vmatpush1.bf16.msra.mxu1 %v7604_v63  ;;  %v7614_v17 = vld [vmem:[#allocation53_spill] sm:$0xff]  ;;  %v7615_v63 = vld [vmem:[#allocation54_spill] sm:$0xff] }
 0x657   :  { %3143 = vmatprep.subr.bf16.mxu0 %v7605_v2  ;;  %3184 = vmatprep.subr.bf16.mxu1 %v7606_v13  ;;  %v7616_v2 = vld [vmem:[#allocation55_spill] sm:$0xff]  ;;  %v7617_v13 = vld [vmem:[#allocation56_spill] sm:$0xff] }
 0x65a   :  { %3144 = vmatpush1.bf16.msra.mxu0 %v7607_v55  ;;  %3185 = vmatpush1.bf16.msra.mxu1 %v7608_v52  ;;  %v7618_v55 = vld [vmem:[#allocation57_spill] sm:$0xff]  ;;  %v7619_v52 = vld [vmem:[#allocation58_spill] sm:$0xff] }
 0x65b   :  { %3145 = vmatprep.subr.bf16.mxu0 %v7609_v35  ;;  %3186 = vmatprep.subr.bf16.mxu1 %v7610_v29  ;;  %v7620_v35 = vld [vmem:[#allocation59_spill] sm:$0xff]  ;;  %v7621_v29 = vld [vmem:[#allocation60_spill] sm:$0xff] }
 0x65e   :  { %3146 = vmatpush1.bf16.msra.mxu0 %v7611_v22  ;;  %3187 = vmatpush1.bf16.msra.mxu1 %v7612_v45  ;;  %v7622_v22 = vld [vmem:[#allocation61_spill] sm:$0xff]  ;;  %v7623_v45 = vld [vmem:[#allocation62_spill] sm:$0xff] }
 0x65f   :  { %3147 = vmatprep.subr.bf16.mxu0 %v7613_v36  ;;  %3188 = vmatprep.subr.bf16.mxu1 %v7614_v17  ;;  %v7624_v36 = vld [vmem:[#allocation63_spill] sm:$0xff]  ;;  %v7625_v17 = vld [vmem:[#allocation64_spill] sm:$0xff] }
 0x662   :  { %3148 = vmatpush1.bf16.msra.mxu0 %v7615_v63  ;;  %3189 = vmatpush1.bf16.msra.mxu1 %v7616_v2  ;;  %v7626_v63 = vld [vmem:[#allocation65_spill] sm:$0xff]  ;;  %v7627_v2 = vld [vmem:[#allocation66_spill] sm:$0xff] }
 0x663   :  { %3149 = vmatprep.subr.bf16.mxu0 %v7617_v13  ;;  %3190 = vmatprep.subr.bf16.mxu1 %v7618_v55  ;;  %v7628_v13 = vld [vmem:[#allocation67_spill] sm:$0xff]  ;;  %v7629_v55 = vld [vmem:[#allocation68_spill] sm:$0xff] }
 0x666   :  { %3150 = vmatpush1.bf16.msra.mxu0 %v7619_v52  ;;  %3191 = vmatpush1.bf16.msra.mxu1 %v7620_v35  ;;  %v7630_v52 = vld [vmem:[#allocation69_spill] sm:$0xff]  ;;  %v7631_v35 = vld [vmem:[#allocation70_spill] sm:$0xff] }
 0x667   :  { %3151 = vmatprep.subr.bf16.mxu0 %v7621_v29  ;;  %3192 = vmatprep.subr.bf16.mxu1 %v7622_v22  ;;  %v7632_v29 = vld [vmem:[#allocation71_spill] sm:$0xff]  ;;  %v7633_v22 = vld [vmem:[#allocation72_spill] sm:$0xff] }
 0x66a   :  { %3152 = vmatpush1.bf16.msra.mxu0 %v7623_v45  ;;  %3193 = vmatpush1.bf16.msra.mxu1 %v7624_v36  ;;  %v7634_v45 = vld [vmem:[#allocation73_spill] sm:$0xff]  ;;  %v7635_v36 = vld [vmem:[#allocation74_spill] sm:$0xff] }
 0x66b   :  { %3153 = vmatprep.subr.bf16.mxu0 %v7625_v17  ;;  %3194 = vmatprep.subr.bf16.mxu1 %v7626_v63  ;;  %v7636_v17 = vld [vmem:[#allocation75_spill] sm:$0xff]  ;;  %v7637_v63 = vld [vmem:[#allocation76_spill] sm:$0xff] }
 0x66e   :  { %3154 = vmatpush1.bf16.msra.mxu0 %v7627_v2  ;;  %3195 = vmatpush1.bf16.msra.mxu1 %v7628_v13  ;;  %v7638_v2 = vld [vmem:[#allocation77_spill] sm:$0xff]  ;;  %v7639_v13 = vld [vmem:[#allocation78_spill] sm:$0xff] }
 0x66f   :  { %3155 = vmatprep.subr.bf16.mxu0 %v7629_v55  ;;  %3196 = vmatprep.subr.bf16.mxu1 %v7630_v52  ;;  %v7640_v55 = vld [vmem:[#allocation79_spill] sm:$0xff]  ;;  %v7641_v52 = vld [vmem:[#allocation80_spill] sm:$0xff] }
 0x672   :  { %3156 = vmatpush1.bf16.msra.mxu0 %v7631_v35  ;;  %3197 = vmatpush1.bf16.msra.mxu1 %v7632_v29  ;;  %v7642_v35 = vld [vmem:[#allocation81_spill] sm:$0xff]  ;;  %v7643_v29 = vld [vmem:[#allocation82_spill] sm:$0xff] }
 0x673   :  { %3157 = vmatprep.subr.bf16.mxu0 %v7633_v22  ;;  %3198 = vmatprep.subr.bf16.mxu1 %v7634_v45  ;;  %v7644_v22 = vld [vmem:[#allocation83_spill] sm:$0xff]  ;;  %v7645_v45 = vld [vmem:[#allocation84_spill] sm:$0xff] }
 0x676   :  { %3158 = vmatpush1.bf16.msra.mxu0 %v7635_v36  ;;  %3199 = vmatpush1.bf16.msra.mxu1 %v7636_v17  ;;  %v7646_v36 = vld [vmem:[#allocation85_spill] sm:$0xff]  ;;  %v7647_v17 = vld [vmem:[#allocation155_spill] sm:$0xff] }
 0x677   :  { %3159 = vmatprep.subr.bf16.mxu0 %v7637_v63  ;;  %3200 = vmatprep.subr.bf16.mxu1 %v7638_v2  ;;  %v2677_v63 = vunpack.c.l.bf16 %v7647_v17  ;;  %v2679_v2 = vunpack.c.l.bf16 %v7648_v40 }
 0x67a   :  { %3160 = vmatpush1.bf16.msra.mxu0 %v7639_v13  ;;  %3201 = vmatpush1.bf16.msra.mxu1 %v7640_v55  ;;  %v2678_v55 = vunpack.c.h.bf16 %v7647_v17 }
 0x67b   :  { %3161 = vmatprep.subr.bf16.mxu0 %v7641_v52  ;;  %3202 = vmatprep.subr.bf16.mxu1 %v7642_v35  ;;  %v2667_v52 = vunpack.c.h.bf16 %v7649_v33 }
 0x67e   :  { %3162 = vmatpush1.bf16.msra.mxu0 %v7643_v29  ;;  %3203 = vmatpush1.bf16.msra.mxu1 %v7644_v22 }
 0x67f   :  { %3213 = vmatprep.subr.bf16.mxu0 %v7645_v45  ;;  %3254 = vmatprep.subr.bf16.mxu1 %v7646_v36 }
 0x6d4   :  { %v2943_v9 = vpop.f32.mrb[64].mxu0  ;;  %v2984_v13 = vpop.f32.mrb[64].mxu1 }
 0x6d5   :  { %v3073_v14 = vadd.f32 %v2943_v9, %v2677_v63  ;;  %v3075_v35 = vadd.f32 %v2984_v13, %v2679_v2  ;;  %v2945_v8 = vpop.f32.mrb[65].mxu0  ;;  %v2986_v29 = vpop.f32.mrb[65].mxu1  ;;  %v7650_v13 = vld [vmem:[#allocation169_spill] sm:$0xff] }
 0x6d6   :  { %v3074_v23 = vadd.f32 %v2945_v8, %v2678_v55  ;;  %v3076_v22 = vadd.f32 %v2986_v29, %v2667_v52  ;;  %v2947_v12 = vpop.f32.mrb[66].mxu0  ;;  %v2988_v45 = vpop.f32.mrb[66].mxu1  ;;  %v2668_v63 = vunpack.c.l.bf16 %v7650_v13  ;;  %v7651_v8 = vld [vmem:[#allocation172_spill] sm:$0xff] }
 0x6d7   :  { %v2948_v20 = vpop.f32.mrb[67].mxu0  ;;  %v2989_v36 = vpop.f32.mrb[67].mxu1  ;;  %v4362_v3 = vmul.f32 -1.442695, %v3073_v14  ;;  %v2683_v55 = vunpack.c.l.bf16 %v7651_v8  ;;  %v2669_v14 = vunpack.c.h.bf16 %v7650_v13  ;;  %v4364_v13 = vmul.f32 -1.442695, %v3075_v35 }
 0x6d8   :  { %v4363_v0 = vmul.f32 -1.442695, %v3074_v23  ;;  %v4365_v39 = vmul.f32 -1.442695, %v3076_v22  ;;  %v7652_v23 = vld [vmem:[#allocation170_spill] sm:$0xff] }
 0x6d9   :  { %4667 = vpow2.f32 %v4362_v3  ;;  %v2671_v22 = vunpack.c.h.bf16 %v7652_v23 }
 0x6da   :  { %4669 = vpow2.f32 %v4363_v0 }
 0x6db   :  { %4671 = vpow2.f32 %v4365_v39 }
 0x6e3   :  { %v4668_v40 = vpop.eup %4667 }
 0x6e4   :  { %v4670_v17 = vpop.eup %4669  ;;  %v3097_v33 = vadd.f32 1.0, %v4668_v40 }
 0x6e5   :  { %v4672_v7 = vpop.eup %4671  ;;  %v3098_v9 = vadd.f32 1.0, %v4670_v17 }
 0x6e6   :  { %v3100_v2 = vadd.f32 1.0, %v4672_v7  ;;  %4673 = vrcp.f32 %v3097_v33 }
 0x6e7   :  { %4675 = vrcp.f32 %v3098_v9 }
 0x6e8   :  { %4677 = vrcp.f32 %v3100_v2 }
 0x6f0   :  { %v4674_v8 = vpop.eup %4673 }
 0x6f1   :  { %v4676_v28 = vpop.eup %4675 }
 0x6f2   :  { %v4678_v9 = vpop.eup %4677  ;;  %v3119_v2 = vmul.f32 %v4676_v28, %v6219_v58 }
 0x714   :  { %v3025_v12 = vpop.f32.mrb[68].mxu0  ;;  %v3066_v20 = vpop.f32.mrb[68].mxu1 }
 0x715   :  { %v3077_v0 = vadd.f32 %v3025_v12, %v2668_v63  ;;  %v3115_v39 = vadd.f32 %v3066_v20, %v2683_v55  ;;  %v3027_v3 = vpop.f32.mrb[69].mxu0  ;;  %v3068_v45 = vpop.f32.mrb[69].mxu1 }
 0x716   :  { %v3078_v36 = vadd.f32 %v3027_v3, %v2669_v14  ;;  %v3116_v52 = vadd.f32 %v3068_v45, %v2671_v22  ;;  %v3029_v7 = vpop.f32.mrb[70].mxu0  ;;  %v3070_v29 = vpop.f32.mrb[70].mxu1 }
 0x717   :  { %v4366_v40 = vmul.f32 -1.442695, %v3077_v0  ;;  %4679 = vtanh.f32 %v3115_v39  ;;  %v3030_v17 = vpop.f32.mrb[71].mxu0  ;;  %v3071_v33 = vpop.f32.mrb[71].mxu1 }
 0x718   :  { %4681 = vtanh.f32 %v3116_v52  ;;  %v4367_v23 = vmul.f32 -1.442695, %v3078_v36 }
 0x719   :  { %4683 = vpow2.f32 %v4366_v40 }
 0x71a   :  { %4685 = vpow2.f32 %v4364_v13 }
 0x71b   :  { %4687 = vpow2.f32 %v4367_v23  ;;  %v7654_v23 = vld [vmem:[#allocation125_spill] sm:$0xff] }
 0x721   :  { %v4680_v63 = vpop.eup %4679 }
 0x722   :  { %v4682_v55 = vpop.eup %4681  ;;  %v3120_v12 = vmul.f32 %v4680_v63, %v4674_v8  ;;  %v7656_v63 = vld [vmem:[#allocation127_spill] sm:$0xff] }
 0x723   :  { %v4684_v20 = vpop.eup %4683  ;;  %v3123_v14 = vmul.f32 %v4682_v55, %v4678_v9  ;;  %v7655_v9 = vld [vmem:[#allocation126_spill] sm:$0xff]  ;;  %v7657_v55 = vld [vmem:[#allocation128_spill] sm:$0xff] }
 0x724   :  { %v3101_v22 = vadd.f32 1.0, %v4684_v20  ;;  %v6369_v0 = vadd.f32 %v3120_v12, %v3119_v2  ;;  %v4686_v39 = vpop.eup %4685  ;;  %v7658_v2 = vld [vmem:[#allocation129_spill] sm:$0xff]  ;;  %v7659_v12 = vld [vmem:[#allocation130_spill] sm:$0xff]  ;;  %v7660_v20 = vld [vmem:[#allocation131_spill] sm:$0xff] }
 0x725   :  { %v4688_v3 = vpop.eup %4687  ;;  %v3099_v45 = vadd.f32 1.0, %v4686_v39  ;;  %v7663_v39 = vld [vmem:[#allocation134_spill] sm:$0xff] }
 0x726   :  { %4689 = vrcp.f32 %v3101_v22  ;;  %v3102_v52 = vadd.f32 1.0, %v4688_v3  ;;  %v7662_v22 = vld [vmem:[#allocation133_spill] sm:$0xff]  ;;  %v7664_v3 = vld [vmem:[#allocation135_spill] sm:$0xff] }
 0x727   :  { %4691 = vtanh.f32 %v6369_v0 }
 0x728   :  { %4693 = vrcp.f32 %v3099_v45  ;;  %v7665_v45 = vld [vmem:[#allocation136_spill] sm:$0xff] }
 0x729   :  { %4695 = vrcp.f32 %v3102_v52  ;;  %v7667_v52 = vld [vmem:[#allocation138_spill] sm:$0xff] }
 0x730   :  { %v4690_v35 = vpop.eup %4689 }
 0x731   :  { %v3122_v36 = vmul.f32 %v4690_v35, %v6223_v56  ;;  %v4692_v58 = vpop.eup %4691  ;;  %v7653_v56 = vld [vmem:[#allocation124_spill] sm:$0xff]  ;;  %v7666_v35 = vld [vmem:[#allocation137_spill] sm:$0xff] }
 0x732   :  { %v4694_v28 = vpop.eup %4693 }
 0x733   :  { %v6373_v7 = vadd.f32 %v3123_v14, %v3122_v36  ;;  %v4696_v29 = vpop.eup %4695  ;;  %v3126_v17 = vmul.f32 %v4694_v28, %v4692_v58  ;;  %v7661_v14 = vld [vmem:[#allocation132_spill] sm:$0xff]  ;;  %v7668_v36 = vld [vmem:[#allocation139_spill] sm:$0xff]  ;;  %v7670_v28 = vld [vmem:[#allocation141_spill] sm:$0xff] }
 0x734   :  { %v7669_v58 = vld [vmem:[#allocation140_spill] sm:$0xff] }
 0x735   :  { %4697 = vtanh.f32 %v6373_v7  ;;  %v6376_v13 = vpack.c.bf16 %v3126_v17, %v3126_v17  ;;  %v7673_v17 = vld [vmem:[#allocation144_spill] sm:$0xff] }
 0x73f   :  { %v4698_v40 = vpop.eup %4697 }
 0x740   :  { %v3128_v33 = vmul.f32 %v4698_v40, %v4696_v29  ;;  %v7671_v29 = vld [vmem:[#allocation142_spill] sm:$0xff]  ;;  %v7672_v40 = vld [vmem:[#allocation143_spill] sm:$0xff] }
 0x742   :  { %v3130_v8 = vpack.c.bf16 %v3128_v33, %v3128_v33  ;;  %v7674_v33 = vld [vmem:[#allocation145_spill] sm:$0xff] }
 0x744   :  { %3163 = vmatprep.mubr.bf16.mxu0 %v3130_v8  ;;  %3204 = vmatprep.mubr.bf16.mxu1 %v3130_v8 }
 0x745   :  { %3164 = vmatmul.mubr.bf16.vlgmr.msra.gmra.mrb[72].mxu0 %v6376_v13  ;;  %3205 = vmatmul.mubr.bf16.vlgmr.msra.gmra.mrb[72].mxu1 %v6376_v13 }
 0x746   :  { %3214 = vmatpush1.bf16.msra.mxu0 %v7269_v5  ;;  %3255 = vmatpush1.bf16.msra.mxu1 %v7270_v15 }
 0x747   :  { %3245 = vmatprep.mubr.bf16.mxu0 %v3130_v8  ;;  %3286 = vmatprep.mubr.bf16.mxu1 %v3130_v8  ;;  %v7675_v8 = vld [vmem:[#allocation146_spill] sm:$0xff] }
 0x748   :  { %3215 = vmatprep.subr.bf16.mxu0 %v7271_v32  ;;  %3256 = vmatprep.subr.bf16.mxu1 %v7272_v62 }
 0x74a   :  { %3216 = vmatpush1.bf16.msra.mxu0 %v7273_v51  ;;  %3257 = vmatpush1.bf16.msra.mxu1 %v7274_v16 }
 0x74b   :  { %3217 = vmatprep.subr.bf16.mxu0 %v7275_v4  ;;  %3258 = vmatprep.subr.bf16.mxu1 %v7276_v60 }
 0x74e   :  { %3218 = vmatpush1.bf16.msra.mxu0 %v7277_v11  ;;  %3259 = vmatpush1.bf16.msra.mxu1 %v7278_v61 }
 0x74f   :  { %3219 = vmatprep.subr.bf16.mxu0 %v7279_v10  ;;  %3260 = vmatprep.subr.bf16.mxu1 %v7280_v48 }
 0x752   :  { %3220 = vmatpush1.bf16.msra.mxu0 %v7365_v6  ;;  %3261 = vmatpush1.bf16.msra.mxu1 %v7366_v24 }
 0x753   :  { %3221 = vmatprep.subr.bf16.mxu0 %v7367_v38  ;;  %3262 = vmatprep.subr.bf16.mxu1 %v7368_v59 }
 0x756   :  { %3222 = vmatpush1.bf16.msra.mxu0 %v7369_v46  ;;  %3263 = vmatpush1.bf16.msra.mxu1 %v7370_v42 }
 0x757   :  { %3223 = vmatprep.subr.bf16.mxu0 %v7371_v30  ;;  %3264 = vmatprep.subr.bf16.mxu1 %v7372_v26 }
 0x75a   :  { %3224 = vmatpush1.bf16.msra.mxu0 %v7373_v34  ;;  %3265 = vmatpush1.bf16.msra.mxu1 %v7374_v47 }
 0x75b   :  { %3225 = vmatprep.subr.bf16.mxu0 %v7375_v19  ;;  %3266 = vmatprep.subr.bf16.mxu1 %v7376_v21 }
 0x75e   :  { %3226 = vmatpush1.bf16.msra.mxu0 %v7461_v18  ;;  %3267 = vmatpush1.bf16.msra.mxu1 %v7462_v1 }
 0x75f   :  { %3227 = vmatprep.subr.bf16.mxu0 %v7379_v53  ;;  %3268 = vmatprep.subr.bf16.mxu1 %v7380_v41 }
 0x762   :  { %3228 = vmatpush1.bf16.msra.mxu0 %v7381_v43  ;;  %3269 = vmatpush1.bf16.msra.mxu1 %v7463_v25 }
 0x763   :  { %3229 = vmatprep.subr.bf16.mxu0 %v7383_v31  ;;  %3270 = vmatprep.subr.bf16.mxu1 %v7384_v54 }
 0x766   :  { %3230 = vmatpush1.bf16.msra.mxu0 %v7385_v57  ;;  %3271 = vmatpush1.bf16.msra.mxu1 %v7386_v44 }
 0x767   :  { %3231 = vmatprep.subr.bf16.mxu0 %v7387_v37  ;;  %3272 = vmatprep.subr.bf16.mxu1 %v7388_v27 }
 0x76a   :  { %3232 = vmatpush1.bf16.msra.mxu0 %v7389_v50  ;;  %3273 = vmatpush1.bf16.msra.mxu1 %v7306_v49 }
 0x76b   :  { %3233 = vmatprep.subr.bf16.mxu0 %v7653_v56  ;;  %3274 = vmatprep.subr.bf16.mxu1 %v7654_v23 }
 0x76e   :  { %3234 = vmatpush1.bf16.msra.mxu0 %v7655_v9  ;;  %3275 = vmatpush1.bf16.msra.mxu1 %v7656_v63 }
 0x76f   :  { %3235 = vmatprep.subr.bf16.mxu0 %v7657_v55  ;;  %3276 = vmatprep.subr.bf16.mxu1 %v7658_v2 }
 0x772   :  { %3236 = vmatpush1.bf16.msra.mxu0 %v7659_v12  ;;  %3277 = vmatpush1.bf16.msra.mxu1 %v7660_v20 }
 0x773   :  { %3237 = vmatprep.subr.bf16.mxu0 %v7661_v14  ;;  %3278 = vmatprep.subr.bf16.mxu1 %v7662_v22 }
 0x776   :  { %3238 = vmatpush1.bf16.msra.mxu0 %v7663_v39  ;;  %3279 = vmatpush1.bf16.msra.mxu1 %v7664_v3  ;;  %v7745_v39 = vld [vmem:[#allocation152_spill] sm:$0xff] }
 0x777   :  { %3239 = vmatprep.subr.bf16.mxu0 %v7665_v45  ;;  %3280 = vmatprep.subr.bf16.mxu1 %v7666_v35  ;;  %v7676_v45 = vld [vmem:[#allocation147_spill] sm:$0xff]  ;;  %v7677_v35 = vld [vmem:[#allocation20_spill] sm:$0xff] }
 0x77a   :  { %3240 = vmatpush1.bf16.msra.mxu0 %v7667_v52  ;;  %3281 = vmatpush1.bf16.msra.mxu1 %v7668_v36  ;;  %v7678_v52 = vld [vmem:[#allocation21_spill] sm:$0xff]  ;;  %v7744_v36 = vld [vmem:[#allocation158_spill] sm:$0xff] }
 0x77b   :  { %3241 = vmatprep.subr.bf16.mxu0 %v7669_v58  ;;  %3282 = vmatprep.subr.bf16.mxu1 %v7670_v28  ;;  %v7679_v28 = vld [vmem:[#allocation22_spill] sm:$0xff]  ;;  %v7688_v58 = vld [vmem:[#allocation31_spill] sm:$0xff] }
 0x77e   :  { %3242 = vmatpush1.bf16.msra.mxu0 %v7671_v29  ;;  %3283 = vmatpush1.bf16.msra.mxu1 %v7672_v40  ;;  %v7680_v29 = vld [vmem:[#allocation23_spill] sm:$0xff]  ;;  %v7681_v40 = vld [vmem:[#allocation24_spill] sm:$0xff] }
 0x77f   :  { %3243 = vmatprep.subr.bf16.mxu0 %v7673_v17  ;;  %3284 = vmatprep.subr.bf16.mxu1 %v7674_v33  ;;  %v7682_v17 = vld [vmem:[#allocation25_spill] sm:$0xff]  ;;  %v7683_v33 = vld [vmem:[#allocation26_spill] sm:$0xff] }
 0x782   :  { %3244 = vmatpush1.bf16.msra.mxu0 %v7675_v8  ;;  %3285 = vmatpush1.bf16.msra.mxu1 %v7676_v45  ;;  %v7684_v8 = vld [vmem:[#allocation27_spill] sm:$0xff]  ;;  %v7685_v45 = vld [vmem:[#allocation28_spill] sm:$0xff] }
 0x783   :  { %3353 = vmatprep.subr.bf16.mxu0 %v7677_v35  ;;  %3394 = vmatprep.subr.bf16.mxu1 %v7678_v52  ;;  %v7686_v35 = vld [vmem:[#allocation29_spill] sm:$0xff]  ;;  %v7687_v52 = vld [vmem:[#allocation30_spill] sm:$0xff] }
 0x785   :  { %3246 = vmatmul.mubr.bf16.vlgmr.msra.gmra.mrb[76].mxu0 %v6376_v13  ;;  %3287 = vmatmul.mubr.bf16.vlgmr.msra.gmra.mrb[76].mxu1 %v6376_v13  ;;  %v7689_v13 = vld [vmem:[#allocation32_spill] sm:$0xff] }
 0x786   :  { %3354 = vmatpush1.bf16.msra.mxu0 %v7679_v28  ;;  %3395 = vmatpush1.bf16.msra.mxu1 %v7680_v29  ;;  %v7690_v28 = vld [vmem:[#allocation33_spill] sm:$0xff]  ;;  %v7691_v29 = vld [vmem:[#allocation34_spill] sm:$0xff] }
 0x787   :  { %3355 = vmatprep.subr.bf16.mxu0 %v7681_v40  ;;  %3396 = vmatprep.subr.bf16.mxu1 %v7682_v17  ;;  %v7692_v40 = vld [vmem:[#allocation35_spill] sm:$0xff]  ;;  %v7693_v17 = vld [vmem:[#allocation36_spill] sm:$0xff] }
 0x78a   :  { %3356 = vmatpush1.bf16.msra.mxu0 %v7683_v33  ;;  %3397 = vmatpush1.bf16.msra.mxu1 %v7684_v8  ;;  %v7694_v33 = vld [vmem:[#allocation37_spill] sm:$0xff]  ;;  %v7695_v8 = vld [vmem:[#allocation38_spill] sm:$0xff] }
 0x78b   :  { %3357 = vmatprep.subr.bf16.mxu0 %v7685_v45  ;;  %3398 = vmatprep.subr.bf16.mxu1 %v7686_v35  ;;  %v7696_v45 = vld [vmem:[#allocation39_spill] sm:$0xff]  ;;  %v7697_v35 = vld [vmem:[#allocation40_spill] sm:$0xff] }
 0x78e   :  { %3358 = vmatpush1.bf16.msra.mxu0 %v7687_v52  ;;  %3399 = vmatpush1.bf16.msra.mxu1 %v7688_v58  ;;  %v7698_v52 = vld [vmem:[#allocation41_spill] sm:$0xff]  ;;  %v7699_v58 = vld [vmem:[#allocation42_spill] sm:$0xff] }
 0x78f   :  { %3359 = vmatprep.subr.bf16.mxu0 %v7689_v13  ;;  %3400 = vmatprep.subr.bf16.mxu1 %v7690_v28  ;;  %v7700_v13 = vld [vmem:[#allocation43_spill] sm:$0xff]  ;;  %v7701_v28 = vld [vmem:[#allocation44_spill] sm:$0xff] }
 0x792   :  { %3360 = vmatpush1.bf16.msra.mxu0 %v7691_v29  ;;  %3401 = vmatpush1.bf16.msra.mxu1 %v7692_v40  ;;  %v7702_v29 = vld [vmem:[#allocation45_spill] sm:$0xff]  ;;  %v7703_v40 = vld [vmem:[#allocation46_spill] sm:$0xff] }
 0x793   :  { %3361 = vmatprep.subr.bf16.mxu0 %v7693_v17  ;;  %3402 = vmatprep.subr.bf16.mxu1 %v7694_v33  ;;  %v7704_v17 = vld [vmem:[#allocation47_spill] sm:$0xff]  ;;  %v7705_v33 = vld [vmem:[#allocation48_spill] sm:$0xff] }
 0x796   :  { %3362 = vmatpush1.bf16.msra.mxu0 %v7695_v8  ;;  %3403 = vmatpush1.bf16.msra.mxu1 %v7696_v45  ;;  %v7706_v8 = vld [vmem:[#allocation49_spill] sm:$0xff]  ;;  %v7707_v45 = vld [vmem:[#allocation50_spill] sm:$0xff] }
 0x797   :  { %3363 = vmatprep.subr.bf16.mxu0 %v7697_v35  ;;  %3404 = vmatprep.subr.bf16.mxu1 %v7698_v52  ;;  %v7708_v35 = vld [vmem:[#allocation51_spill] sm:$0xff]  ;;  %v7709_v52 = vld [vmem:[#allocation52_spill] sm:$0xff] }
 0x79a   :  { %3364 = vmatpush1.bf16.msra.mxu0 %v7699_v58  ;;  %3405 = vmatpush1.bf16.msra.mxu1 %v7700_v13  ;;  %v7710_v58 = vld [vmem:[#allocation53_spill] sm:$0xff]  ;;  %v7711_v13 = vld [vmem:[#allocation54_spill] sm:$0xff] }
 0x79b   :  { %3365 = vmatprep.subr.bf16.mxu0 %v7701_v28  ;;  %3406 = vmatprep.subr.bf16.mxu1 %v7702_v29  ;;  %v7712_v28 = vld [vmem:[#allocation55_spill] sm:$0xff]  ;;  %v7713_v29 = vld [vmem:[#allocation56_spill] sm:$0xff] }
 0x79e   :  { %3366 = vmatpush1.bf16.msra.mxu0 %v7703_v40  ;;  %3407 = vmatpush1.bf16.msra.mxu1 %v7704_v17  ;;  %v7714_v40 = vld [vmem:[#allocation57_spill] sm:$0xff]  ;;  %v7715_v17 = vld [vmem:[#allocation58_spill] sm:$0xff] }
 0x79f   :  { %3367 = vmatprep.subr.bf16.mxu0 %v7705_v33  ;;  %3408 = vmatprep.subr.bf16.mxu1 %v7706_v8  ;;  %v7716_v33 = vld [vmem:[#allocation59_spill] sm:$0xff]  ;;  %v7717_v8 = vld [vmem:[#allocation60_spill] sm:$0xff] }
 0x7a2   :  { %3368 = vmatpush1.bf16.msra.mxu0 %v7707_v45  ;;  %3409 = vmatpush1.bf16.msra.mxu1 %v7708_v35  ;;  %v7718_v45 = vld [vmem:[#allocation61_spill] sm:$0xff]  ;;  %v7719_v35 = vld [vmem:[#allocation62_spill] sm:$0xff] }
 0x7a3   :  { %3369 = vmatprep.subr.bf16.mxu0 %v7709_v52  ;;  %3410 = vmatprep.subr.bf16.mxu1 %v7710_v58  ;;  %v7720_v52 = vld [vmem:[#allocation63_spill] sm:$0xff]  ;;  %v7721_v58 = vld [vmem:[#allocation64_spill] sm:$0xff] }
 0x7a6   :  { %3370 = vmatpush1.bf16.msra.mxu0 %v7711_v13  ;;  %3411 = vmatpush1.bf16.msra.mxu1 %v7712_v28  ;;  %v7722_v13 = vld [vmem:[#allocation65_spill] sm:$0xff]  ;;  %v7723_v28 = vld [vmem:[#allocation66_spill] sm:$0xff] }
 0x7a7   :  { %3371 = vmatprep.subr.bf16.mxu0 %v7713_v29  ;;  %3412 = vmatprep.subr.bf16.mxu1 %v7714_v40  ;;  %v7724_v29 = vld [vmem:[#allocation67_spill] sm:$0xff]  ;;  %v7725_v40 = vld [vmem:[#allocation68_spill] sm:$0xff] }
 0x7aa   :  { %3372 = vmatpush1.bf16.msra.mxu0 %v7715_v17  ;;  %3413 = vmatpush1.bf16.msra.mxu1 %v7716_v33  ;;  %v7726_v17 = vld [vmem:[#allocation69_spill] sm:$0xff]  ;;  %v7727_v33 = vld [vmem:[#allocation70_spill] sm:$0xff] }
 0x7ab   :  { %3373 = vmatprep.subr.bf16.mxu0 %v7717_v8  ;;  %3414 = vmatprep.subr.bf16.mxu1 %v7718_v45  ;;  %v7728_v8 = vld [vmem:[#allocation71_spill] sm:$0xff]  ;;  %v7729_v45 = vld [vmem:[#allocation72_spill] sm:$0xff] }
 0x7ae   :  { %3374 = vmatpush1.bf16.msra.mxu0 %v7719_v35  ;;  %3415 = vmatpush1.bf16.msra.mxu1 %v7720_v52  ;;  %v7730_v35 = vld [vmem:[#allocation73_spill] sm:$0xff]  ;;  %v7731_v52 = vld [vmem:[#allocation74_spill] sm:$0xff] }
 0x7af   :  { %3375 = vmatprep.subr.bf16.mxu0 %v7721_v58  ;;  %3416 = vmatprep.subr.bf16.mxu1 %v7722_v13  ;;  %v7732_v58 = vld [vmem:[#allocation75_spill] sm:$0xff]  ;;  %v7733_v13 = vld [vmem:[#allocation76_spill] sm:$0xff] }
 0x7b2   :  { %3376 = vmatpush1.bf16.msra.mxu0 %v7723_v28  ;;  %3417 = vmatpush1.bf16.msra.mxu1 %v7724_v29  ;;  %v7734_v28 = vld [vmem:[#allocation77_spill] sm:$0xff]  ;;  %v7735_v29 = vld [vmem:[#allocation78_spill] sm:$0xff] }
 0x7b3   :  { %3377 = vmatprep.subr.bf16.mxu0 %v7725_v40  ;;  %3418 = vmatprep.subr.bf16.mxu1 %v7726_v17  ;;  %v7736_v40 = vld [vmem:[#allocation79_spill] sm:$0xff]  ;;  %v7737_v17 = vld [vmem:[#allocation80_spill] sm:$0xff] }
 0x7b6   :  { %3378 = vmatpush1.bf16.msra.mxu0 %v7727_v33  ;;  %3419 = vmatpush1.bf16.msra.mxu1 %v7728_v8  ;;  %v7738_v33 = vld [vmem:[#allocation81_spill] sm:$0xff]  ;;  %v7739_v8 = vld [vmem:[#allocation82_spill] sm:$0xff] }
 0x7b7   :  { %3379 = vmatprep.subr.bf16.mxu0 %v7729_v45  ;;  %3420 = vmatprep.subr.bf16.mxu1 %v7730_v35  ;;  %v7740_v45 = vld [vmem:[#allocation83_spill] sm:$0xff]  ;;  %v7741_v35 = vld [vmem:[#allocation84_spill] sm:$0xff] }
 0x7ba   :  { %3380 = vmatpush1.bf16.msra.mxu0 %v7731_v52  ;;  %3421 = vmatpush1.bf16.msra.mxu1 %v7732_v58  ;;  %v7742_v52 = vld [vmem:[#allocation85_spill] sm:$0xff] }
 0x7bb   :  { %3381 = vmatprep.subr.bf16.mxu0 %v7733_v13  ;;  %3422 = vmatprep.subr.bf16.mxu1 %v7734_v28  ;;  %v7743_v58 = vld [vmem:[#allocation157_spill] sm:$0xff]  ;;  %v2431_v28 = vunpack.c.l.bf16 %v7744_v36 }
 0x7bc   :  { %v2429_v13 = vunpack.c.l.bf16 %v7743_v58 }
 0x7be   :  { %3382 = vmatpush1.bf16.msra.mxu0 %v7735_v29  ;;  %3423 = vmatpush1.bf16.msra.mxu1 %v7736_v40  ;;  %v2430_v40 = vunpack.c.h.bf16 %v7743_v58 }
 0x7bf   :  { %3383 = vmatprep.subr.bf16.mxu0 %v7737_v17  ;;  %3424 = vmatprep.subr.bf16.mxu1 %v7738_v33  ;;  %v2419_v17 = vunpack.c.h.bf16 %v7745_v39 }
 0x7c2   :  { %3384 = vmatpush1.bf16.msra.mxu0 %v7739_v8  ;;  %3425 = vmatpush1.bf16.msra.mxu1 %v7740_v45 }
 0x7c3   :  { %3435 = vmatprep.subr.bf16.mxu0 %v7741_v35  ;;  %3476 = vmatprep.subr.bf16.mxu1 %v7742_v52 }
 0x818   :  { %v3165_v3 = vpop.f32.mrb[72].mxu0  ;;  %v3206_v29 = vpop.f32.mrb[72].mxu1 }
 0x819   :  { %v3295_v22 = vadd.f32 %v3165_v3, %v2429_v13  ;;  %v3297_v33 = vadd.f32 %v3206_v29, %v2431_v28  ;;  %v3167_v14 = vpop.f32.mrb[73].mxu0  ;;  %v3208_v8 = vpop.f32.mrb[73].mxu1  ;;  %v7746_v29 = vld [vmem:[#allocation167_spill] sm:$0xff] }
 0x81a   :  { %v3296_v20 = vadd.f32 %v3167_v14, %v2430_v40  ;;  %v3298_v45 = vadd.f32 %v3208_v8, %v2419_v17  ;;  %v3169_v12 = vpop.f32.mrb[74].mxu0  ;;  %v3210_v35 = vpop.f32.mrb[74].mxu1  ;;  %v2420_v13 = vunpack.c.l.bf16 %v7746_v29  ;;  %v7747_v14 = vld [vmem:[#allocation174_spill] sm:$0xff] }
 0x81b   :  { %v3170_v2 = vpop.f32.mrb[75].mxu0  ;;  %v3211_v52 = vpop.f32.mrb[75].mxu1  ;;  %v4368_v55 = vmul.f32 -1.442695, %v3295_v22  ;;  %v2435_v40 = vunpack.c.l.bf16 %v7747_v14  ;;  %v2421_v22 = vunpack.c.h.bf16 %v7746_v29  ;;  %v4370_v29 = vmul.f32 -1.442695, %v3297_v33 }
 0x81c   :  { %v4369_v63 = vmul.f32 -1.442695, %v3296_v20  ;;  %v4371_v9 = vmul.f32 -1.442695, %v3298_v45  ;;  %v7748_v20 = vld [vmem:[#allocation168_spill] sm:$0xff] }
 0x81d   :  { %4699 = vpow2.f32 %v4368_v55  ;;  %v2423_v45 = vunpack.c.h.bf16 %v7748_v20 }
 0x81e   :  { %4701 = vpow2.f32 %v4369_v63 }
 0x81f   :  { %4703 = vpow2.f32 %v4371_v9 }
 0x827   :  { %v4700_v36 = vpop.eup %4699 }
 0x828   :  { %v4702_v58 = vpop.eup %4701  ;;  %v3319_v39 = vadd.f32 1.0, %v4700_v36 }
 0x829   :  { %v4704_v23 = vpop.eup %4703  ;;  %v3320_v3 = vadd.f32 1.0, %v4702_v58 }
 0x82a   :  { %v3322_v28 = vadd.f32 1.0, %v4704_v23  ;;  %4705 = vrcp.f32 %v3319_v39 }
 0x82b   :  { %4707 = vrcp.f32 %v3320_v3 }
 0x82c   :  { %4709 = vrcp.f32 %v3322_v28 }
 0x834   :  { %v4706_v14 = vpop.eup %4705 }
 0x835   :  { %v4708_v56 = vpop.eup %4707 }
 0x836   :  { %v4710_v3 = vpop.eup %4709  ;;  %v3341_v28 = vmul.f32 %v4708_v56, %v6369_v0 }
 0x858   :  { %v3247_v12 = vpop.f32.mrb[76].mxu0  ;;  %v3288_v2 = vpop.f32.mrb[76].mxu1 }
 0x859   :  { %v3299_v63 = vadd.f32 %v3247_v12, %v2420_v13  ;;  %v3337_v9 = vadd.f32 %v3288_v2, %v2435_v40  ;;  %v3249_v55 = vpop.f32.mrb[77].mxu0  ;;  %v3290_v35 = vpop.f32.mrb[77].mxu1 }
 0x85a   :  { %v3300_v52 = vadd.f32 %v3249_v55, %v2421_v22  ;;  %v3338_v17 = vadd.f32 %v3290_v35, %v2423_v45  ;;  %v3251_v23 = vpop.f32.mrb[78].mxu0  ;;  %v3292_v8 = vpop.f32.mrb[78].mxu1 }
 0x85b   :  { %v4372_v36 = vmul.f32 -1.442695, %v3299_v63  ;;  %4711 = vtanh.f32 %v3337_v9  ;;  %v3252_v58 = vpop.f32.mrb[79].mxu0  ;;  %v3293_v39 = vpop.f32.mrb[79].mxu1 }
 0x85c   :  { %4713 = vtanh.f32 %v3338_v17  ;;  %v4373_v20 = vmul.f32 -1.442695, %v3300_v52 }
 0x85d   :  { %4715 = vpow2.f32 %v4372_v36 }
 0x85e   :  { %4717 = vpow2.f32 %v4370_v29 }
 0x85f   :  { %4719 = vpow2.f32 %v4373_v20  ;;  %v7750_v20 = vld [vmem:[#allocation125_spill] sm:$0xff] }
 0x865   :  { %v4712_v13 = vpop.eup %4711 }
 0x866   :  { %v4714_v40 = vpop.eup %4713  ;;  %v3342_v12 = vmul.f32 %v4712_v13, %v4706_v14  ;;  %v7752_v13 = vld [vmem:[#allocation127_spill] sm:$0xff] }
 0x867   :  { %v4716_v2 = vpop.eup %4715  ;;  %v3345_v22 = vmul.f32 %v4714_v40, %v4710_v3  ;;  %v7751_v3 = vld [vmem:[#allocation126_spill] sm:$0xff]  ;;  %v7753_v40 = vld [vmem:[#allocation128_spill] sm:$0xff] }
 0x868   :  { %v3323_v45 = vadd.f32 1.0, %v4716_v2  ;;  %v6519_v63 = vadd.f32 %v3342_v12, %v3341_v28  ;;  %v4718_v9 = vpop.eup %4717  ;;  %v7754_v28 = vld [vmem:[#allocation129_spill] sm:$0xff]  ;;  %v7755_v12 = vld [vmem:[#allocation130_spill] sm:$0xff]  ;;  %v7756_v2 = vld [vmem:[#allocation131_spill] sm:$0xff] }
 0x869   :  { %v4720_v55 = vpop.eup %4719  ;;  %v3321_v35 = vadd.f32 1.0, %v4718_v9  ;;  %v7759_v9 = vld [vmem:[#allocation134_spill] sm:$0xff] }
 0x86a   :  { %4721 = vrcp.f32 %v3323_v45  ;;  %v3324_v17 = vadd.f32 1.0, %v4720_v55  ;;  %v7758_v45 = vld [vmem:[#allocation133_spill] sm:$0xff]  ;;  %v7760_v55 = vld [vmem:[#allocation135_spill] sm:$0xff] }
 0x86b   :  { %4723 = vtanh.f32 %v6519_v63 }
 0x86c   :  { %4725 = vrcp.f32 %v3321_v35  ;;  %v7761_v35 = vld [vmem:[#allocation136_spill] sm:$0xff] }
 0x86d   :  { %4727 = vrcp.f32 %v3324_v17  ;;  %v7763_v17 = vld [vmem:[#allocation138_spill] sm:$0xff] }
 0x874   :  { %v4722_v33 = vpop.eup %4721 }
 0x875   :  { %v3344_v52 = vmul.f32 %v4722_v33, %v6373_v7  ;;  %v4724_v0 = vpop.eup %4723  ;;  %v7749_v7 = vld [vmem:[#allocation124_spill] sm:$0xff]  ;;  %v7762_v33 = vld [vmem:[#allocation137_spill] sm:$0xff] }
 0x876   :  { %v4726_v56 = vpop.eup %4725 }
 0x877   :  { %v6523_v23 = vadd.f32 %v3345_v22, %v3344_v52  ;;  %v4728_v8 = vpop.eup %4727  ;;  %v3348_v58 = vmul.f32 %v4726_v56, %v4724_v0  ;;  %v7757_v22 = vld [vmem:[#allocation132_spill] sm:$0xff]  ;;  %v7764_v52 = vld [vmem:[#allocation139_spill] sm:$0xff]  ;;  %v7766_v56 = vld [vmem:[#allocation141_spill] sm:$0xff] }
 0x878   :  { %v7765_v0 = vld [vmem:[#allocation140_spill] sm:$0xff] }
 0x879   :  { %4729 = vtanh.f32 %v6523_v23  ;;  %v6526_v29 = vpack.c.bf16 %v3348_v58, %v3348_v58  ;;  %v7769_v58 = vld [vmem:[#allocation144_spill] sm:$0xff] }
 0x883   :  { %v4730_v36 = vpop.eup %4729 }
 0x884   :  { %v3350_v39 = vmul.f32 %v4730_v36, %v4728_v8  ;;  %v7767_v8 = vld [vmem:[#allocation142_spill] sm:$0xff]  ;;  %v7768_v36 = vld [vmem:[#allocation143_spill] sm:$0xff] }
 0x886   :  { %v3352_v14 = vpack.c.bf16 %v3350_v39, %v3350_v39  ;;  %v7770_v39 = vld [vmem:[#allocation145_spill] sm:$0xff] }
 0x888   :  { %3385 = vmatprep.mubr.bf16.mxu0 %v3352_v14  ;;  %3426 = vmatprep.mubr.bf16.mxu1 %v3352_v14 }
 0x889   :  { %3386 = vmatmul.mubr.bf16.vlgmr.msra.gmra.mrb[80].mxu0 %v6526_v29  ;;  %3427 = vmatmul.mubr.bf16.vlgmr.msra.gmra.mrb[80].mxu1 %v6526_v29 }
 0x88a   :  { %3436 = vmatpush1.bf16.msra.mxu0 %v7269_v5  ;;  %3477 = vmatpush1.bf16.msra.mxu1 %v7270_v15 }
 0x88b   :  { %3467 = vmatprep.mubr.bf16.mxu0 %v3352_v14  ;;  %3508 = vmatprep.mubr.bf16.mxu1 %v3352_v14  ;;  %v7771_v14 = vld [vmem:[#allocation146_spill] sm:$0xff] }
 0x88c   :  { %3437 = vmatprep.subr.bf16.mxu0 %v7271_v32  ;;  %3478 = vmatprep.subr.bf16.mxu1 %v7272_v62 }
 0x88e   :  { %3438 = vmatpush1.bf16.msra.mxu0 %v7273_v51  ;;  %3479 = vmatpush1.bf16.msra.mxu1 %v7274_v16 }
 0x88f   :  { %3439 = vmatprep.subr.bf16.mxu0 %v7275_v4  ;;  %3480 = vmatprep.subr.bf16.mxu1 %v7276_v60 }
 0x892   :  { %3440 = vmatpush1.bf16.msra.mxu0 %v7277_v11  ;;  %3481 = vmatpush1.bf16.msra.mxu1 %v7278_v61 }
 0x893   :  { %3441 = vmatprep.subr.bf16.mxu0 %v7279_v10  ;;  %3482 = vmatprep.subr.bf16.mxu1 %v7280_v48 }
 0x896   :  { %3442 = vmatpush1.bf16.msra.mxu0 %v7365_v6  ;;  %3483 = vmatpush1.bf16.msra.mxu1 %v7366_v24 }
 0x897   :  { %3443 = vmatprep.subr.bf16.mxu0 %v7367_v38  ;;  %3484 = vmatprep.subr.bf16.mxu1 %v7368_v59 }
 0x89a   :  { %3444 = vmatpush1.bf16.msra.mxu0 %v7369_v46  ;;  %3485 = vmatpush1.bf16.msra.mxu1 %v7370_v42 }
 0x89b   :  { %3445 = vmatprep.subr.bf16.mxu0 %v7371_v30  ;;  %3486 = vmatprep.subr.bf16.mxu1 %v7372_v26 }
 0x89e   :  { %3446 = vmatpush1.bf16.msra.mxu0 %v7373_v34  ;;  %3487 = vmatpush1.bf16.msra.mxu1 %v7374_v47 }
 0x89f   :  { %3447 = vmatprep.subr.bf16.mxu0 %v7375_v19  ;;  %3488 = vmatprep.subr.bf16.mxu1 %v7376_v21 }
 0x8a2   :  { %3448 = vmatpush1.bf16.msra.mxu0 %v7461_v18  ;;  %3489 = vmatpush1.bf16.msra.mxu1 %v7462_v1 }
 0x8a3   :  { %3449 = vmatprep.subr.bf16.mxu0 %v7379_v53  ;;  %3490 = vmatprep.subr.bf16.mxu1 %v7380_v41 }
 0x8a6   :  { %3450 = vmatpush1.bf16.msra.mxu0 %v7381_v43  ;;  %3491 = vmatpush1.bf16.msra.mxu1 %v7463_v25 }
 0x8a7   :  { %3451 = vmatprep.subr.bf16.mxu0 %v7383_v31  ;;  %3492 = vmatprep.subr.bf16.mxu1 %v7384_v54 }
 0x8aa   :  { %3452 = vmatpush1.bf16.msra.mxu0 %v7385_v57  ;;  %3493 = vmatpush1.bf16.msra.mxu1 %v7386_v44 }
 0x8ab   :  { %3453 = vmatprep.subr.bf16.mxu0 %v7387_v37  ;;  %3494 = vmatprep.subr.bf16.mxu1 %v7388_v27 }
 0x8ae   :  { %3454 = vmatpush1.bf16.msra.mxu0 %v7389_v50  ;;  %3495 = vmatpush1.bf16.msra.mxu1 %v7306_v49 }
 0x8af   :  { %3455 = vmatprep.subr.bf16.mxu0 %v7749_v7  ;;  %3496 = vmatprep.subr.bf16.mxu1 %v7750_v20 }
 0x8b2   :  { %3456 = vmatpush1.bf16.msra.mxu0 %v7751_v3  ;;  %3497 = vmatpush1.bf16.msra.mxu1 %v7752_v13 }
 0x8b3   :  { %3457 = vmatprep.subr.bf16.mxu0 %v7753_v40  ;;  %3498 = vmatprep.subr.bf16.mxu1 %v7754_v28 }
 0x8b6   :  { %3458 = vmatpush1.bf16.msra.mxu0 %v7755_v12  ;;  %3499 = vmatpush1.bf16.msra.mxu1 %v7756_v2 }
 0x8b7   :  { %3459 = vmatprep.subr.bf16.mxu0 %v7757_v22  ;;  %3500 = vmatprep.subr.bf16.mxu1 %v7758_v45 }
 0x8ba   :  { %3460 = vmatpush1.bf16.msra.mxu0 %v7759_v9  ;;  %3501 = vmatpush1.bf16.msra.mxu1 %v7760_v55  ;;  %v7841_v9 = vld [vmem:[#allocation150_spill] sm:$0xff] }
 0x8bb   :  { %3461 = vmatprep.subr.bf16.mxu0 %v7761_v35  ;;  %3502 = vmatprep.subr.bf16.mxu1 %v7762_v33  ;;  %v7772_v35 = vld [vmem:[#allocation147_spill] sm:$0xff]  ;;  %v7773_v33 = vld [vmem:[#allocation20_spill] sm:$0xff] }
 0x8be   :  { %3462 = vmatpush1.bf16.msra.mxu0 %v7763_v17  ;;  %3503 = vmatpush1.bf16.msra.mxu1 %v7764_v52  ;;  %v7774_v17 = vld [vmem:[#allocation21_spill] sm:$0xff]  ;;  %v7840_v52 = vld [vmem:[#allocation160_spill] sm:$0xff] }
 0x8bf   :  { %3463 = vmatprep.subr.bf16.mxu0 %v7765_v0  ;;  %3504 = vmatprep.subr.bf16.mxu1 %v7766_v56  ;;  %v7775_v56 = vld [vmem:[#allocation22_spill] sm:$0xff]  ;;  %v7784_v0 = vld [vmem:[#allocation31_spill] sm:$0xff] }
 0x8c2   :  { %3464 = vmatpush1.bf16.msra.mxu0 %v7767_v8  ;;  %3505 = vmatpush1.bf16.msra.mxu1 %v7768_v36  ;;  %v7776_v8 = vld [vmem:[#allocation23_spill] sm:$0xff]  ;;  %v7777_v36 = vld [vmem:[#allocation24_spill] sm:$0xff] }
 0x8c3   :  { %3465 = vmatprep.subr.bf16.mxu0 %v7769_v58  ;;  %3506 = vmatprep.subr.bf16.mxu1 %v7770_v39  ;;  %v7778_v58 = vld [vmem:[#allocation25_spill] sm:$0xff]  ;;  %v7779_v39 = vld [vmem:[#allocation26_spill] sm:$0xff] }
 0x8c6   :  { %3466 = vmatpush1.bf16.msra.mxu0 %v7771_v14  ;;  %3507 = vmatpush1.bf16.msra.mxu1 %v7772_v35  ;;  %v7780_v14 = vld [vmem:[#allocation27_spill] sm:$0xff]  ;;  %v7781_v35 = vld [vmem:[#allocation28_spill] sm:$0xff] }
 0x8c7   :  { %3575 = vmatprep.subr.bf16.mxu0 %v7773_v33  ;;  %3616 = vmatprep.subr.bf16.mxu1 %v7774_v17  ;;  %v7782_v33 = vld [vmem:[#allocation29_spill] sm:$0xff]  ;;  %v7783_v17 = vld [vmem:[#allocation30_spill] sm:$0xff] }
 0x8c9   :  { %3468 = vmatmul.mubr.bf16.vlgmr.msra.gmra.mrb[84].mxu0 %v6526_v29  ;;  %3509 = vmatmul.mubr.bf16.vlgmr.msra.gmra.mrb[84].mxu1 %v6526_v29  ;;  %v7785_v29 = vld [vmem:[#allocation32_spill] sm:$0xff] }
 0x8ca   :  { %3576 = vmatpush1.bf16.msra.mxu0 %v7775_v56  ;;  %3617 = vmatpush1.bf16.msra.mxu1 %v7776_v8  ;;  %v7786_v56 = vld [vmem:[#allocation33_spill] sm:$0xff]  ;;  %v7787_v8 = vld [vmem:[#allocation34_spill] sm:$0xff] }
 0x8cb   :  { %3577 = vmatprep.subr.bf16.mxu0 %v7777_v36  ;;  %3618 = vmatprep.subr.bf16.mxu1 %v7778_v58  ;;  %v7788_v36 = vld [vmem:[#allocation35_spill] sm:$0xff]  ;;  %v7789_v58 = vld [vmem:[#allocation36_spill] sm:$0xff] }
 0x8ce   :  { %3578 = vmatpush1.bf16.msra.mxu0 %v7779_v39  ;;  %3619 = vmatpush1.bf16.msra.mxu1 %v7780_v14  ;;  %v7790_v39 = vld [vmem:[#allocation37_spill] sm:$0xff]  ;;  %v7791_v14 = vld [vmem:[#allocation38_spill] sm:$0xff] }
 0x8cf   :  { %3579 = vmatprep.subr.bf16.mxu0 %v7781_v35  ;;  %3620 = vmatprep.subr.bf16.mxu1 %v7782_v33  ;;  %v7792_v35 = vld [vmem:[#allocation39_spill] sm:$0xff]  ;;  %v7793_v33 = vld [vmem:[#allocation40_spill] sm:$0xff] }
 0x8d2   :  { %3580 = vmatpush1.bf16.msra.mxu0 %v7783_v17  ;;  %3621 = vmatpush1.bf16.msra.mxu1 %v7784_v0  ;;  %v7794_v17 = vld [vmem:[#allocation41_spill] sm:$0xff]  ;;  %v7795_v0 = vld [vmem:[#allocation42_spill] sm:$0xff] }
 0x8d3   :  { %3581 = vmatprep.subr.bf16.mxu0 %v7785_v29  ;;  %3622 = vmatprep.subr.bf16.mxu1 %v7786_v56  ;;  %v7796_v29 = vld [vmem:[#allocation43_spill] sm:$0xff]  ;;  %v7797_v56 = vld [vmem:[#allocation44_spill] sm:$0xff] }
 0x8d6   :  { %3582 = vmatpush1.bf16.msra.mxu0 %v7787_v8  ;;  %3623 = vmatpush1.bf16.msra.mxu1 %v7788_v36  ;;  %v7798_v8 = vld [vmem:[#allocation45_spill] sm:$0xff]  ;;  %v7799_v36 = vld [vmem:[#allocation46_spill] sm:$0xff] }
 0x8d7   :  { %3583 = vmatprep.subr.bf16.mxu0 %v7789_v58  ;;  %3624 = vmatprep.subr.bf16.mxu1 %v7790_v39  ;;  %v7800_v58 = vld [vmem:[#allocation47_spill] sm:$0xff]  ;;  %v7801_v39 = vld [vmem:[#allocation48_spill] sm:$0xff] }
 0x8da   :  { %3584 = vmatpush1.bf16.msra.mxu0 %v7791_v14  ;;  %3625 = vmatpush1.bf16.msra.mxu1 %v7792_v35  ;;  %v7802_v14 = vld [vmem:[#allocation49_spill] sm:$0xff]  ;;  %v7803_v35 = vld [vmem:[#allocation50_spill] sm:$0xff] }
 0x8db   :  { %3585 = vmatprep.subr.bf16.mxu0 %v7793_v33  ;;  %3626 = vmatprep.subr.bf16.mxu1 %v7794_v17  ;;  %v7804_v33 = vld [vmem:[#allocation51_spill] sm:$0xff]  ;;  %v7805_v17 = vld [vmem:[#allocation52_spill] sm:$0xff] }
 0x8de   :  { %3586 = vmatpush1.bf16.msra.mxu0 %v7795_v0  ;;  %3627 = vmatpush1.bf16.msra.mxu1 %v7796_v29  ;;  %v7806_v0 = vld [vmem:[#allocation53_spill] sm:$0xff]  ;;  %v7807_v29 = vld [vmem:[#allocation54_spill] sm:$0xff] }
 0x8df   :  { %3587 = vmatprep.subr.bf16.mxu0 %v7797_v56  ;;  %3628 = vmatprep.subr.bf16.mxu1 %v7798_v8  ;;  %v7808_v56 = vld [vmem:[#allocation55_spill] sm:$0xff]  ;;  %v7809_v8 = vld [vmem:[#allocation56_spill] sm:$0xff] }
 0x8e2   :  { %3588 = vmatpush1.bf16.msra.mxu0 %v7799_v36  ;;  %3629 = vmatpush1.bf16.msra.mxu1 %v7800_v58  ;;  %v7810_v36 = vld [vmem:[#allocation57_spill] sm:$0xff]  ;;  %v7811_v58 = vld [vmem:[#allocation58_spill] sm:$0xff] }
 0x8e3   :  { %3589 = vmatprep.subr.bf16.mxu0 %v7801_v39  ;;  %3630 = vmatprep.subr.bf16.mxu1 %v7802_v14  ;;  %v7812_v39 = vld [vmem:[#allocation59_spill] sm:$0xff]  ;;  %v7813_v14 = vld [vmem:[#allocation60_spill] sm:$0xff] }
 0x8e6   :  { %3590 = vmatpush1.bf16.msra.mxu0 %v7803_v35  ;;  %3631 = vmatpush1.bf16.msra.mxu1 %v7804_v33  ;;  %v7814_v35 = vld [vmem:[#allocation61_spill] sm:$0xff]  ;;  %v7815_v33 = vld [vmem:[#allocation62_spill] sm:$0xff] }
 0x8e7   :  { %3591 = vmatprep.subr.bf16.mxu0 %v7805_v17  ;;  %3632 = vmatprep.subr.bf16.mxu1 %v7806_v0  ;;  %v7816_v17 = vld [vmem:[#allocation63_spill] sm:$0xff]  ;;  %v7817_v0 = vld [vmem:[#allocation64_spill] sm:$0xff] }
 0x8ea   :  { %3592 = vmatpush1.bf16.msra.mxu0 %v7807_v29  ;;  %3633 = vmatpush1.bf16.msra.mxu1 %v7808_v56  ;;  %v7818_v29 = vld [vmem:[#allocation65_spill] sm:$0xff]  ;;  %v7819_v56 = vld [vmem:[#allocation66_spill] sm:$0xff] }
 0x8eb   :  { %3593 = vmatprep.subr.bf16.mxu0 %v7809_v8  ;;  %3634 = vmatprep.subr.bf16.mxu1 %v7810_v36  ;;  %v7820_v8 = vld [vmem:[#allocation67_spill] sm:$0xff]  ;;  %v7821_v36 = vld [vmem:[#allocation68_spill] sm:$0xff] }
 0x8ee   :  { %3594 = vmatpush1.bf16.msra.mxu0 %v7811_v58  ;;  %3635 = vmatpush1.bf16.msra.mxu1 %v7812_v39  ;;  %v7822_v58 = vld [vmem:[#allocation69_spill] sm:$0xff]  ;;  %v7823_v39 = vld [vmem:[#allocation70_spill] sm:$0xff] }
 0x8ef   :  { %3595 = vmatprep.subr.bf16.mxu0 %v7813_v14  ;;  %3636 = vmatprep.subr.bf16.mxu1 %v7814_v35  ;;  %v7824_v14 = vld [vmem:[#allocation71_spill] sm:$0xff]  ;;  %v7825_v35 = vld [vmem:[#allocation72_spill] sm:$0xff] }
 0x8f2   :  { %3596 = vmatpush1.bf16.msra.mxu0 %v7815_v33  ;;  %3637 = vmatpush1.bf16.msra.mxu1 %v7816_v17  ;;  %v7826_v33 = vld [vmem:[#allocation73_spill] sm:$0xff]  ;;  %v7827_v17 = vld [vmem:[#allocation74_spill] sm:$0xff] }
 0x8f3   :  { %3597 = vmatprep.subr.bf16.mxu0 %v7817_v0  ;;  %3638 = vmatprep.subr.bf16.mxu1 %v7818_v29  ;;  %v7828_v0 = vld [vmem:[#allocation75_spill] sm:$0xff]  ;;  %v7829_v29 = vld [vmem:[#allocation76_spill] sm:$0xff] }
 0x8f6   :  { %3598 = vmatpush1.bf16.msra.mxu0 %v7819_v56  ;;  %3639 = vmatpush1.bf16.msra.mxu1 %v7820_v8  ;;  %v7830_v56 = vld [vmem:[#allocation77_spill] sm:$0xff]  ;;  %v7831_v8 = vld [vmem:[#allocation78_spill] sm:$0xff] }
 0x8f7   :  { %3599 = vmatprep.subr.bf16.mxu0 %v7821_v36  ;;  %3640 = vmatprep.subr.bf16.mxu1 %v7822_v58  ;;  %v7832_v36 = vld [vmem:[#allocation79_spill] sm:$0xff]  ;;  %v7833_v58 = vld [vmem:[#allocation80_spill] sm:$0xff] }
 0x8fa   :  { %3600 = vmatpush1.bf16.msra.mxu0 %v7823_v39  ;;  %3641 = vmatpush1.bf16.msra.mxu1 %v7824_v14  ;;  %v7834_v39 = vld [vmem:[#allocation81_spill] sm:$0xff]  ;;  %v7835_v14 = vld [vmem:[#allocation82_spill] sm:$0xff] }
 0x8fb   :  { %3601 = vmatprep.subr.bf16.mxu0 %v7825_v35  ;;  %3642 = vmatprep.subr.bf16.mxu1 %v7826_v33  ;;  %v7836_v35 = vld [vmem:[#allocation83_spill] sm:$0xff]  ;;  %v7837_v33 = vld [vmem:[#allocation84_spill] sm:$0xff] }
 0x8fe   :  { %3602 = vmatpush1.bf16.msra.mxu0 %v7827_v17  ;;  %3643 = vmatpush1.bf16.msra.mxu1 %v7828_v0  ;;  %v7838_v17 = vld [vmem:[#allocation85_spill] sm:$0xff]  ;;  %v7839_v0 = vld [vmem:[#allocation159_spill] sm:$0xff] }
 0x8ff   :  { %3603 = vmatprep.subr.bf16.mxu0 %v7829_v29  ;;  %3644 = vmatprep.subr.bf16.mxu1 %v7830_v56  ;;  %v2181_v29 = vunpack.c.l.bf16 %v7839_v0  ;;  %v2183_v56 = vunpack.c.l.bf16 %v7840_v52 }
 0x902   :  { %3604 = vmatpush1.bf16.msra.mxu0 %v7831_v8  ;;  %3645 = vmatpush1.bf16.msra.mxu1 %v7832_v36  ;;  %v2182_v36 = vunpack.c.h.bf16 %v7839_v0 }
 0x903   :  { %3605 = vmatprep.subr.bf16.mxu0 %v7833_v58  ;;  %3646 = vmatprep.subr.bf16.mxu1 %v7834_v39  ;;  %v2171_v58 = vunpack.c.h.bf16 %v7841_v9 }
 0x906   :  { %3606 = vmatpush1.bf16.msra.mxu0 %v7835_v14  ;;  %3647 = vmatpush1.bf16.msra.mxu1 %v7836_v35 }
 0x907   :  { %3657 = vmatprep.subr.bf16.mxu0 %v7837_v33  ;;  %3698 = vmatprep.subr.bf16.mxu1 %v7838_v17 }
 0x95c   :  { %v3387_v55 = vpop.f32.mrb[80].mxu0  ;;  %v3428_v8 = vpop.f32.mrb[80].mxu1 }
 0x95d   :  { %v3517_v45 = vadd.f32 %v3387_v55, %v2181_v29  ;;  %v3519_v39 = vadd.f32 %v3428_v8, %v2183_v56  ;;  %v3389_v22 = vpop.f32.mrb[81].mxu0  ;;  %v3430_v14 = vpop.f32.mrb[81].mxu1  ;;  %v7842_v56 = vld [vmem:[#allocation165_spill] sm:$0xff] }
 0x95e   :  { %v3518_v2 = vadd.f32 %v3389_v22, %v2182_v36  ;;  %v3520_v35 = vadd.f32 %v3430_v14, %v2171_v58  ;;  %v3391_v12 = vpop.f32.mrb[82].mxu0  ;;  %v3432_v33 = vpop.f32.mrb[82].mxu1  ;;  %v2172_v8 = vunpack.c.l.bf16 %v7842_v56  ;;  %v7843_v22 = vld [vmem:[#allocation175_spill] sm:$0xff] }
 0x95f   :  { %v3392_v28 = vpop.f32.mrb[83].mxu0  ;;  %v3433_v17 = vpop.f32.mrb[83].mxu1  ;;  %v4374_v40 = vmul.f32 -1.442695, %v3517_v45  ;;  %v2187_v36 = vunpack.c.l.bf16 %v7843_v22  ;;  %v2173_v45 = vunpack.c.h.bf16 %v7842_v56  ;;  %v4376_v56 = vmul.f32 -1.442695, %v3519_v39 }
 0x960   :  { %v4375_v13 = vmul.f32 -1.442695, %v3518_v2  ;;  %v4377_v3 = vmul.f32 -1.442695, %v3520_v35  ;;  %v7844_v2 = vld [vmem:[#allocation166_spill] sm:$0xff] }
 0x961   :  { %4731 = vpow2.f32 %v4374_v40  ;;  %v2175_v58 = vunpack.c.h.bf16 %v7844_v2 }
 0x962   :  { %4733 = vpow2.f32 %v4375_v13 }
 0x963   :  { %4735 = vpow2.f32 %v4377_v3 }
 0x96b   :  { %v4732_v52 = vpop.eup %4731 }
 0x96c   :  { %v4734_v0 = vpop.eup %4733  ;;  %v3541_v9 = vadd.f32 1.0, %v4732_v52 }
 0x96d   :  { %v4736_v20 = vpop.eup %4735  ;;  %v3542_v55 = vadd.f32 1.0, %v4734_v0 }
 0x96e   :  { %v3544_v29 = vadd.f32 1.0, %v4736_v20  ;;  %4737 = vrcp.f32 %v3541_v9 }
 0x96f   :  { %4739 = vrcp.f32 %v3542_v55 }
 0x970   :  { %4741 = vrcp.f32 %v3544_v29 }
 0x978   :  { %v4738_v22 = vpop.eup %4737 }
 0x979   :  { %v4740_v7 = vpop.eup %4739 }
 0x97a   :  { %v4742_v55 = vpop.eup %4741  ;;  %v3563_v29 = vmul.f32 %v4740_v7, %v6519_v63 }
 0x99c   :  { %v3469_v12 = vpop.f32.mrb[84].mxu0  ;;  %v3510_v28 = vpop.f32.mrb[84].mxu1 }
 0x99d   :  { %v3521_v13 = vadd.f32 %v3469_v12, %v2172_v8  ;;  %v3559_v3 = vadd.f32 %v3510_v28, %v2187_v36  ;;  %v3471_v40 = vpop.f32.mrb[85].mxu0  ;;  %v3512_v14 = vpop.f32.mrb[85].mxu1 }
 0x99e   :  { %v3522_v35 = vadd.f32 %v3471_v40, %v2173_v45  ;;  %v3560_v33 = vadd.f32 %v3512_v14, %v2175_v58  ;;  %v3473_v20 = vpop.f32.mrb[86].mxu0  ;;  %v3514_v17 = vpop.f32.mrb[86].mxu1 }
 0x99f   :  { %v4378_v52 = vmul.f32 -1.442695, %v3521_v13  ;;  %4743 = vtanh.f32 %v3559_v3  ;;  %v3474_v0 = vpop.f32.mrb[87].mxu0  ;;  %v3515_v9 = vpop.f32.mrb[87].mxu1 }
 0x9a0   :  { %4745 = vtanh.f32 %v3560_v33  ;;  %v4379_v2 = vmul.f32 -1.442695, %v3522_v35 }
 0x9a1   :  { %4747 = vpow2.f32 %v4378_v52 }
 0x9a2   :  { %4749 = vpow2.f32 %v4376_v56 }
 0x9a3   :  { %4751 = vpow2.f32 %v4379_v2  ;;  %v4530_v2 = vld [vmem:[#allocation11 + $0x38] sm:$0xff]  }
 0x9a9   :  { %v4744_v8 = vpop.eup %4743 }
 0x9aa   :  { %v4746_v36 = vpop.eup %4745  ;;  %v3564_v12 = vmul.f32 %v4744_v8, %v4738_v22  ;;  %v4975_v8 = vmov 0.0  }
 0x9ab   :  { %v4748_v28 = vpop.eup %4747  ;;  %v3567_v45 = vmul.f32 %v4746_v36, %v4742_v55  ;;  %v4531_v55 = vld [vmem:[#allocation12] sm:$0xff]   ;;  %v4532_v36 = vld [vmem:[#allocation12 + $0x8] sm:$0xff]  }
 0x9ac   :  { %v3545_v58 = vadd.f32 1.0, %v4748_v28  ;;  %v6669_v13 = vadd.f32 %v3564_v12, %v3563_v29  ;;  %v4750_v3 = vpop.eup %4749  ;;  %v4533_v29 = vld [vmem:[#allocation12 + $0x10] sm:$0xff]   ;;  %v4534_v12 = vld [vmem:[#allocation12 + $0x18] sm:$0xff]  }
 0x9ad   :  { %v4752_v40 = vpop.eup %4751  ;;  %v3543_v14 = vadd.f32 1.0, %v4750_v3  ;;  %v7869_v28 = vld [vmem:[#allocation161_spill] sm:$0xff] }
 0x9ae   :  { %4753 = vrcp.f32 %v3545_v58  ;;  %v3546_v33 = vadd.f32 1.0, %v4752_v40  ;;  %v7870_v58 = vld [vmem:[#allocation162_spill] sm:$0xff]  ;;  %v4535_v40 = vld [vmem:[#allocation12 + $0x20] sm:$0xff]  }
 0x9af   :  { %4755 = vtanh.f32 %v6669_v13  ;;  %v1168_v3 = vunpack.c.l.bf16 %v7870_v58 }
 0x9b0   :  { %4757 = vrcp.f32 %v3543_v14 }
 0x9b1   :  { %4759 = vrcp.f32 %v3546_v33  ;;  %v1167_v33 = vunpack.c.h.bf16 %v7869_v28 }
 0x9b8   :  { %v4754_v39 = vpop.eup %4753 }
 0x9b9   :  { %v3566_v35 = vmul.f32 %v4754_v39, %v6523_v23  ;;  %v4756_v63 = vpop.eup %4755  ;;  %v4529_v23 = vld [vmem:[#allocation11 + $0x78] sm:$0xff]  }
 0x9ba   :  { %v4758_v7 = vpop.eup %4757 }
 0x9bb   :  { %v6673_v20 = vadd.f32 %v3567_v45, %v3566_v35  ;;  %v4760_v17 = vpop.eup %4759  ;;  %v3570_v0 = vmul.f32 %v4758_v7, %v4756_v63  ;;  %v1166_v45 = vunpack.c.l.bf16 %v7869_v28  ;;  %v7871_v35 = vld [vmem:[#allocation148_spill] sm:$0xff] }
 0x9bc   :  { %v1156_v63 = vunpack.c.h.bf16 %v7871_v35 }
 0x9bd   :  { %4761 = vtanh.f32 %v6673_v20  ;;  %v6676_v56 = vpack.c.bf16 %v3570_v0, %v3570_v0 }
 0x9c7   :  { %v4762_v52 = vpop.eup %4761 }
 0x9c8   :  { %v3572_v9 = vmul.f32 %v4762_v52, %v4760_v17 }
 0x9ca   :  { %v3574_v22 = vpack.c.bf16 %v3572_v9, %v3572_v9 }
 0x9cc   :  { %3607 = vmatprep.mubr.bf16.mxu0 %v3574_v22  ;;  %3648 = vmatprep.mubr.bf16.mxu1 %v3574_v22 }
 0x9cd   :  { %3608 = vmatmul.mubr.bf16.vlgmr.msra.gmra.mrb[88].mxu0 %v6676_v56  ;;  %3649 = vmatmul.mubr.bf16.vlgmr.msra.gmra.mrb[88].mxu1 %v6676_v56 }
 0x9ce   :  { %3658 = vmatpush1.bf16.msra.mxu0 %v7269_v5  ;;  %3699 = vmatpush1.bf16.msra.mxu1 %v7270_v15  ;;  %v7845_v5 = vld [vmem:[#allocation124_spill] sm:$0xff]  ;;  %v7846_v15 = vld [vmem:[#allocation125_spill] sm:$0xff] }
 0x9cf   :  { %3689 = vmatprep.mubr.bf16.mxu0 %v3574_v22  ;;  %3730 = vmatprep.mubr.bf16.mxu1 %v3574_v22 }
 0x9d0   :  { %3659 = vmatprep.subr.bf16.mxu0 %v7271_v32  ;;  %3700 = vmatprep.subr.bf16.mxu1 %v7272_v62  ;;  %v7847_v32 = vld [vmem:[#allocation126_spill] sm:$0xff]  ;;  %v7848_v62 = vld [vmem:[#allocation127_spill] sm:$0xff] }
 0x9d2   :  { %3660 = vmatpush1.bf16.msra.mxu0 %v7273_v51  ;;  %3701 = vmatpush1.bf16.msra.mxu1 %v7274_v16  ;;  %v7849_v51 = vld [vmem:[#allocation128_spill] sm:$0xff]  ;;  %v7850_v16 = vld [vmem:[#allocation129_spill] sm:$0xff] }
 0x9d3   :  { %3661 = vmatprep.subr.bf16.mxu0 %v7275_v4  ;;  %3702 = vmatprep.subr.bf16.mxu1 %v7276_v60  ;;  %v7851_v4 = vld [vmem:[#allocation130_spill] sm:$0xff]  ;;  %v7852_v60 = vld [vmem:[#allocation131_spill] sm:$0xff] }
 0x9d6   :  { %3662 = vmatpush1.bf16.msra.mxu0 %v7277_v11  ;;  %3703 = vmatpush1.bf16.msra.mxu1 %v7278_v61  ;;  %v7853_v11 = vld [vmem:[#allocation132_spill] sm:$0xff]  ;;  %v7854_v61 = vld [vmem:[#allocation133_spill] sm:$0xff] }
 0x9d7   :  { %3663 = vmatprep.subr.bf16.mxu0 %v7279_v10  ;;  %3704 = vmatprep.subr.bf16.mxu1 %v7280_v48  ;;  %v7855_v10 = vld [vmem:[#allocation134_spill] sm:$0xff]  ;;  %v7856_v48 = vld [vmem:[#allocation135_spill] sm:$0xff] }
 0x9da   :  { %3664 = vmatpush1.bf16.msra.mxu0 %v7365_v6  ;;  %3705 = vmatpush1.bf16.msra.mxu1 %v7366_v24  ;;  %v7858_v6 = vld [vmem:[#allocation137_spill] sm:$0xff]  ;;  %v7859_v24 = vld [vmem:[#allocation138_spill] sm:$0xff] }
 0x9db   :  { %3665 = vmatprep.subr.bf16.mxu0 %v7367_v38  ;;  %3706 = vmatprep.subr.bf16.mxu1 %v7368_v59  ;;  %v7860_v38 = vld [vmem:[#allocation139_spill] sm:$0xff]  ;;  %v7861_v59 = vld [vmem:[#allocation140_spill] sm:$0xff] }
 0x9de   :  { %3666 = vmatpush1.bf16.msra.mxu0 %v7369_v46  ;;  %3707 = vmatpush1.bf16.msra.mxu1 %v7370_v42  ;;  %v7862_v46 = vld [vmem:[#allocation141_spill] sm:$0xff]  ;;  %v7863_v42 = vld [vmem:[#allocation142_spill] sm:$0xff] }
 0x9df   :  { %3667 = vmatprep.subr.bf16.mxu0 %v7371_v30  ;;  %3708 = vmatprep.subr.bf16.mxu1 %v7372_v26  ;;  %v7864_v30 = vld [vmem:[#allocation143_spill] sm:$0xff]  ;;  %v7865_v26 = vld [vmem:[#allocation144_spill] sm:$0xff] }
 0x9e2   :  { %3668 = vmatpush1.bf16.msra.mxu0 %v7373_v34  ;;  %3709 = vmatpush1.bf16.msra.mxu1 %v7374_v47  ;;  %v7866_v34 = vld [vmem:[#allocation145_spill] sm:$0xff]  ;;  %v7867_v47 = vld [vmem:[#allocation146_spill] sm:$0xff] }
 0x9e3   :  { %3669 = vmatprep.subr.bf16.mxu0 %v7375_v19  ;;  %3710 = vmatprep.subr.bf16.mxu1 %v7376_v21  ;;  %v7868_v19 = vld [vmem:[#allocation147_spill] sm:$0xff] }
 0x9e4   :  { %v4515_v21 = vld [vmem:[#allocation11 + $0x40] sm:$0xff]  }
 0x9e6   :  { %3670 = vmatpush1.bf16.msra.mxu0 %v7461_v18  ;;  %3711 = vmatpush1.bf16.msra.mxu1 %v7462_v1  ;;  %v4526_v18 = vld [vmem:[#allocation11 + $0x28] sm:$0xff]   ;;  %v4527_v1 = vld [vmem:[#allocation11 + $0x70] sm:$0xff]  }
 0x9e7   :  { %3671 = vmatprep.subr.bf16.mxu0 %v7379_v53  ;;  %3712 = vmatprep.subr.bf16.mxu1 %v7380_v41  ;;  %v4518_v53 = vld [vmem:[#allocation11 + $0x8] sm:$0xff]   ;;  %v4519_v41 = vld [vmem:[#allocation11 + $0x50] sm:$0xff]  }
 0x9ea   :  { %3672 = vmatpush1.bf16.msra.mxu0 %v7381_v43  ;;  %3713 = vmatpush1.bf16.msra.mxu1 %v7463_v25  ;;  %v4520_v43 = vld [vmem:[#allocation11 + $0x10] sm:$0xff]  }
 0x9eb   :  { %3673 = vmatprep.subr.bf16.mxu0 %v7383_v31  ;;  %3714 = vmatprep.subr.bf16.mxu1 %v7384_v54  ;;  %v4521_v31 = vld [vmem:[#allocation11 + $0x58] sm:$0xff]   ;;  %v4528_v25 = vld [vmem:[#allocation11 + $0x30] sm:$0xff]  }
 0x9ec   :  { %v4522_v54 = vld [vmem:[#allocation11 + $0x18] sm:$0xff]  }
 0x9ee   :  { %3674 = vmatpush1.bf16.msra.mxu0 %v7385_v57  ;;  %3715 = vmatpush1.bf16.msra.mxu1 %v7386_v44  ;;  %v4523_v57 = vld [vmem:[#allocation11 + $0x60] sm:$0xff]  }
 0x9ef   :  { %3675 = vmatprep.subr.bf16.mxu0 %v7387_v37  ;;  %3716 = vmatprep.subr.bf16.mxu1 %v7388_v27  ;;  %v4516_v27 = vld [vmem:[#allocation11] sm:$0xff]   ;;  %v4525_v37 = vld [vmem:[#allocation11 + $0x68] sm:$0xff]  }
 0x9f0   :  { %v4524_v44 = vld [vmem:[#allocation11 + $0x20] sm:$0xff]  }
 0x9f2   :  { %3676 = vmatpush1.bf16.msra.mxu0 %v7389_v50  ;;  %3717 = vmatpush1.bf16.msra.mxu1 %v7306_v49  ;;  %v7857_v49 = vld [vmem:[#allocation136_spill] sm:$0xff] }
 0x9f3   :  { %3677 = vmatprep.subr.bf16.mxu0 %v7845_v5  ;;  %3718 = vmatprep.subr.bf16.mxu1 %v7846_v15  ;;  %v4517_v50 = vld [vmem:[#allocation11 + $0x48] sm:$0xff]  }
 0x9f6   :  { %3678 = vmatpush1.bf16.msra.mxu0 %v7847_v32  ;;  %3719 = vmatpush1.bf16.msra.mxu1 %v7848_v62  ;;  %v4536_v62 = vld [vmem:[#allocation12 + $0x28] sm:$0xff]  }
 0x9f7   :  { %3679 = vmatprep.subr.bf16.mxu0 %v7849_v51  ;;  %3720 = vmatprep.subr.bf16.mxu1 %v7850_v16 }
 0x9fa   :  { %3680 = vmatpush1.bf16.msra.mxu0 %v7851_v4  ;;  %3721 = vmatpush1.bf16.msra.mxu1 %v7852_v60 }
 0x9fb   :  { %3681 = vmatprep.subr.bf16.mxu0 %v7853_v11  ;;  %3722 = vmatprep.subr.bf16.mxu1 %v7854_v61 }
 0x9fe   :  { %3682 = vmatpush1.bf16.msra.mxu0 %v7855_v10  ;;  %3723 = vmatpush1.bf16.msra.mxu1 %v7856_v48 }
 0x9ff   :  { %3683 = vmatprep.subr.bf16.mxu0 %v7857_v49  ;;  %3724 = vmatprep.subr.bf16.mxu1 %v7858_v6 }
 0xa02   :  { %3684 = vmatpush1.bf16.msra.mxu0 %v7859_v24  ;;  %3725 = vmatpush1.bf16.msra.mxu1 %v7860_v38  ;;  %v7872_v24 = vld [vmem:[#allocation163_spill] sm:$0xff] }
 0xa03   :  { %3685 = vmatprep.subr.bf16.mxu0 %v7861_v59  ;;  %3726 = vmatprep.subr.bf16.mxu1 %v7862_v46  ;;  %v1157_v38 = vunpack.c.l.bf16 %v7872_v24  ;;  %v7873_v59 = vld [vmem:[#allocation176_spill] sm:$0xff] }
 0xa04   :  { %v1172_v46 = vunpack.c.l.bf16 %v7873_v59 }
 0xa06   :  { %3686 = vmatpush1.bf16.msra.mxu0 %v7863_v42  ;;  %3727 = vmatpush1.bf16.msra.mxu1 %v7864_v30 }
 0xa07   :  { %3687 = vmatprep.subr.bf16.mxu0 %v7865_v26  ;;  %3728 = vmatprep.subr.bf16.mxu1 %v7866_v34  ;;  %v1158_v26 = vunpack.c.h.bf16 %v7872_v24  ;;  %v7874_v34 = vld [vmem:[#allocation164_spill] sm:$0xff] }
 0xa0a   :  { %3688 = vmatpush1.bf16.msra.mxu0 %v7867_v47  ;;  %3729 = vmatpush1.bf16.msra.mxu1 %v7868_v19  ;;  %v1160_v47 = vunpack.c.h.bf16 %v7874_v34 }
 0xa0b   :  { %4445 = vmatprep.subr.bf16.mxu0 %v4515_v21  ;;  %4476 = vmatprep.subr.bf16.mxu1 %v4975_v8 }
 0xa0d   :  { %3690 = vmatmul.mubr.bf16.vlgmr.msra.gmra.mrb[92].mxu0 %v6676_v56  ;;  %3731 = vmatmul.mubr.bf16.vlgmr.msra.gmra.mrb[92].mxu1 %v6676_v56 }
 0xa0e   :  { %4446 = vmatpush3.bf16.msra.mxu0 %v4516_v27  ;;  %4477 = vmatpush3.bf16.msra.mxu1 %v4531_v55 }
 0xa0f   :  { %4447 = vmatprep.subr.bf16.mxu0 %v4517_v50  ;;  %4478 = vmatprep.subr.bf16.mxu1 %v4975_v8 }
 0xa10   :  { %4492 = vmatprep.mubr.msk.bf16.mxu1 %vm4976_vm0, %v4975_v8 }
 0xa12   :  { %4448 = vmatpush3.bf16.msra.mxu0 %v4518_v53  ;;  %4479 = vmatpush3.bf16.msra.mxu1 %v4532_v36 }
 0xa13   :  { %4449 = vmatprep.subr.bf16.mxu0 %v4519_v41  ;;  %4480 = vmatprep.subr.bf16.mxu1 %v4975_v8 }
 0xa16   :  { %4450 = vmatpush3.bf16.msra.mxu0 %v4520_v43  ;;  %4481 = vmatpush3.bf16.msra.mxu1 %v4533_v29 }
 0xa17   :  { %4451 = vmatprep.subr.bf16.mxu0 %v4521_v31  ;;  %4482 = vmatprep.subr.bf16.mxu1 %v4975_v8 }
 0xa1a   :  { %4452 = vmatpush3.bf16.msra.mxu0 %v4522_v54  ;;  %4483 = vmatpush3.bf16.msra.mxu1 %v4534_v12 }
 0xa1b   :  { %4453 = vmatprep.subr.bf16.mxu0 %v4523_v57  ;;  %4484 = vmatprep.subr.bf16.mxu1 %v4975_v8 }
 0xa1e   :  { %4454 = vmatpush3.bf16.msra.mxu0 %v4524_v44  ;;  %4485 = vmatpush3.bf16.msra.mxu1 %v4535_v40 }
 0xa1f   :  { %4455 = vmatprep.subr.bf16.mxu0 %v4525_v37  ;;  %4486 = vmatprep.subr.bf16.mxu1 %v4975_v8 }
 0xa22   :  { %4456 = vmatpush3.bf16.msra.mxu0 %v4526_v18  ;;  %4487 = vmatpush3.bf16.msra.mxu1 %v4536_v62 }
 0xa23   :  { %4457 = vmatprep.subr.bf16.mxu0 %v4527_v1  ;;  %4488 = vmatprep.subr.bf16.mxu1 %v4975_v8 }
 0xa26   :  { %4458 = vmatpush3.bf16.msra.mxu0 %v4528_v25 }
 0xa27   :  { %4459 = vmatprep.subr.bf16.mxu0 %v4529_v23 }
 0xa2a   :  { %4460 = vmatpush3.bf16.msra.mxu0 %v4530_v2 }
 0xaa0   :  { %v3609_v14 = vpop.f32.mrb[88].mxu0  ;;  %v3650_v39 = vpop.f32.mrb[88].mxu1 }
 0xaa1   :  { %v3739_v7 = vadd.f32 %v3609_v14, %v1166_v45  ;;  %v3741_v17 = vadd.f32 %v3650_v39, %v1168_v3  ;;  %v3611_v52 = vpop.f32.mrb[89].mxu0  ;;  %v3652_v0 = vpop.f32.mrb[89].mxu1 }
 0xaa2   :  { %v3740_v9 = vadd.f32 %v3611_v52, %v1167_v33  ;;  %v3742_v22 = vadd.f32 %v3652_v0, %v1156_v63  ;;  %v3613_v56 = vpop.f32.mrb[90].mxu0  ;;  %v3654_v5 = vpop.f32.mrb[90].mxu1 }
 0xaa3   :  { %v3614_v15 = vpop.f32.mrb[91].mxu0  ;;  %v3655_v32 = vpop.f32.mrb[91].mxu1  ;;  %v4380_v51 = vmul.f32 -1.442695, %v3739_v7  ;;  %v4382_v10 = vmul.f32 -1.442695, %v3741_v17 }
 0xaa4   :  { %v4381_v16 = vmul.f32 -1.442695, %v3740_v9  ;;  %v4383_v4 = vmul.f32 -1.442695, %v3742_v22  ;;  %v4537_v56 = vld [vmem:[#allocation12 + $0x30] sm:$0xff]   ;;  %v4538_v5 = vld [vmem:[#allocation12 + $0x38] sm:$0xff]  }
 0xaa5   :  { %4763 = vpow2.f32 %v4380_v51  ;;  %4489 = vmatpush3.bf16.msra.mxu1 %v4537_v56  ;;  %v4386_v15 = vld [vmem:[%s6786_s5] ss:$0 sm:$0xff]  ;;  %s4977_s5 = smov [#allocation14]  }
 0xaa6   :  { %4765 = vpow2.f32 %v4381_v16  ;;  %4490 = vmatprep.subr.bf16.mxu1 %v4975_v8  ;;  %s4098_s22 = sshll.u32 %s4977_s5, 4  ;;  %s4099_s22 = int_to_ptr.vmem [resolvable:$true] %s4098_s22 }
 0xaa7   :  { %4767 = vpow2.f32 %v4383_v4  ;;  %s4931_s10 = scalar_lea.vmem %s4099_s22, 128  ;;  %p4936_p7 = scmp.lt.s32.totalorder %s4099_s22, %s4099_s22 }
 0xaa8   :  { %4769 = vpow2.f32 %v4382_v10  ;;  %p4932_p6 = scmp.ne.s32.totalorder %s4099_s22, %s4931_s10  ;;  %p4937_p8 = scmp.lt.s32.totalorder %s4931_s10, %s4931_s10 }
 0xaa9   :  { %4491 = vmatpush3.bf16.msra.mxu1 %v4538_v5 }
 0xaaa   :  { %p4938_p9 = por %p4937_p8, %p4936_p7 }
 0xaac   :  { %p4939_p10 = pnand %p4938_p9, %p4932_p6 }
 0xaaf   :  { %v4764_v60 = vpop.eup %4763 }
 0xab0   :  { %v4766_v11 = vpop.eup %4765  ;;  %v3763_v48 = vadd.f32 1.0, %v4764_v60 }
 0xab1   :  { %v4768_v61 = vpop.eup %4767  ;;  %v3764_v49 = vadd.f32 1.0, %v4766_v11 }
 0xab2   :  { %v3766_v6 = vadd.f32 1.0, %v4768_v61  ;;  %4771 = vrcp.f32 %v3763_v48  ;;  %v4770_v37 = vpop.eup %4769  ;;  %v4403_v61 = vld [vmem:[%s6788_s7] ss:$0 sm:$0xff] }
 0xab3   :  { %4773 = vrcp.f32 %v3764_v49  ;;  %v3765_v55 = vadd.f32 1.0, %v4770_v37 }
 0xab4   :  { %4775 = vrcp.f32 %v3766_v6 }
 0xabc   :  { %v4772_v18 = vpop.eup %4771 }
 0xabd   :  { %v4774_v1 = vpop.eup %4773 }
 0xabe   :  { %v4776_v23 = vpop.eup %4775  ;;  %v3785_v29 = vmul.f32 %v4774_v1, %v6669_v13 }
 0xae0   :  { %v3691_v42 = vpop.f32.mrb[92].mxu0  ;;  %v3732_v30 = vpop.f32.mrb[92].mxu1 }
 0xae1   :  { %v3743_v19 = vadd.f32 %v3691_v42, %v1157_v38  ;;  %v3781_v21 = vadd.f32 %v3732_v30, %v1172_v46  ;;  %v3693_v27 = vpop.f32.mrb[93].mxu0  ;;  %v3734_v50 = vpop.f32.mrb[93].mxu1 }
 0xae2   :  { %v3744_v53 = vadd.f32 %v3693_v27, %v1158_v26  ;;  %v3782_v41 = vadd.f32 %v3734_v50, %v1160_v47  ;;  %v3695_v43 = vpop.f32.mrb[94].mxu0  ;;  %v3736_v31 = vpop.f32.mrb[94].mxu1 }
 0xae3   :  { %v4384_v54 = vmul.f32 -1.442695, %v3743_v19  ;;  %4777 = vtanh.f32 %v3781_v21  ;;  %v3696_v57 = vpop.f32.mrb[95].mxu0  ;;  %v3737_v44 = vpop.f32.mrb[95].mxu1 }
 0xae4   :  { %4779 = vtanh.f32 %v3782_v41  ;;  %v4385_v25 = vmul.f32 -1.442695, %v3744_v53 }
 0xae5   :  { %4781 = vpow2.f32 %v4384_v54 }
 0xae6   :  { %4783 = vpow2.f32 %v4385_v25 }
 0xae7   :  { %4785 = vrcp.f32 %v3765_v55 }
 0xaed   :  { %v4778_v2 = vpop.eup %4777 }
 0xaee   :  { %v4780_v36 = vpop.eup %4779  ;;  %v3786_v12 = vmul.f32 %v4778_v2, %v4772_v18 }
 0xaef   :  { %v4782_v28 = vpop.eup %4781  ;;  %v3789_v45 = vmul.f32 %v4780_v36, %v4776_v23 }
 0xaf0   :  { %v3767_v58 = vadd.f32 1.0, %v4782_v28  ;;  %v3787_v3 = vadd.f32 %v3786_v12, %v3785_v29  ;;  %v4784_v40 = vpop.eup %4783 }
 0xaf1   :  { %v4786_v14 = vpop.eup %4785  ;;  %v3768_v33 = vadd.f32 1.0, %v4784_v40 }
 0xaf2   :  { %4787 = vrcp.f32 %v3767_v58 }
 0xaf3   :  { %4789 = vtanh.f32 %v3787_v3 }
 0xaf4   :  { %4791 = vrcp.f32 %v3768_v33 }
 0xafc   :  { %v4788_v39 = vpop.eup %4787 }
 0xafd   :  { %v4790_v35 = vpop.eup %4789  ;;  %v3788_v63 = vmul.f32 %v4788_v39, %v6673_v20 }
 0xafe   :  { %v3792_v7 = vmul.f32 %v4790_v35, %v4786_v14  ;;  %v4792_v13 = vpop.eup %4791 }
 0xaff   :  { %v3790_v17 = vadd.f32 %v3789_v45, %v3788_v63 }
 0xb00   :  { %v3795_v22 = vpack.c.bf16 %v3792_v7, %v3792_v7 }
 0xb01   :  { %4793 = vtanh.f32 %v3790_v17 }
 0xb0b   :  { %v4794_v52 = vpop.eup %4793 }
 0xb0c   :  { %v3794_v0 = vmul.f32 %v4794_v52, %v4792_v13 }
 0xb0e   :  { %v3796_v9 = vpack.c.bf16 %v3794_v0, %v3794_v0 }
 0xb10   :  { %3964 = vmatprep.mubr.bf16.mxu0 %v3796_v9 }
 0xb11   :  { %3965 = vmatmul.mubr.bf16.vlgmr.msra.gmra.mrb[96].mxu0 %v3795_v22 }
 0xbe4   :  { %v4461_v20 = vpop.f32.mrb[96].mxu0 }
 0xbe5   :  { %v4462_v32 = vpop.f32.mrb[97].mxu0 }
 0xbe6   :  { %v4463_v62 = vadd.f32 %v4462_v32, %v4461_v20  ;;  %v4464_v51 = vpop.f32.mrb[98].mxu0 }
 0xbe7   :  { %v4465_v16 = vpop.f32.mrb[99].mxu0 }
 0xbe8   :  { %v3967_v4 = vadd.f32 %v4463_v62, %v4386_v15 }
 0xbea   :  { %v3972_v60 = vmax.f32 %v3967_v4, 0.0 }
 0xbec   :  { %v3973_v11 = vpack.c.bf16 %v3972_v60, %v3972_v60 }
 0xbee   :  { %4493 = vmatmul.mubr.bf16.vlgmr.msra.gmra.mrb[96].mxu1 %v3973_v11 }
 0xcc1   :  { %v4079_v10 = vpop.f32.mrb[96].mxu1 }
 0xcc2   :  { %v4080_v48 = vadd.f32 %v4403_v61, %v4079_v10  ;;  %v4494_v8 = vpop.f32.mrb[97].mxu1 }
 0xcc3   :  { %v4082_v49 = vpop.f32.mrb[98].mxu1 }
 0xcc4   :  { %v4412_v6 = vmul.f32 -1.442695, %v4080_v48  ;;  %v4495_v24 = vpop.f32.mrb[99].mxu1 }
 0xcc6   :  { %4795 = vpow2.f32 %v4412_v6 }
 0xcd0   :  { %v4796_v38 = vpop.eup %4795 }
 0xcd1   :  { %v4088_v59 = vadd.f32 1.0, %v4796_v38 }
 0xcd3   :  { %4797 = vrcp.f32 %v4088_v59 }
 0xcdd   :  { %v4798_v46 = vpop.eup %4797 }
 0xcde   :  { %4091 = vst [vmem:[#allocation14] sm:$0xff] %v4798_v46 }
 0xcdf   :  { %4942 = shalt.err (!%p4939_p10)
}
 0xce0   :  { %s4943_s12 = scalar_lea.hbm %s6789_s8, 128 }
 0xce1   :  { %p4944_p11 = scmp.ne.s32.totalorder %s6789_s8, %s4943_s12  ;;  %p4947_p12 = scmp.lt.u32.totalorder %s4943_s12, %s6789_s8 }
 0xce3   :  { %p4949_p13 = pnand %p4947_p12, %p4944_p11 }
 0xce5   :  { %4952 = shalt.err (!%p4949_p13)
}
 0xce6   :  { %4101 = dma.vmem_to_hbm [thread:$0]  %s4099_s22, 128, %s6789_s8, [#allocation5]  }
 0xce7   :  { %4961 = dma.done.wait [#allocation5], 128  }
 0xce8   :  { %4962 = vsyncadd [#allocation5], 4294967168 }
 0xce9   :  { %4105 = vsyncpa [#allocation4], 1 }
 0xcea   :  { %4106 = vsyncpa [#allocation7], 1 }
 0xceb   :  { %4107 = vsyncpa [#allocation10], 1 }
 0xcec   :  { %4108 = vsyncpa [#allocation13], 1 }
 0xced   :  { %4109 = vsyncpa [#allocation5], 1 }

</bundles_post_ra>
